<compile_context>
chip_gen: v7x
topology: tpu7x:2x2x1
jax: 0.10.0
libtpu: 0.0.40
codegen_flags: <defaults>
</compile_context>

<pallas_src>
import numpy as np
import jax
import jax.numpy as jnp
from jax import lax
from jax.experimental import pallas as pl
from jax.experimental.pallas import tpu as pltpu

# ----------------------------- small T5 config ------------------------------
VOCAB = 64
D_MODEL = 32
N_HEADS = 4
D_KV = 8                           # inner_dim = N_HEADS * D_KV
INNER = N_HEADS * D_KV
D_FF = 64
N_LAYERS = 2
NUM_BUCKETS = 32
MAX_DISTANCE = 128
PLANES = 64                        # make_head: nn.Linear(d_model, planes, bias=False)
HEAD_PAD = ((PLANES + 127) // 128) * 128   # lane-dense pooled-head store
EPS = 1e-6
NEG = -1e9                         # finite large-negative mask (avoids -inf -> NaN)

# Row indices inside the stacked RMSNorm-weight array:
#   [enc(l0 ln1,ln2), enc(l1 ...), dec(l0 ln1,ln2,ln3), dec(l1 ...), enc_final, dec_final]
_LN_DEC_BASE = 2 * N_LAYERS
_LN_ENC_FINAL = 2 * N_LAYERS + 3 * N_LAYERS
_LN_DEC_FINAL = _LN_ENC_FINAL + 1


# ------------------------------ the fused kernel -----------------------------
def _make_kernel(Bt):
    """Kernel closure over the per-grid-step batch block size Bt."""

    def kernel(rows_ref,        # (B,)  int32 SMEM: pooled row index (bi*S + argmax)
               x_ref,           # (Bt*S, D)           f32  embedded ids, batch folded
               bias_ref,        # (3*H, Bt*S, Bt*S)   f32  [enc | dec-self | cross] block-diag
               ln_ref,          # (5L+2, 1, D)        f32  RMSNorm weights (dec-final pre-scaled)
               qkv_ref,         # (2L, D, 3*INNER)    bf16 fused self-attn qkv (enc then dec)
               o_ref,           # (3L, H, Dk, D)      bf16 enc_o / dec_o / dec_cross_o
               wi_ref,          # (2L, D, FF)         bf16
               wo_ref,          # (2L, FF, D)         bf16
               cq_ref,          # (L, D, INNER)       bf16 cross-attn q
               ckv_ref,         # (L, D, 2*INNER)     bf16 cross-attn fused kv
               head_ref,        # (D, HEAD_PAD)       bf16 pooling head (lane-padded)
               head_out_ref,    # (Bt, HEAD_PAD)      f32
               logits_ref):     # (Bt*S, D)           f32
        x = x_ref[...]

        def rms(h, idx):
            # T5LayerNorm: RMS norm, no mean subtraction; f32 VPU math.
            var = jnp.mean(h * h, axis=-1, keepdims=True)
            return h * lax.rsqrt(var + EPS) * ln_ref[idx]

        def dot(a, w):
            # bf16 MXU operands, f32 accumulation.
            return jnp.dot(a.astype(jnp.bfloat16), w,
                           preferred_element_type=jnp.float32)

        def mha(q, k, v, bias_off, o_idx):
            """Multi-head attention on batch-folded rows.

            The bias is block-diagonal over the Bt batch elements (-1e9 in
            cross-batch blocks), so a single (Bt*S, Bt*S) softmax per head is
            exact.  The output projection is folded per head:
            concat_h(ctx_h) @ Wo == sum_h ctx_h @ Wo_h.  T5 does NOT scale
            scores by 1/sqrt(d_kv).
            """
            out = None
            for h in range(N_HEADS):
                sl = slice(h * D_KV, (h + 1) * D_KV)
                s = lax.dot_general(q[:, sl].astype(jnp.bfloat16),
                                    k[:, sl].astype(jnp.bfloat16),
                                    (((1,), (1,)), ((), ())),
                                    preferred_element_type=jnp.float32)
                s = s + bias_ref[bias_off + h]
                m = jnp.max(s, axis=-1, keepdims=True)
                p = jnp.exp(s - m)
                p = p * pl.reciprocal(jnp.sum(p, axis=-1, keepdims=True), approx=True)
                ctx = jnp.dot(p.astype(jnp.bfloat16), v[:, sl].astype(jnp.bfloat16),
                              preferred_element_type=jnp.float32)
                oh = jnp.dot(ctx.astype(jnp.bfloat16), o_ref[o_idx, h],
                             preferred_element_type=jnp.float32)
                out = oh if out is None else out + oh
            return out

        # --------------------------------- encoder ---------------------------
        h = x
        for l in range(N_LAYERS):
            n = rms(h, 2 * l)
            qkv = dot(n, qkv_ref[l])
            q, k, v = qkv[:, :INNER], qkv[:, INNER:2 * INNER], qkv[:, 2 * INNER:]
            h = h + mha(q, k, v, 0, l)
            n = rms(h, 2 * l + 1)
            h = h + dot(jnp.maximum(dot(n, wi_ref[l]), 0.0), wo_ref[l])
        enc_out = rms(h, _LN_ENC_FINAL)

        # --------------------------------- decoder ---------------------------
        h = x                                       # decoder_input_ids == input_ids
        for l in range(N_LAYERS):
            # causal + padding self-attention
            n = rms(h, _LN_DEC_BASE + 3 * l)
            qkv = dot(n, qkv_ref[N_LAYERS + l])
            q, k, v = qkv[:, :INNER], qkv[:, INNER:2 * INNER], qkv[:, 2 * INNER:]
            h = h + mha(q, k, v, N_HEADS, N_LAYERS + l)
            # cross attention (keys/values from encoder output)
            n = rms(h, _LN_DEC_BASE + 3 * l + 1)
            q = dot(n, cq_ref[l])
            kv = dot(enc_out, ckv_ref[l])
            h = h + mha(q, kv[:, :INNER], kv[:, INNER:], 2 * N_HEADS,
                        2 * N_LAYERS + l)
            # feed forward
            n = rms(h, _LN_DEC_BASE + 3 * l + 2)
            h = h + dot(jnp.maximum(dot(n, wi_ref[N_LAYERS + l]), 0.0),
                        wo_ref[N_LAYERS + l])

        # final norm; d_model**-0.5 tie-embedding rescale is folded into the
        # weight on the host; lm_head = nn.Identity()
        seq = rms(h, _LN_DEC_FINAL)
        logits_ref[...] = seq

        # pooled = logits[argmax(input_ids)] via SMEM-prefetched row index,
        # then linear head on a lane-dense (128-wide) padded weight.
        step = pl.program_id(0)
        rows = [logits_ref[pl.ds(rows_ref[step * Bt + bi], 1), :]
                for bi in range(Bt)]
        pooled = rows[0] if Bt == 1 else jnp.concatenate(rows, axis=0)   # (Bt, D)
        head_out_ref[...] = jnp.dot(pooled.astype(jnp.bfloat16), head_ref[...],
                                    preferred_element_type=jnp.float32)

    return kernel


# --------------------------------- JAX glue ----------------------------------
def _relative_position_bucket(relative_position, bidirectional, num_buckets, max_distance):
    relative_buckets = jnp.zeros_like(relative_position)
    if bidirectional:
        num_buckets //= 2
        relative_buckets = relative_buckets + (relative_position > 0).astype(jnp.int32) * num_buckets
        relative_position = jnp.abs(relative_position)
    else:
        relative_position = -jnp.minimum(relative_position, jnp.zeros_like(relative_position))
    max_exact = num_buckets // 2
    is_small = relative_position < max_exact
    rel_fp = jnp.maximum(relative_position, 1).astype(jnp.float32)
    rel_if_large = max_exact + (
        jnp.log(rel_fp / max_exact) / np.log(max_distance / max_exact)
        * (num_buckets - max_exact)
    ).astype(jnp.int32)
    rel_if_large = jnp.minimum(rel_if_large, jnp.full_like(rel_if_large, num_buckets - 1))
    return relative_buckets + jnp.where(is_small, relative_position, rel_if_large)


def compute_position_bias(rel_emb, q_len, k_len, bidirectional):
    ctx = jnp.arange(q_len, dtype=jnp.int32)[:, None]
    mem = jnp.arange(k_len, dtype=jnp.int32)[None, :]
    buckets = _relative_position_bucket(mem - ctx, bidirectional, NUM_BUCKETS, MAX_DISTANCE)
    values = rel_emb[buckets]                                     # (q, k, H)
    return jnp.transpose(values, (2, 0, 1)).astype(jnp.float32)   # (H, q, k)


def _fused_forward(params, input_ids, attention_mask):
    B, S = input_ids.shape
    # v5e/v6e (single TC): one grid step over the whole batch.
    # v7x: keep an even 2-step grid when B allows so both TCs stay busy.
    num_steps = 2 if (B % 2 == 0 and B >= 4) else 1
    Bt = B // num_steps
    BtS = Bt * S
    f32, bf16 = jnp.float32, jnp.bfloat16
    L = N_LAYERS

    # ---- activations: batch folded into the matmul M-dimension --------------
    x = params['emb'][input_ids].astype(f32).reshape(num_steps, BtS, D_MODEL)

    # pooled-gather row index (scalar-prefetched into SMEM): bi*S + argmax
    rows = ((jnp.arange(B, dtype=jnp.int32) % Bt) * S
            + jnp.argmax(input_ids, axis=-1).astype(jnp.int32))

    # ---- biases: everything batch-invariant precomputed here, then
    #      block-diagonalized over the Bt elements folded into each step ------
    mask = attention_mask.astype(f32)                              # (B,S)
    pad = (1.0 - mask)[:, None, None, :] * NEG                     # (B,1,1,S)
    causal = jnp.tril(jnp.ones((S, S), f32))                       # (S,S)
    enc_rel = compute_position_bias(params['enc_rel'], S, S, bidirectional=True)   # (H,S,S)
    dec_rel = compute_position_bias(params['dec_rel'], S, S, bidirectional=False)  # (H,S,S)

    enc_b = enc_rel[None] + pad                                                     # (B,H,S,S)
    dec_b = dec_rel[None] + (1.0 - causal[None, None] * mask[:, None, None, :]) * NEG
    cross_b = jnp.broadcast_to(pad, (B, N_HEADS, S, S))            # no rel-bias in cross-attn

    def blockdiag(b):   # (B,H,S,S) -> (num_steps, H, Bt*S, Bt*S); off-diagonal blocks = NEG
        b = b.reshape(num_steps, Bt, N_HEADS, S, S)
        out = jnp.full((num_steps, N_HEADS, BtS, BtS), NEG, f32)
        for i in range(Bt):
            out = out.at[:, :, i * S:(i + 1) * S, i * S:(i + 1) * S].set(b[:, i])
        return out

    bias_all = jnp.concatenate(
        [blockdiag(enc_b), blockdiag(dec_b), blockdiag(cross_b)], axis=1)  # (steps,3H,BtS,BtS)

    # ---- weights: stacked into few streams; MXU operands cast to bf16 -------
    enc_lns = jnp.stack([params['enc_ln1'], params['enc_ln2']],
                        axis=1).reshape(2 * L, 1, D_MODEL)
    dec_lns = jnp.stack([params['dec_ln1'], params['dec_ln2'], params['dec_ln3']],
                        axis=1).reshape(3 * L, 1, D_MODEL)
    ln_all = jnp.concatenate(
        [enc_lns, dec_lns,
         params['enc_final_ln'][None],
         (params['dec_final_ln'] * (D_MODEL ** -0.5))[None]],      # fold tie-embed rescale
        axis=0).astype(f32)

    qkv_all = jnp.concatenate([params['enc_qkv'], params['dec_qkv']], axis=0).astype(bf16)
    o_all = jnp.concatenate([params['enc_o'], params['dec_o'], params['dec_co']],
                            axis=0).reshape(3 * L, N_HEADS, D_KV, D_MODEL).astype(bf16)
    wi_all = jnp.concatenate([params['enc_wi'], params['dec_wi']], axis=0).astype(bf16)
    wo_all = jnp.concatenate([params['enc_wo'], params['dec_wo']], axis=0).astype(bf16)
    cq = params['dec_cq'].astype(bf16)
    ckv = params['dec_ckv'].astype(bf16)
    head_w = (jnp.zeros((D_MODEL, HEAD_PAD), f32)
              .at[:, :PLANES].set(params['head']).astype(bf16))

    inputs = [x, bias_all, ln_all, qkv_all, o_all, wi_all, wo_all, cq, ckv, head_w]

    def const_spec(a):
        n = a.ndim
        return pl.BlockSpec(a.shape, lambda step, rows_r, _n=n: (0,) * _n)

    in_specs = [
        pl.BlockSpec((None, BtS, D_MODEL), lambda step, rows_r: (step, 0, 0)),
        pl.BlockSpec((None, 3 * N_HEADS, BtS, BtS), lambda step, rows_r: (step, 0, 0, 0)),
    ] + [const_spec(a) for a in inputs[2:]]

    out_shape = (
        jax.ShapeDtypeStruct((num_steps, Bt, HEAD_PAD), f32),      # pooled head (lane-dense)
        jax.ShapeDtypeStruct((num_steps, BtS, D_MODEL), f32),      # logits (identity lm_head)
    )
    out_specs = (
        pl.BlockSpec((None, Bt, HEAD_PAD), lambda step, rows_r: (step, 0, 0)),
        pl.BlockSpec((None, BtS, D_MODEL), lambda step, rows_r: (step, 0, 0)),
    )

    head_out, logits = pl.pallas_call(
        _make_kernel(Bt),
        out_shape=out_shape,
        grid_spec=pltpu.PrefetchScalarGridSpec(
            num_scalar_prefetch=1,
            grid=(num_steps,),
            in_specs=in_specs,
            out_specs=out_specs),
        compiler_params=pltpu.CompilerParams(
            dimension_semantics=("parallel",)),
    )(rows, *inputs)

    return (head_out.reshape(B, HEAD_PAD)[:, :PLANES],
            logits.reshape(B, S, D_MODEL))


def t5_model_forward(params, input_ids, attention_mask, lm_head_type='identy'):
    """T5_Model.forward: decoder_input_ids=input_ids, decoder_attention_mask=attention_mask."""
    head_out, logits = _fused_forward(params, input_ids, attention_mask)
    if lm_head_type == 'identy':
        return head_out, logits
    # default HF path: tied lm_head -> vocab logits (cold path, plain JAX)
    return jnp.einsum('bsd,vd->bsv', logits, params['emb'])


# ----------------------------- parameter init --------------------------------
def init_params(key):
    keys = jax.random.split(key, 40)
    it = iter(keys)

    def nrm(shape, scale=0.05):
        return (scale * jax.random.normal(next(it), shape)).astype(jnp.float32)

    L = N_LAYERS
    ones = lambda *s: jnp.ones(s, jnp.float32)
    params = {
        'emb': nrm((VOCAB, D_MODEL), 1.0),
        'enc_rel': nrm((NUM_BUCKETS, N_HEADS)),
        'dec_rel': nrm((NUM_BUCKETS, N_HEADS)),
        # encoder layer stacks (leading dim = layer)
        'enc_ln1': ones(L, 1, D_MODEL),
        'enc_qkv': nrm((L, D_MODEL, 3 * INNER)),      # fused [Wq|Wk|Wv]
        'enc_o':   nrm((L, INNER, D_MODEL)),
        'enc_ln2': ones(L, 1, D_MODEL),
        'enc_wi':  nrm((L, D_MODEL, D_FF)),
        'enc_wo':  nrm((L, D_FF, D_MODEL)),
        # decoder layer stacks
        'dec_ln1': ones(L, 1, D_MODEL),
        'dec_qkv': nrm((L, D_MODEL, 3 * INNER)),      # fused self-attn [Wq|Wk|Wv]
        'dec_o':   nrm((L, INNER, D_MODEL)),
        'dec_ln2': ones(L, 1, D_MODEL),
        'dec_cq':  nrm((L, D_MODEL, INNER)),          # cross-attn q
        'dec_ckv': nrm((L, D_MODEL, 2 * INNER)),      # fused cross-attn [Wk|Wv]
        'dec_co':  nrm((L, INNER, D_MODEL)),
        'dec_ln3': ones(L, 1, D_MODEL),
        'dec_wi':  nrm((L, D_MODEL, D_FF)),
        'dec_wo':  nrm((L, D_FF, D_MODEL)),
        # final norms + pooling head (make_head: Linear(d_model, planes, bias=False))
        'enc_final_ln': ones(1, D_MODEL),
        'dec_final_ln': ones(1, D_MODEL),
        'head': nrm((D_MODEL, PLANES)),
    }
    return params


# ----------------------------------- main ------------------------------------
if __name__ == "__main__":
    key = jax.random.PRNGKey(0)
    kp, kid = jax.random.split(key)
    params = init_params(kp)

    B, S = 2, 8
    input_ids = jax.random.randint(kid, (B, S), 0, VOCAB, dtype=jnp.int32)
    attention_mask = jnp.ones((B, S), jnp.int32).at[1, -2:].set(0)

    fwd = jax.jit(lambda p, ids, m: t5_model_forward(p, ids, m, lm_head_type='identy'))
    head_out, logits = fwd(params, input_ids, attention_mask)
    jax.block_until_ready((head_out, logits))

    assert head_out.shape == (B, PLANES)
    assert logits.shape == (B, S, D_MODEL)
    assert jnp.all(jnp.isfinite(head_out)) and jnp.all(jnp.isfinite(logits))
    print("KERNEL_OK")
</pallas_src>

<mosaic_0001>
module attributes {stable_mosaic.version = 11 : i64} {
  func.func @kernel(%arg0: i32, %arg1: memref<2xi32, #tpu.memory_space<smem>>, %arg2: memref<1x16x32xf32, #tpu.memory_space<vmem>>, %arg3: memref<1x12x16x16xf32, #tpu.memory_space<vmem>>, %arg4: memref<12x1x32xf32, #tpu.memory_space<vmem>>, %arg5: memref<4x32x96xbf16, #tpu.memory_space<vmem>>, %arg6: memref<6x4x8x32xbf16, #tpu.memory_space<vmem>>, %arg7: memref<4x32x64xbf16, #tpu.memory_space<vmem>>, %arg8: memref<4x64x32xbf16, #tpu.memory_space<vmem>>, %arg9: memref<2x32x32xbf16, #tpu.memory_space<vmem>>, %arg10: memref<2x32x64xbf16, #tpu.memory_space<vmem>>, %arg11: memref<32x128xbf16, #tpu.memory_space<vmem>>, %arg12: memref<1x2x128xf32, #tpu.memory_space<vmem>>, %arg13: memref<1x16x32xf32, #tpu.memory_space<vmem>>) attributes {dimension_semantics = [#tpu.dimension_semantics<parallel>], iteration_bounds = array<i64: 1>, scalar_prefetch = 1 : i64, scratch_operands = 0 : i64, tpu.core_type = #tpu.core_type<tc>, window_params = [{transform_indices = @transform_0, window_bounds = array<i64: 1, 16, 32>}, {transform_indices = @transform_1, window_bounds = array<i64: 1, 12, 16, 16>}, {pipeline_mode = #tpu.pipeline_mode<synchronous>, transform_indices = @transform_2, window_bounds = array<i64: 12, 1, 32>}, {pipeline_mode = #tpu.pipeline_mode<synchronous>, transform_indices = @transform_3, window_bounds = array<i64: 4, 32, 96>}, {pipeline_mode = #tpu.pipeline_mode<synchronous>, transform_indices = @transform_4, window_bounds = array<i64: 6, 4, 8, 32>}, {pipeline_mode = #tpu.pipeline_mode<synchronous>, transform_indices = @transform_5, window_bounds = array<i64: 4, 32, 64>}, {pipeline_mode = #tpu.pipeline_mode<synchronous>, transform_indices = @transform_6, window_bounds = array<i64: 4, 64, 32>}, {pipeline_mode = #tpu.pipeline_mode<synchronous>, transform_indices = @transform_7, window_bounds = array<i64: 2, 32, 32>}, {pipeline_mode = #tpu.pipeline_mode<synchronous>, transform_indices = @transform_8, window_bounds = array<i64: 2, 32, 64>}, {pipeline_mode = #tpu.pipeline_mode<synchronous>, transform_indices = @transform_9, window_bounds = array<i64: 32, 128>}, {transform_indices = @transform_10, window_bounds = array<i64: 1, 2, 128>}, {transform_indices = @transform_11, window_bounds = array<i64: 1, 16, 32>}]} {
    %c0 = arith.constant 0 : index
    %c0_0 = arith.constant 0 : index
    %c0_1 = arith.constant 0 : index
    %0 = vector.load %arg2[%c0, %c0_0, %c0_1] : memref<1x16x32xf32, #tpu.memory_space<vmem>>, vector<1x16x32xf32>
    %1 = vector.shape_cast %0 : vector<1x16x32xf32> to vector<16x32xf32>
    %2 = arith.mulf %1, %1 : vector<16x32xf32>
    %cst = arith.constant dense<0.000000e+00> : vector<16xf32>
    %3 = vector.multi_reduction <add>, %2, %cst [1] : vector<16x32xf32> to vector<16xf32>
    %4 = vector.shape_cast %3 : vector<16xf32> to vector<16x1xf32>
    %cst_2 = arith.constant 3.200000e+01 : f32
    %5 = vector.broadcast %cst_2 : f32 to vector<16x1xf32>
    %6 = arith.divf %4, %5 : vector<16x1xf32>
    %cst_3 = arith.constant 9.99999997E-7 : f32
    %7 = vector.broadcast %cst_3 : f32 to vector<16x1xf32>
    %8 = arith.addf %6, %7 : vector<16x1xf32>
    %9 = math.rsqrt %8 : vector<16x1xf32>
    %10 = vector.broadcast %9 : vector<16x1xf32> to vector<16x32xf32>
    %11 = arith.mulf %1, %10 : vector<16x32xf32>
    %c0_4 = arith.constant 0 : index
    %c0_5 = arith.constant 0 : index
    %c0_6 = arith.constant 0 : index
    %12 = vector.load %arg4[%c0_4, %c0_5, %c0_6] : memref<12x1x32xf32, #tpu.memory_space<vmem>>, vector<1x1x32xf32>
    %13 = vector.shape_cast %12 : vector<1x1x32xf32> to vector<1x32xf32>
    %14 = vector.broadcast %13 : vector<1x32xf32> to vector<16x32xf32>
    %15 = arith.mulf %11, %14 : vector<16x32xf32>
    %c0_7 = arith.constant 0 : index
    %c0_8 = arith.constant 0 : index
    %c0_9 = arith.constant 0 : index
    %16 = vector.load %arg5[%c0_7, %c0_8, %c0_9] : memref<4x32x96xbf16, #tpu.memory_space<vmem>>, vector<1x32x96xbf16>
    %17 = vector.shape_cast %16 : vector<1x32x96xbf16> to vector<32x96xbf16>
    %18 = arith.truncf %15 : vector<16x32xf32> to vector<16x32xbf16>
    %cst_10 = arith.constant dense<0.000000e+00> : vector<16x96xf32>
    %19 = tpu.matmul %18, %17, %cst_10 {dimension_numbers = #tpu.dot_dimension_numbers<[1], [0], [0], [1], [0, 0, 1, 1], [], []>} : vector<16x32xbf16>, vector<32x96xbf16>, vector<16x96xf32> -> vector<16x96xf32>
    %20 = vector.extract_strided_slice %19 {offsets = [0, 0], sizes = [16, 32], strides = [1, 1]} : vector<16x96xf32> to vector<16x32xf32>
    %21 = vector.extract_strided_slice %19 {offsets = [0, 32], sizes = [16, 32], strides = [1, 1]} : vector<16x96xf32> to vector<16x32xf32>
    %22 = vector.extract_strided_slice %19 {offsets = [0, 64], sizes = [16, 32], strides = [1, 1]} : vector<16x96xf32> to vector<16x32xf32>
    %23 = vector.extract_strided_slice %20 {offsets = [0, 0], sizes = [16, 8], strides = [1, 1]} : vector<16x32xf32> to vector<16x8xf32>
    %24 = arith.truncf %23 : vector<16x8xf32> to vector<16x8xbf16>
    %25 = vector.extract_strided_slice %21 {offsets = [0, 0], sizes = [16, 8], strides = [1, 1]} : vector<16x32xf32> to vector<16x8xf32>
    %26 = arith.truncf %25 : vector<16x8xf32> to vector<16x8xbf16>
    %cst_11 = arith.constant dense<0.000000e+00> : vector<16x16xf32>
    %27 = tpu.matmul %24, %26, %cst_11 {dimension_numbers = #tpu.dot_dimension_numbers<[1], [1], [0], [0], [0, 0, 1, 0], [], []>} : vector<16x8xbf16>, vector<16x8xbf16>, vector<16x16xf32> -> vector<16x16xf32>
    %c0_12 = arith.constant 0 : index
    %c0_13 = arith.constant 0 : index
    %c0_14 = arith.constant 0 : index
    %c0_15 = arith.constant 0 : index
    %28 = vector.load %arg3[%c0_12, %c0_13, %c0_14, %c0_15] : memref<1x12x16x16xf32, #tpu.memory_space<vmem>>, vector<1x1x16x16xf32>
    %29 = vector.shape_cast %28 : vector<1x1x16x16xf32> to vector<16x16xf32>
    %30 = arith.addf %27, %29 : vector<16x16xf32>
    %cst_16 = arith.constant dense<0xFF800000> : vector<16xf32>
    %31 = vector.multi_reduction <maximumf>, %30, %cst_16 [1] : vector<16x16xf32> to vector<16xf32>
    %32 = vector.shape_cast %31 : vector<16xf32> to vector<16x1xf32>
    %33 = vector.broadcast %32 : vector<16x1xf32> to vector<16x16xf32>
    %34 = arith.subf %30, %33 : vector<16x16xf32>
    %35 = math.exp %34 : vector<16x16xf32>
    %cst_17 = arith.constant dense<0.000000e+00> : vector<16xf32>
    %36 = vector.multi_reduction <add>, %35, %cst_17 [1] : vector<16x16xf32> to vector<16xf32>
    %37 = vector.shape_cast %36 : vector<16xf32> to vector<16x1xf32>
    %38 = tpu.reciprocal %37 {approx = true} : vector<16x1xf32> -> vector<16x1xf32>
    %39 = vector.broadcast %38 : vector<16x1xf32> to vector<16x16xf32>
    %40 = arith.mulf %35, %39 : vector<16x16xf32>
    %41 = arith.truncf %40 : vector<16x16xf32> to vector<16x16xbf16>
    %42 = vector.extract_strided_slice %22 {offsets = [0, 0], sizes = [16, 8], strides = [1, 1]} : vector<16x32xf32> to vector<16x8xf32>
    %43 = arith.truncf %42 : vector<16x8xf32> to vector<16x8xbf16>
    %cst_18 = arith.constant dense<0.000000e+00> : vector<16x8xf32>
    %44 = tpu.matmul %41, %43, %cst_18 {dimension_numbers = #tpu.dot_dimension_numbers<[1], [0], [0], [1], [0, 0, 1, 1], [], []>} : vector<16x16xbf16>, vector<16x8xbf16>, vector<16x8xf32> -> vector<16x8xf32>
    %45 = arith.truncf %44 : vector<16x8xf32> to vector<16x8xbf16>
    %c0_19 = arith.constant 0 : index
    %c0_20 = arith.constant 0 : index
    %c0_21 = arith.constant 0 : index
    %c0_22 = arith.constant 0 : index
    %46 = vector.load %arg6[%c0_19, %c0_20, %c0_21, %c0_22] : memref<6x4x8x32xbf16, #tpu.memory_space<vmem>>, vector<1x1x8x32xbf16>
    %47 = vector.shape_cast %46 : vector<1x1x8x32xbf16> to vector<8x32xbf16>
    %cst_23 = arith.constant dense<0.000000e+00> : vector<16x32xf32>
    %48 = tpu.matmul %45, %47, %cst_23 {dimension_numbers = #tpu.dot_dimension_numbers<[1], [0], [0], [1], [0, 0, 1, 1], [], []>} : vector<16x8xbf16>, vector<8x32xbf16>, vector<16x32xf32> -> vector<16x32xf32>
    %49 = vector.extract_strided_slice %20 {offsets = [0, 8], sizes = [16, 8], strides = [1, 1]} : vector<16x32xf32> to vector<16x8xf32>
    %50 = arith.truncf %49 : vector<16x8xf32> to vector<16x8xbf16>
    %51 = vector.extract_strided_slice %21 {offsets = [0, 8], sizes = [16, 8], strides = [1, 1]} : vector<16x32xf32> to vector<16x8xf32>
    %52 = arith.truncf %51 : vector<16x8xf32> to vector<16x8xbf16>
    %cst_24 = arith.constant dense<0.000000e+00> : vector<16x16xf32>
    %53 = tpu.matmul %50, %52, %cst_24 {dimension_numbers = #tpu.dot_dimension_numbers<[1], [1], [0], [0], [0, 0, 1, 0], [], []>} : vector<16x8xbf16>, vector<16x8xbf16>, vector<16x16xf32> -> vector<16x16xf32>
    %c0_25 = arith.constant 0 : index
    %c1 = arith.constant 1 : index
    %c0_26 = arith.constant 0 : index
    %c0_27 = arith.constant 0 : index
    %54 = vector.load %arg3[%c0_25, %c1, %c0_26, %c0_27] : memref<1x12x16x16xf32, #tpu.memory_space<vmem>>, vector<1x1x16x16xf32>
    %55 = vector.shape_cast %54 : vector<1x1x16x16xf32> to vector<16x16xf32>
    %56 = arith.addf %53, %55 : vector<16x16xf32>
    %cst_28 = arith.constant dense<0xFF800000> : vector<16xf32>
    %57 = vector.multi_reduction <maximumf>, %56, %cst_28 [1] : vector<16x16xf32> to vector<16xf32>
    %58 = vector.shape_cast %57 : vector<16xf32> to vector<16x1xf32>
    %59 = vector.broadcast %58 : vector<16x1xf32> to vector<16x16xf32>
    %60 = arith.subf %56, %59 : vector<16x16xf32>
    %61 = math.exp %60 : vector<16x16xf32>
    %cst_29 = arith.constant dense<0.000000e+00> : vector<16xf32>
    %62 = vector.multi_reduction <add>, %61, %cst_29 [1] : vector<16x16xf32> to vector<16xf32>
    %63 = vector.shape_cast %62 : vector<16xf32> to vector<16x1xf32>
    %64 = tpu.reciprocal %63 {approx = true} : vector<16x1xf32> -> vector<16x1xf32>
    %65 = vector.broadcast %64 : vector<16x1xf32> to vector<16x16xf32>
    %66 = arith.mulf %61, %65 : vector<16x16xf32>
    %67 = arith.truncf %66 : vector<16x16xf32> to vector<16x16xbf16>
    %68 = vector.extract_strided_slice %22 {offsets = [0, 8], sizes = [16, 8], strides = [1, 1]} : vector<16x32xf32> to vector<16x8xf32>
    %69 = arith.truncf %68 : vector<16x8xf32> to vector<16x8xbf16>
    %cst_30 = arith.constant dense<0.000000e+00> : vector<16x8xf32>
    %70 = tpu.matmul %67, %69, %cst_30 {dimension_numbers = #tpu.dot_dimension_numbers<[1], [0], [0], [1], [0, 0, 1, 1], [], []>} : vector<16x16xbf16>, vector<16x8xbf16>, vector<16x8xf32> -> vector<16x8xf32>
    %71 = arith.truncf %70 : vector<16x8xf32> to vector<16x8xbf16>
    %c0_31 = arith.constant 0 : index
    %c1_32 = arith.constant 1 : index
    %c0_33 = arith.constant 0 : index
    %c0_34 = arith.constant 0 : index
    %72 = vector.load %arg6[%c0_31, %c1_32, %c0_33, %c0_34] : memref<6x4x8x32xbf16, #tpu.memory_space<vmem>>, vector<1x1x8x32xbf16>
    %73 = vector.shape_cast %72 : vector<1x1x8x32xbf16> to vector<8x32xbf16>
    %cst_35 = arith.constant dense<0.000000e+00> : vector<16x32xf32>
    %74 = tpu.matmul %71, %73, %cst_35 {dimension_numbers = #tpu.dot_dimension_numbers<[1], [0], [0], [1], [0, 0, 1, 1], [], []>} : vector<16x8xbf16>, vector<8x32xbf16>, vector<16x32xf32> -> vector<16x32xf32>
    %75 = arith.addf %48, %74 : vector<16x32xf32>
    %76 = vector.extract_strided_slice %20 {offsets = [0, 16], sizes = [16, 8], strides = [1, 1]} : vector<16x32xf32> to vector<16x8xf32>
    %77 = arith.truncf %76 : vector<16x8xf32> to vector<16x8xbf16>
    %78 = vector.extract_strided_slice %21 {offsets = [0, 16], sizes = [16, 8], strides = [1, 1]} : vector<16x32xf32> to vector<16x8xf32>
    %79 = arith.truncf %78 : vector<16x8xf32> to vector<16x8xbf16>
    %cst_36 = arith.constant dense<0.000000e+00> : vector<16x16xf32>
    %80 = tpu.matmul %77, %79, %cst_36 {dimension_numbers = #tpu.dot_dimension_numbers<[1], [1], [0], [0], [0, 0, 1, 0], [], []>} : vector<16x8xbf16>, vector<16x8xbf16>, vector<16x16xf32> -> vector<16x16xf32>
    %c0_37 = arith.constant 0 : index
    %c2 = arith.constant 2 : index
    %c0_38 = arith.constant 0 : index
    %c0_39 = arith.constant 0 : index
    %81 = vector.load %arg3[%c0_37, %c2, %c0_38, %c0_39] : memref<1x12x16x16xf32, #tpu.memory_space<vmem>>, vector<1x1x16x16xf32>
    %82 = vector.shape_cast %81 : vector<1x1x16x16xf32> to vector<16x16xf32>
    %83 = arith.addf %80, %82 : vector<16x16xf32>
    %cst_40 = arith.constant dense<0xFF800000> : vector<16xf32>
    %84 = vector.multi_reduction <maximumf>, %83, %cst_40 [1] : vector<16x16xf32> to vector<16xf32>
    %85 = vector.shape_cast %84 : vector<16xf32> to vector<16x1xf32>
    %86 = vector.broadcast %85 : vector<16x1xf32> to vector<16x16xf32>
    %87 = arith.subf %83, %86 : vector<16x16xf32>
    %88 = math.exp %87 : vector<16x16xf32>
    %cst_41 = arith.constant dense<0.000000e+00> : vector<16xf32>
    %89 = vector.multi_reduction <add>, %88, %cst_41 [1] : vector<16x16xf32> to vector<16xf32>
    %90 = vector.shape_cast %89 : vector<16xf32> to vector<16x1xf32>
    %91 = tpu.reciprocal %90 {approx = true} : vector<16x1xf32> -> vector<16x1xf32>
    %92 = vector.broadcast %91 : vector<16x1xf32> to vector<16x16xf32>
    %93 = arith.mulf %88, %92 : vector<16x16xf32>
    %94 = arith.truncf %93 : vector<16x16xf32> to vector<16x16xbf16>
    %95 = vector.extract_strided_slice %22 {offsets = [0, 16], sizes = [16, 8], strides = [1, 1]} : vector<16x32xf32> to vector<16x8xf32>
    %96 = arith.truncf %95 : vector<16x8xf32> to vector<16x8xbf16>
    %cst_42 = arith.constant dense<0.000000e+00> : vector<16x8xf32>
    %97 = tpu.matmul %94, %96, %cst_42 {dimension_numbers = #tpu.dot_dimension_numbers<[1], [0], [0], [1], [0, 0, 1, 1], [], []>} : vector<16x16xbf16>, vector<16x8xbf16>, vector<16x8xf32> -> vector<16x8xf32>
    %98 = arith.truncf %97 : vector<16x8xf32> to vector<16x8xbf16>
    %c0_43 = arith.constant 0 : index
    %c2_44 = arith.constant 2 : index
    %c0_45 = arith.constant 0 : index
    %c0_46 = arith.constant 0 : index
    %99 = vector.load %arg6[%c0_43, %c2_44, %c0_45, %c0_46] : memref<6x4x8x32xbf16, #tpu.memory_space<vmem>>, vector<1x1x8x32xbf16>
    %100 = vector.shape_cast %99 : vector<1x1x8x32xbf16> to vector<8x32xbf16>
    %cst_47 = arith.constant dense<0.000000e+00> : vector<16x32xf32>
    %101 = tpu.matmul %98, %100, %cst_47 {dimension_numbers = #tpu.dot_dimension_numbers<[1], [0], [0], [1], [0, 0, 1, 1], [], []>} : vector<16x8xbf16>, vector<8x32xbf16>, vector<16x32xf32> -> vector<16x32xf32>
    %102 = arith.addf %75, %101 : vector<16x32xf32>
    %103 = vector.extract_strided_slice %20 {offsets = [0, 24], sizes = [16, 8], strides = [1, 1]} : vector<16x32xf32> to vector<16x8xf32>
    %104 = arith.truncf %103 : vector<16x8xf32> to vector<16x8xbf16>
    %105 = vector.extract_strided_slice %21 {offsets = [0, 24], sizes = [16, 8], strides = [1, 1]} : vector<16x32xf32> to vector<16x8xf32>
    %106 = arith.truncf %105 : vector<16x8xf32> to vector<16x8xbf16>
    %cst_48 = arith.constant dense<0.000000e+00> : vector<16x16xf32>
    %107 = tpu.matmul %104, %106, %cst_48 {dimension_numbers = #tpu.dot_dimension_numbers<[1], [1], [0], [0], [0, 0, 1, 0], [], []>} : vector<16x8xbf16>, vector<16x8xbf16>, vector<16x16xf32> -> vector<16x16xf32>
    %c0_49 = arith.constant 0 : index
    %c3 = arith.constant 3 : index
    %c0_50 = arith.constant 0 : index
    %c0_51 = arith.constant 0 : index
    %108 = vector.load %arg3[%c0_49, %c3, %c0_50, %c0_51] : memref<1x12x16x16xf32, #tpu.memory_space<vmem>>, vector<1x1x16x16xf32>
    %109 = vector.shape_cast %108 : vector<1x1x16x16xf32> to vector<16x16xf32>
    %110 = arith.addf %107, %109 : vector<16x16xf32>
    %cst_52 = arith.constant dense<0xFF800000> : vector<16xf32>
    %111 = vector.multi_reduction <maximumf>, %110, %cst_52 [1] : vector<16x16xf32> to vector<16xf32>
    %112 = vector.shape_cast %111 : vector<16xf32> to vector<16x1xf32>
    %113 = vector.broadcast %112 : vector<16x1xf32> to vector<16x16xf32>
    %114 = arith.subf %110, %113 : vector<16x16xf32>
    %115 = math.exp %114 : vector<16x16xf32>
    %cst_53 = arith.constant dense<0.000000e+00> : vector<16xf32>
    %116 = vector.multi_reduction <add>, %115, %cst_53 [1] : vector<16x16xf32> to vector<16xf32>
    %117 = vector.shape_cast %116 : vector<16xf32> to vector<16x1xf32>
    %118 = tpu.reciprocal %117 {approx = true} : vector<16x1xf32> -> vector<16x1xf32>
    %119 = vector.broadcast %118 : vector<16x1xf32> to vector<16x16xf32>
    %120 = arith.mulf %115, %119 : vector<16x16xf32>
    %121 = arith.truncf %120 : vector<16x16xf32> to vector<16x16xbf16>
    %122 = vector.extract_strided_slice %22 {offsets = [0, 24], sizes = [16, 8], strides = [1, 1]} : vector<16x32xf32> to vector<16x8xf32>
    %123 = arith.truncf %122 : vector<16x8xf32> to vector<16x8xbf16>
    %cst_54 = arith.constant dense<0.000000e+00> : vector<16x8xf32>
    %124 = tpu.matmul %121, %123, %cst_54 {dimension_numbers = #tpu.dot_dimension_numbers<[1], [0], [0], [1], [0, 0, 1, 1], [], []>} : vector<16x16xbf16>, vector<16x8xbf16>, vector<16x8xf32> -> vector<16x8xf32>
    %125 = arith.truncf %124 : vector<16x8xf32> to vector<16x8xbf16>
    %c0_55 = arith.constant 0 : index
    %c3_56 = arith.constant 3 : index
    %c0_57 = arith.constant 0 : index
    %c0_58 = arith.constant 0 : index
    %126 = vector.load %arg6[%c0_55, %c3_56, %c0_57, %c0_58] : memref<6x4x8x32xbf16, #tpu.memory_space<vmem>>, vector<1x1x8x32xbf16>
    %127 = vector.shape_cast %126 : vector<1x1x8x32xbf16> to vector<8x32xbf16>
    %cst_59 = arith.constant dense<0.000000e+00> : vector<16x32xf32>
    %128 = tpu.matmul %125, %127, %cst_59 {dimension_numbers = #tpu.dot_dimension_numbers<[1], [0], [0], [1], [0, 0, 1, 1], [], []>} : vector<16x8xbf16>, vector<8x32xbf16>, vector<16x32xf32> -> vector<16x32xf32>
    %129 = arith.addf %102, %128 : vector<16x32xf32>
    %130 = arith.addf %1, %129 : vector<16x32xf32>
    %131 = arith.mulf %130, %130 : vector<16x32xf32>
    %cst_60 = arith.constant dense<0.000000e+00> : vector<16xf32>
    %132 = vector.multi_reduction <add>, %131, %cst_60 [1] : vector<16x32xf32> to vector<16xf32>
    %133 = vector.shape_cast %132 : vector<16xf32> to vector<16x1xf32>
    %cst_61 = arith.constant 3.200000e+01 : f32
    %134 = vector.broadcast %cst_61 : f32 to vector<16x1xf32>
    %135 = arith.divf %133, %134 : vector<16x1xf32>
    %cst_62 = arith.constant 9.99999997E-7 : f32
    %136 = vector.broadcast %cst_62 : f32 to vector<16x1xf32>
    %137 = arith.addf %135, %136 : vector<16x1xf32>
    %138 = math.rsqrt %137 : vector<16x1xf32>
    %139 = vector.broadcast %138 : vector<16x1xf32> to vector<16x32xf32>
    %140 = arith.mulf %130, %139 : vector<16x32xf32>
    %c1_63 = arith.constant 1 : index
    %c0_64 = arith.constant 0 : index
    %c0_65 = arith.constant 0 : index
    %141 = vector.load %arg4[%c1_63, %c0_64, %c0_65] : memref<12x1x32xf32, #tpu.memory_space<vmem>>, vector<1x1x32xf32>
    %142 = vector.shape_cast %141 : vector<1x1x32xf32> to vector<1x32xf32>
    %143 = vector.broadcast %142 : vector<1x32xf32> to vector<16x32xf32>
    %144 = arith.mulf %140, %143 : vector<16x32xf32>
    %c0_66 = arith.constant 0 : index
    %c0_67 = arith.constant 0 : index
    %c0_68 = arith.constant 0 : index
    %145 = vector.load %arg7[%c0_66, %c0_67, %c0_68] : memref<4x32x64xbf16, #tpu.memory_space<vmem>>, vector<1x32x64xbf16>
    %146 = vector.shape_cast %145 : vector<1x32x64xbf16> to vector<32x64xbf16>
    %147 = arith.truncf %144 : vector<16x32xf32> to vector<16x32xbf16>
    %cst_69 = arith.constant dense<0.000000e+00> : vector<16x64xf32>
    %148 = tpu.matmul %147, %146, %cst_69 {dimension_numbers = #tpu.dot_dimension_numbers<[1], [0], [0], [1], [0, 0, 1, 1], [], []>} : vector<16x32xbf16>, vector<32x64xbf16>, vector<16x64xf32> -> vector<16x64xf32>
    %cst_70 = arith.constant 0.000000e+00 : f32
    %149 = vector.broadcast %cst_70 : f32 to vector<16x64xf32>
    %150 = arith.maximumf %148, %149 : vector<16x64xf32>
    %c0_71 = arith.constant 0 : index
    %c0_72 = arith.constant 0 : index
    %c0_73 = arith.constant 0 : index
    %151 = vector.load %arg8[%c0_71, %c0_72, %c0_73] : memref<4x64x32xbf16, #tpu.memory_space<vmem>>, vector<1x64x32xbf16>
    %152 = vector.shape_cast %151 : vector<1x64x32xbf16> to vector<64x32xbf16>
    %153 = arith.truncf %150 : vector<16x64xf32> to vector<16x64xbf16>
    %cst_74 = arith.constant dense<0.000000e+00> : vector<16x32xf32>
    %154 = tpu.matmul %153, %152, %cst_74 {dimension_numbers = #tpu.dot_dimension_numbers<[1], [0], [0], [1], [0, 0, 1, 1], [], []>} : vector<16x64xbf16>, vector<64x32xbf16>, vector<16x32xf32> -> vector<16x32xf32>
    %155 = arith.addf %130, %154 : vector<16x32xf32>
    %156 = arith.mulf %155, %155 : vector<16x32xf32>
    %cst_75 = arith.constant dense<0.000000e+00> : vector<16xf32>
    %157 = vector.multi_reduction <add>, %156, %cst_75 [1] : vector<16x32xf32> to vector<16xf32>
    %158 = vector.shape_cast %157 : vector<16xf32> to vector<16x1xf32>
    %cst_76 = arith.constant 3.200000e+01 : f32
    %159 = vector.broadcast %cst_76 : f32 to vector<16x1xf32>
    %160 = arith.divf %158, %159 : vector<16x1xf32>
    %cst_77 = arith.constant 9.99999997E-7 : f32
    %161 = vector.broadcast %cst_77 : f32 to vector<16x1xf32>
    %162 = arith.addf %160, %161 : vector<16x1xf32>
    %163 = math.rsqrt %162 : vector<16x1xf32>
    %164 = vector.broadcast %163 : vector<16x1xf32> to vector<16x32xf32>
    %165 = arith.mulf %155, %164 : vector<16x32xf32>
    %c2_78 = arith.constant 2 : index
    %c0_79 = arith.constant 0 : index
    %c0_80 = arith.constant 0 : index
    %166 = vector.load %arg4[%c2_78, %c0_79, %c0_80] : memref<12x1x32xf32, #tpu.memory_space<vmem>>, vector<1x1x32xf32>
    %167 = vector.shape_cast %166 : vector<1x1x32xf32> to vector<1x32xf32>
    %168 = vector.broadcast %167 : vector<1x32xf32> to vector<16x32xf32>
    %169 = arith.mulf %165, %168 : vector<16x32xf32>
    %c1_81 = arith.constant 1 : index
    %c0_82 = arith.constant 0 : index
    %c0_83 = arith.constant 0 : index
    %170 = vector.load %arg5[%c1_81, %c0_82, %c0_83] : memref<4x32x96xbf16, #tpu.memory_space<vmem>>, vector<1x32x96xbf16>
    %171 = vector.shape_cast %170 : vector<1x32x96xbf16> to vector<32x96xbf16>
    %172 = arith.truncf %169 : vector<16x32xf32> to vector<16x32xbf16>
    %cst_84 = arith.constant dense<0.000000e+00> : vector<16x96xf32>
    %173 = tpu.matmul %172, %171, %cst_84 {dimension_numbers = #tpu.dot_dimension_numbers<[1], [0], [0], [1], [0, 0, 1, 1], [], []>} : vector<16x32xbf16>, vector<32x96xbf16>, vector<16x96xf32> -> vector<16x96xf32>
    %174 = vector.extract_strided_slice %173 {offsets = [0, 0], sizes = [16, 32], strides = [1, 1]} : vector<16x96xf32> to vector<16x32xf32>
    %175 = vector.extract_strided_slice %173 {offsets = [0, 32], sizes = [16, 32], strides = [1, 1]} : vector<16x96xf32> to vector<16x32xf32>
    %176 = vector.extract_strided_slice %173 {offsets = [0, 64], sizes = [16, 32], strides = [1, 1]} : vector<16x96xf32> to vector<16x32xf32>
    %177 = vector.extract_strided_slice %174 {offsets = [0, 0], sizes = [16, 8], strides = [1, 1]} : vector<16x32xf32> to vector<16x8xf32>
    %178 = arith.truncf %177 : vector<16x8xf32> to vector<16x8xbf16>
    %179 = vector.extract_strided_slice %175 {offsets = [0, 0], sizes = [16, 8], strides = [1, 1]} : vector<16x32xf32> to vector<16x8xf32>
    %180 = arith.truncf %179 : vector<16x8xf32> to vector<16x8xbf16>
    %cst_85 = arith.constant dense<0.000000e+00> : vector<16x16xf32>
    %181 = tpu.matmul %178, %180, %cst_85 {dimension_numbers = #tpu.dot_dimension_numbers<[1], [1], [0], [0], [0, 0, 1, 0], [], []>} : vector<16x8xbf16>, vector<16x8xbf16>, vector<16x16xf32> -> vector<16x16xf32>
    %c0_86 = arith.constant 0 : index
    %c0_87 = arith.constant 0 : index
    %c0_88 = arith.constant 0 : index
    %c0_89 = arith.constant 0 : index
    %182 = vector.load %arg3[%c0_86, %c0_87, %c0_88, %c0_89] : memref<1x12x16x16xf32, #tpu.memory_space<vmem>>, vector<1x1x16x16xf32>
    %183 = vector.shape_cast %182 : vector<1x1x16x16xf32> to vector<16x16xf32>
    %184 = arith.addf %181, %183 : vector<16x16xf32>
    %cst_90 = arith.constant dense<0xFF800000> : vector<16xf32>
    %185 = vector.multi_reduction <maximumf>, %184, %cst_90 [1] : vector<16x16xf32> to vector<16xf32>
    %186 = vector.shape_cast %185 : vector<16xf32> to vector<16x1xf32>
    %187 = vector.broadcast %186 : vector<16x1xf32> to vector<16x16xf32>
    %188 = arith.subf %184, %187 : vector<16x16xf32>
    %189 = math.exp %188 : vector<16x16xf32>
    %cst_91 = arith.constant dense<0.000000e+00> : vector<16xf32>
    %190 = vector.multi_reduction <add>, %189, %cst_91 [1] : vector<16x16xf32> to vector<16xf32>
    %191 = vector.shape_cast %190 : vector<16xf32> to vector<16x1xf32>
    %192 = tpu.reciprocal %191 {approx = true} : vector<16x1xf32> -> vector<16x1xf32>
    %193 = vector.broadcast %192 : vector<16x1xf32> to vector<16x16xf32>
    %194 = arith.mulf %189, %193 : vector<16x16xf32>
    %195 = arith.truncf %194 : vector<16x16xf32> to vector<16x16xbf16>
    %196 = vector.extract_strided_slice %176 {offsets = [0, 0], sizes = [16, 8], strides = [1, 1]} : vector<16x32xf32> to vector<16x8xf32>
    %197 = arith.truncf %196 : vector<16x8xf32> to vector<16x8xbf16>
    %cst_92 = arith.constant dense<0.000000e+00> : vector<16x8xf32>
    %198 = tpu.matmul %195, %197, %cst_92 {dimension_numbers = #tpu.dot_dimension_numbers<[1], [0], [0], [1], [0, 0, 1, 1], [], []>} : vector<16x16xbf16>, vector<16x8xbf16>, vector<16x8xf32> -> vector<16x8xf32>
    %199 = arith.truncf %198 : vector<16x8xf32> to vector<16x8xbf16>
    %c1_93 = arith.constant 1 : index
    %c0_94 = arith.constant 0 : index
    %c0_95 = arith.constant 0 : index
    %c0_96 = arith.constant 0 : index
    %200 = vector.load %arg6[%c1_93, %c0_94, %c0_95, %c0_96] : memref<6x4x8x32xbf16, #tpu.memory_space<vmem>>, vector<1x1x8x32xbf16>
    %201 = vector.shape_cast %200 : vector<1x1x8x32xbf16> to vector<8x32xbf16>
    %cst_97 = arith.constant dense<0.000000e+00> : vector<16x32xf32>
    %202 = tpu.matmul %199, %201, %cst_97 {dimension_numbers = #tpu.dot_dimension_numbers<[1], [0], [0], [1], [0, 0, 1, 1], [], []>} : vector<16x8xbf16>, vector<8x32xbf16>, vector<16x32xf32> -> vector<16x32xf32>
    %203 = vector.extract_strided_slice %174 {offsets = [0, 8], sizes = [16, 8], strides = [1, 1]} : vector<16x32xf32> to vector<16x8xf32>
    %204 = arith.truncf %203 : vector<16x8xf32> to vector<16x8xbf16>
    %205 = vector.extract_strided_slice %175 {offsets = [0, 8], sizes = [16, 8], strides = [1, 1]} : vector<16x32xf32> to vector<16x8xf32>
    %206 = arith.truncf %205 : vector<16x8xf32> to vector<16x8xbf16>
    %cst_98 = arith.constant dense<0.000000e+00> : vector<16x16xf32>
    %207 = tpu.matmul %204, %206, %cst_98 {dimension_numbers = #tpu.dot_dimension_numbers<[1], [1], [0], [0], [0, 0, 1, 0], [], []>} : vector<16x8xbf16>, vector<16x8xbf16>, vector<16x16xf32> -> vector<16x16xf32>
    %c0_99 = arith.constant 0 : index
    %c1_100 = arith.constant 1 : index
    %c0_101 = arith.constant 0 : index
    %c0_102 = arith.constant 0 : index
    %208 = vector.load %arg3[%c0_99, %c1_100, %c0_101, %c0_102] : memref<1x12x16x16xf32, #tpu.memory_space<vmem>>, vector<1x1x16x16xf32>
    %209 = vector.shape_cast %208 : vector<1x1x16x16xf32> to vector<16x16xf32>
    %210 = arith.addf %207, %209 : vector<16x16xf32>
    %cst_103 = arith.constant dense<0xFF800000> : vector<16xf32>
    %211 = vector.multi_reduction <maximumf>, %210, %cst_103 [1] : vector<16x16xf32> to vector<16xf32>
    %212 = vector.shape_cast %211 : vector<16xf32> to vector<16x1xf32>
    %213 = vector.broadcast %212 : vector<16x1xf32> to vector<16x16xf32>
    %214 = arith.subf %210, %213 : vector<16x16xf32>
    %215 = math.exp %214 : vector<16x16xf32>
    %cst_104 = arith.constant dense<0.000000e+00> : vector<16xf32>
    %216 = vector.multi_reduction <add>, %215, %cst_104 [1] : vector<16x16xf32> to vector<16xf32>
    %217 = vector.shape_cast %216 : vector<16xf32> to vector<16x1xf32>
    %218 = tpu.reciprocal %217 {approx = true} : vector<16x1xf32> -> vector<16x1xf32>
    %219 = vector.broadcast %218 : vector<16x1xf32> to vector<16x16xf32>
    %220 = arith.mulf %215, %219 : vector<16x16xf32>
    %221 = arith.truncf %220 : vector<16x16xf32> to vector<16x16xbf16>
    %222 = vector.extract_strided_slice %176 {offsets = [0, 8], sizes = [16, 8], strides = [1, 1]} : vector<16x32xf32> to vector<16x8xf32>
    %223 = arith.truncf %222 : vector<16x8xf32> to vector<16x8xbf16>
    %cst_105 = arith.constant dense<0.000000e+00> : vector<16x8xf32>
    %224 = tpu.matmul %221, %223, %cst_105 {dimension_numbers = #tpu.dot_dimension_numbers<[1], [0], [0], [1], [0, 0, 1, 1], [], []>} : vector<16x16xbf16>, vector<16x8xbf16>, vector<16x8xf32> -> vector<16x8xf32>
    %225 = arith.truncf %224 : vector<16x8xf32> to vector<16x8xbf16>
    %c1_106 = arith.constant 1 : index
    %c1_107 = arith.constant 1 : index
    %c0_108 = arith.constant 0 : index
    %c0_109 = arith.constant 0 : index
    %226 = vector.load %arg6[%c1_106, %c1_107, %c0_108, %c0_109] : memref<6x4x8x32xbf16, #tpu.memory_space<vmem>>, vector<1x1x8x32xbf16>
    %227 = vector.shape_cast %226 : vector<1x1x8x32xbf16> to vector<8x32xbf16>
    %cst_110 = arith.constant dense<0.000000e+00> : vector<16x32xf32>
    %228 = tpu.matmul %225, %227, %cst_110 {dimension_numbers = #tpu.dot_dimension_numbers<[1], [0], [0], [1], [0, 0, 1, 1], [], []>} : vector<16x8xbf16>, vector<8x32xbf16>, vector<16x32xf32> -> vector<16x32xf32>
    %229 = arith.addf %202, %228 : vector<16x32xf32>
    %230 = vector.extract_strided_slice %174 {offsets = [0, 16], sizes = [16, 8], strides = [1, 1]} : vector<16x32xf32> to vector<16x8xf32>
    %231 = arith.truncf %230 : vector<16x8xf32> to vector<16x8xbf16>
    %232 = vector.extract_strided_slice %175 {offsets = [0, 16], sizes = [16, 8], strides = [1, 1]} : vector<16x32xf32> to vector<16x8xf32>
    %233 = arith.truncf %232 : vector<16x8xf32> to vector<16x8xbf16>
    %cst_111 = arith.constant dense<0.000000e+00> : vector<16x16xf32>
    %234 = tpu.matmul %231, %233, %cst_111 {dimension_numbers = #tpu.dot_dimension_numbers<[1], [1], [0], [0], [0, 0, 1, 0], [], []>} : vector<16x8xbf16>, vector<16x8xbf16>, vector<16x16xf32> -> vector<16x16xf32>
    %c0_112 = arith.constant 0 : index
    %c2_113 = arith.constant 2 : index
    %c0_114 = arith.constant 0 : index
    %c0_115 = arith.constant 0 : index
    %235 = vector.load %arg3[%c0_112, %c2_113, %c0_114, %c0_115] : memref<1x12x16x16xf32, #tpu.memory_space<vmem>>, vector<1x1x16x16xf32>
    %236 = vector.shape_cast %235 : vector<1x1x16x16xf32> to vector<16x16xf32>
    %237 = arith.addf %234, %236 : vector<16x16xf32>
    %cst_116 = arith.constant dense<0xFF800000> : vector<16xf32>
    %238 = vector.multi_reduction <maximumf>, %237, %cst_116 [1] : vector<16x16xf32> to vector<16xf32>
    %239 = vector.shape_cast %238 : vector<16xf32> to vector<16x1xf32>
    %240 = vector.broadcast %239 : vector<16x1xf32> to vector<16x16xf32>
    %241 = arith.subf %237, %240 : vector<16x16xf32>
    %242 = math.exp %241 : vector<16x16xf32>
    %cst_117 = arith.constant dense<0.000000e+00> : vector<16xf32>
    %243 = vector.multi_reduction <add>, %242, %cst_117 [1] : vector<16x16xf32> to vector<16xf32>
    %244 = vector.shape_cast %243 : vector<16xf32> to vector<16x1xf32>
    %245 = tpu.reciprocal %244 {approx = true} : vector<16x1xf32> -> vector<16x1xf32>
    %246 = vector.broadcast %245 : vector<16x1xf32> to vector<16x16xf32>
    %247 = arith.mulf %242, %246 : vector<16x16xf32>
    %248 = arith.truncf %247 : vector<16x16xf32> to vector<16x16xbf16>
    %249 = vector.extract_strided_slice %176 {offsets = [0, 16], sizes = [16, 8], strides = [1, 1]} : vector<16x32xf32> to vector<16x8xf32>
    %250 = arith.truncf %249 : vector<16x8xf32> to vector<16x8xbf16>
    %cst_118 = arith.constant dense<0.000000e+00> : vector<16x8xf32>
    %251 = tpu.matmul %248, %250, %cst_118 {dimension_numbers = #tpu.dot_dimension_numbers<[1], [0], [0], [1], [0, 0, 1, 1], [], []>} : vector<16x16xbf16>, vector<16x8xbf16>, vector<16x8xf32> -> vector<16x8xf32>
    %252 = arith.truncf %251 : vector<16x8xf32> to vector<16x8xbf16>
    %c1_119 = arith.constant 1 : index
    %c2_120 = arith.constant 2 : index
    %c0_121 = arith.constant 0 : index
    %c0_122 = arith.constant 0 : index
    %253 = vector.load %arg6[%c1_119, %c2_120, %c0_121, %c0_122] : memref<6x4x8x32xbf16, #tpu.memory_space<vmem>>, vector<1x1x8x32xbf16>
    %254 = vector.shape_cast %253 : vector<1x1x8x32xbf16> to vector<8x32xbf16>
    %cst_123 = arith.constant dense<0.000000e+00> : vector<16x32xf32>
    %255 = tpu.matmul %252, %254, %cst_123 {dimension_numbers = #tpu.dot_dimension_numbers<[1], [0], [0], [1], [0, 0, 1, 1], [], []>} : vector<16x8xbf16>, vector<8x32xbf16>, vector<16x32xf32> -> vector<16x32xf32>
    %256 = arith.addf %229, %255 : vector<16x32xf32>
    %257 = vector.extract_strided_slice %174 {offsets = [0, 24], sizes = [16, 8], strides = [1, 1]} : vector<16x32xf32> to vector<16x8xf32>
    %258 = arith.truncf %257 : vector<16x8xf32> to vector<16x8xbf16>
    %259 = vector.extract_strided_slice %175 {offsets = [0, 24], sizes = [16, 8], strides = [1, 1]} : vector<16x32xf32> to vector<16x8xf32>
    %260 = arith.truncf %259 : vector<16x8xf32> to vector<16x8xbf16>
    %cst_124 = arith.constant dense<0.000000e+00> : vector<16x16xf32>
    %261 = tpu.matmul %258, %260, %cst_124 {dimension_numbers = #tpu.dot_dimension_numbers<[1], [1], [0], [0], [0, 0, 1, 0], [], []>} : vector<16x8xbf16>, vector<16x8xbf16>, vector<16x16xf32> -> vector<16x16xf32>
    %c0_125 = arith.constant 0 : index
    %c3_126 = arith.constant 3 : index
    %c0_127 = arith.constant 0 : index
    %c0_128 = arith.constant 0 : index
    %262 = vector.load %arg3[%c0_125, %c3_126, %c0_127, %c0_128] : memref<1x12x16x16xf32, #tpu.memory_space<vmem>>, vector<1x1x16x16xf32>
    %263 = vector.shape_cast %262 : vector<1x1x16x16xf32> to vector<16x16xf32>
    %264 = arith.addf %261, %263 : vector<16x16xf32>
    %cst_129 = arith.constant dense<0xFF800000> : vector<16xf32>
    %265 = vector.multi_reduction <maximumf>, %264, %cst_129 [1] : vector<16x16xf32> to vector<16xf32>
    %266 = vector.shape_cast %265 : vector<16xf32> to vector<16x1xf32>
    %267 = vector.broadcast %266 : vector<16x1xf32> to vector<16x16xf32>
    %268 = arith.subf %264, %267 : vector<16x16xf32>
    %269 = math.exp %268 : vector<16x16xf32>
    %cst_130 = arith.constant dense<0.000000e+00> : vector<16xf32>
    %270 = vector.multi_reduction <add>, %269, %cst_130 [1] : vector<16x16xf32> to vector<16xf32>
    %271 = vector.shape_cast %270 : vector<16xf32> to vector<16x1xf32>
    %272 = tpu.reciprocal %271 {approx = true} : vector<16x1xf32> -> vector<16x1xf32>
    %273 = vector.broadcast %272 : vector<16x1xf32> to vector<16x16xf32>
    %274 = arith.mulf %269, %273 : vector<16x16xf32>
    %275 = arith.truncf %274 : vector<16x16xf32> to vector<16x16xbf16>
    %276 = vector.extract_strided_slice %176 {offsets = [0, 24], sizes = [16, 8], strides = [1, 1]} : vector<16x32xf32> to vector<16x8xf32>
    %277 = arith.truncf %276 : vector<16x8xf32> to vector<16x8xbf16>
    %cst_131 = arith.constant dense<0.000000e+00> : vector<16x8xf32>
    %278 = tpu.matmul %275, %277, %cst_131 {dimension_numbers = #tpu.dot_dimension_numbers<[1], [0], [0], [1], [0, 0, 1, 1], [], []>} : vector<16x16xbf16>, vector<16x8xbf16>, vector<16x8xf32> -> vector<16x8xf32>
    %279 = arith.truncf %278 : vector<16x8xf32> to vector<16x8xbf16>
    %c1_132 = arith.constant 1 : index
    %c3_133 = arith.constant 3 : index
    %c0_134 = arith.constant 0 : index
    %c0_135 = arith.constant 0 : index
    %280 = vector.load %arg6[%c1_132, %c3_133, %c0_134, %c0_135] : memref<6x4x8x32xbf16, #tpu.memory_space<vmem>>, vector<1x1x8x32xbf16>
    %281 = vector.shape_cast %280 : vector<1x1x8x32xbf16> to vector<8x32xbf16>
    %cst_136 = arith.constant dense<0.000000e+00> : vector<16x32xf32>
    %282 = tpu.matmul %279, %281, %cst_136 {dimension_numbers = #tpu.dot_dimension_numbers<[1], [0], [0], [1], [0, 0, 1, 1], [], []>} : vector<16x8xbf16>, vector<8x32xbf16>, vector<16x32xf32> -> vector<16x32xf32>
    %283 = arith.addf %256, %282 : vector<16x32xf32>
    %284 = arith.addf %155, %283 : vector<16x32xf32>
    %285 = arith.mulf %284, %284 : vector<16x32xf32>
    %cst_137 = arith.constant dense<0.000000e+00> : vector<16xf32>
    %286 = vector.multi_reduction <add>, %285, %cst_137 [1] : vector<16x32xf32> to vector<16xf32>
    %287 = vector.shape_cast %286 : vector<16xf32> to vector<16x1xf32>
    %cst_138 = arith.constant 3.200000e+01 : f32
    %288 = vector.broadcast %cst_138 : f32 to vector<16x1xf32>
    %289 = arith.divf %287, %288 : vector<16x1xf32>
    %cst_139 = arith.constant 9.99999997E-7 : f32
    %290 = vector.broadcast %cst_139 : f32 to vector<16x1xf32>
    %291 = arith.addf %289, %290 : vector<16x1xf32>
    %292 = math.rsqrt %291 : vector<16x1xf32>
    %293 = vector.broadcast %292 : vector<16x1xf32> to vector<16x32xf32>
    %294 = arith.mulf %284, %293 : vector<16x32xf32>
    %c3_140 = arith.constant 3 : index
    %c0_141 = arith.constant 0 : index
    %c0_142 = arith.constant 0 : index
    %295 = vector.load %arg4[%c3_140, %c0_141, %c0_142] : memref<12x1x32xf32, #tpu.memory_space<vmem>>, vector<1x1x32xf32>
    %296 = vector.shape_cast %295 : vector<1x1x32xf32> to vector<1x32xf32>
    %297 = vector.broadcast %296 : vector<1x32xf32> to vector<16x32xf32>
    %298 = arith.mulf %294, %297 : vector<16x32xf32>
    %c1_143 = arith.constant 1 : index
    %c0_144 = arith.constant 0 : index
    %c0_145 = arith.constant 0 : index
    %299 = vector.load %arg7[%c1_143, %c0_144, %c0_145] : memref<4x32x64xbf16, #tpu.memory_space<vmem>>, vector<1x32x64xbf16>
    %300 = vector.shape_cast %299 : vector<1x32x64xbf16> to vector<32x64xbf16>
    %301 = arith.truncf %298 : vector<16x32xf32> to vector<16x32xbf16>
    %cst_146 = arith.constant dense<0.000000e+00> : vector<16x64xf32>
    %302 = tpu.matmul %301, %300, %cst_146 {dimension_numbers = #tpu.dot_dimension_numbers<[1], [0], [0], [1], [0, 0, 1, 1], [], []>} : vector<16x32xbf16>, vector<32x64xbf16>, vector<16x64xf32> -> vector<16x64xf32>
    %cst_147 = arith.constant 0.000000e+00 : f32
    %303 = vector.broadcast %cst_147 : f32 to vector<16x64xf32>
    %304 = arith.maximumf %302, %303 : vector<16x64xf32>
    %c1_148 = arith.constant 1 : index
    %c0_149 = arith.constant 0 : index
    %c0_150 = arith.constant 0 : index
    %305 = vector.load %arg8[%c1_148, %c0_149, %c0_150] : memref<4x64x32xbf16, #tpu.memory_space<vmem>>, vector<1x64x32xbf16>
    %306 = vector.shape_cast %305 : vector<1x64x32xbf16> to vector<64x32xbf16>
    %307 = arith.truncf %304 : vector<16x64xf32> to vector<16x64xbf16>
    %cst_151 = arith.constant dense<0.000000e+00> : vector<16x32xf32>
    %308 = tpu.matmul %307, %306, %cst_151 {dimension_numbers = #tpu.dot_dimension_numbers<[1], [0], [0], [1], [0, 0, 1, 1], [], []>} : vector<16x64xbf16>, vector<64x32xbf16>, vector<16x32xf32> -> vector<16x32xf32>
    %309 = arith.addf %284, %308 : vector<16x32xf32>
    %310 = arith.mulf %309, %309 : vector<16x32xf32>
    %cst_152 = arith.constant dense<0.000000e+00> : vector<16xf32>
    %311 = vector.multi_reduction <add>, %310, %cst_152 [1] : vector<16x32xf32> to vector<16xf32>
    %312 = vector.shape_cast %311 : vector<16xf32> to vector<16x1xf32>
    %cst_153 = arith.constant 3.200000e+01 : f32
    %313 = vector.broadcast %cst_153 : f32 to vector<16x1xf32>
    %314 = arith.divf %312, %313 : vector<16x1xf32>
    %cst_154 = arith.constant 9.99999997E-7 : f32
    %315 = vector.broadcast %cst_154 : f32 to vector<16x1xf32>
    %316 = arith.addf %314, %315 : vector<16x1xf32>
    %317 = math.rsqrt %316 : vector<16x1xf32>
    %318 = vector.broadcast %317 : vector<16x1xf32> to vector<16x32xf32>
    %319 = arith.mulf %309, %318 : vector<16x32xf32>
    %c10 = arith.constant 10 : index
    %c0_155 = arith.constant 0 : index
    %c0_156 = arith.constant 0 : index
    %320 = vector.load %arg4[%c10, %c0_155, %c0_156] : memref<12x1x32xf32, #tpu.memory_space<vmem>>, vector<1x1x32xf32>
    %321 = vector.shape_cast %320 : vector<1x1x32xf32> to vector<1x32xf32>
    %322 = vector.broadcast %321 : vector<1x32xf32> to vector<16x32xf32>
    %323 = arith.mulf %319, %322 : vector<16x32xf32>
    %324 = arith.mulf %1, %1 : vector<16x32xf32>
    %cst_157 = arith.constant dense<0.000000e+00> : vector<16xf32>
    %325 = vector.multi_reduction <add>, %324, %cst_157 [1] : vector<16x32xf32> to vector<16xf32>
    %326 = vector.shape_cast %325 : vector<16xf32> to vector<16x1xf32>
    %cst_158 = arith.constant 3.200000e+01 : f32
    %327 = vector.broadcast %cst_158 : f32 to vector<16x1xf32>
    %328 = arith.divf %326, %327 : vector<16x1xf32>
    %cst_159 = arith.constant 9.99999997E-7 : f32
    %329 = vector.broadcast %cst_159 : f32 to vector<16x1xf32>
    %330 = arith.addf %328, %329 : vector<16x1xf32>
    %331 = math.rsqrt %330 : vector<16x1xf32>
    %332 = vector.broadcast %331 : vector<16x1xf32> to vector<16x32xf32>
    %333 = arith.mulf %1, %332 : vector<16x32xf32>
    %c4 = arith.constant 4 : index
    %c0_160 = arith.constant 0 : index
    %c0_161 = arith.constant 0 : index
    %334 = vector.load %arg4[%c4, %c0_160, %c0_161] : memref<12x1x32xf32, #tpu.memory_space<vmem>>, vector<1x1x32xf32>
    %335 = vector.shape_cast %334 : vector<1x1x32xf32> to vector<1x32xf32>
    %336 = vector.broadcast %335 : vector<1x32xf32> to vector<16x32xf32>
    %337 = arith.mulf %333, %336 : vector<16x32xf32>
    %c2_162 = arith.constant 2 : index
    %c0_163 = arith.constant 0 : index
    %c0_164 = arith.constant 0 : index
    %338 = vector.load %arg5[%c2_162, %c0_163, %c0_164] : memref<4x32x96xbf16, #tpu.memory_space<vmem>>, vector<1x32x96xbf16>
    %339 = vector.shape_cast %338 : vector<1x32x96xbf16> to vector<32x96xbf16>
    %340 = arith.truncf %337 : vector<16x32xf32> to vector<16x32xbf16>
    %cst_165 = arith.constant dense<0.000000e+00> : vector<16x96xf32>
    %341 = tpu.matmul %340, %339, %cst_165 {dimension_numbers = #tpu.dot_dimension_numbers<[1], [0], [0], [1], [0, 0, 1, 1], [], []>} : vector<16x32xbf16>, vector<32x96xbf16>, vector<16x96xf32> -> vector<16x96xf32>
    %342 = vector.extract_strided_slice %341 {offsets = [0, 0], sizes = [16, 32], strides = [1, 1]} : vector<16x96xf32> to vector<16x32xf32>
    %343 = vector.extract_strided_slice %341 {offsets = [0, 32], sizes = [16, 32], strides = [1, 1]} : vector<16x96xf32> to vector<16x32xf32>
    %344 = vector.extract_strided_slice %341 {offsets = [0, 64], sizes = [16, 32], strides = [1, 1]} : vector<16x96xf32> to vector<16x32xf32>
    %345 = vector.extract_strided_slice %342 {offsets = [0, 0], sizes = [16, 8], strides = [1, 1]} : vector<16x32xf32> to vector<16x8xf32>
    %346 = arith.truncf %345 : vector<16x8xf32> to vector<16x8xbf16>
    %347 = vector.extract_strided_slice %343 {offsets = [0, 0], sizes = [16, 8], strides = [1, 1]} : vector<16x32xf32> to vector<16x8xf32>
    %348 = arith.truncf %347 : vector<16x8xf32> to vector<16x8xbf16>
    %cst_166 = arith.constant dense<0.000000e+00> : vector<16x16xf32>
    %349 = tpu.matmul %346, %348, %cst_166 {dimension_numbers = #tpu.dot_dimension_numbers<[1], [1], [0], [0], [0, 0, 1, 0], [], []>} : vector<16x8xbf16>, vector<16x8xbf16>, vector<16x16xf32> -> vector<16x16xf32>
    %c0_167 = arith.constant 0 : index
    %c4_168 = arith.constant 4 : index
    %c0_169 = arith.constant 0 : index
    %c0_170 = arith.constant 0 : index
    %350 = vector.load %arg3[%c0_167, %c4_168, %c0_169, %c0_170] : memref<1x12x16x16xf32, #tpu.memory_space<vmem>>, vector<1x1x16x16xf32>
    %351 = vector.shape_cast %350 : vector<1x1x16x16xf32> to vector<16x16xf32>
    %352 = arith.addf %349, %351 : vector<16x16xf32>
    %cst_171 = arith.constant dense<0xFF800000> : vector<16xf32>
    %353 = vector.multi_reduction <maximumf>, %352, %cst_171 [1] : vector<16x16xf32> to vector<16xf32>
    %354 = vector.shape_cast %353 : vector<16xf32> to vector<16x1xf32>
    %355 = vector.broadcast %354 : vector<16x1xf32> to vector<16x16xf32>
    %356 = arith.subf %352, %355 : vector<16x16xf32>
    %357 = math.exp %356 : vector<16x16xf32>
    %cst_172 = arith.constant dense<0.000000e+00> : vector<16xf32>
    %358 = vector.multi_reduction <add>, %357, %cst_172 [1] : vector<16x16xf32> to vector<16xf32>
    %359 = vector.shape_cast %358 : vector<16xf32> to vector<16x1xf32>
    %360 = tpu.reciprocal %359 {approx = true} : vector<16x1xf32> -> vector<16x1xf32>
    %361 = vector.broadcast %360 : vector<16x1xf32> to vector<16x16xf32>
    %362 = arith.mulf %357, %361 : vector<16x16xf32>
    %363 = arith.truncf %362 : vector<16x16xf32> to vector<16x16xbf16>
    %364 = vector.extract_strided_slice %344 {offsets = [0, 0], sizes = [16, 8], strides = [1, 1]} : vector<16x32xf32> to vector<16x8xf32>
    %365 = arith.truncf %364 : vector<16x8xf32> to vector<16x8xbf16>
    %cst_173 = arith.constant dense<0.000000e+00> : vector<16x8xf32>
    %366 = tpu.matmul %363, %365, %cst_173 {dimension_numbers = #tpu.dot_dimension_numbers<[1], [0], [0], [1], [0, 0, 1, 1], [], []>} : vector<16x16xbf16>, vector<16x8xbf16>, vector<16x8xf32> -> vector<16x8xf32>
    %367 = arith.truncf %366 : vector<16x8xf32> to vector<16x8xbf16>
    %c2_174 = arith.constant 2 : index
    %c0_175 = arith.constant 0 : index
    %c0_176 = arith.constant 0 : index
    %c0_177 = arith.constant 0 : index
    %368 = vector.load %arg6[%c2_174, %c0_175, %c0_176, %c0_177] : memref<6x4x8x32xbf16, #tpu.memory_space<vmem>>, vector<1x1x8x32xbf16>
    %369 = vector.shape_cast %368 : vector<1x1x8x32xbf16> to vector<8x32xbf16>
    %cst_178 = arith.constant dense<0.000000e+00> : vector<16x32xf32>
    %370 = tpu.matmul %367, %369, %cst_178 {dimension_numbers = #tpu.dot_dimension_numbers<[1], [0], [0], [1], [0, 0, 1, 1], [], []>} : vector<16x8xbf16>, vector<8x32xbf16>, vector<16x32xf32> -> vector<16x32xf32>
    %371 = vector.extract_strided_slice %342 {offsets = [0, 8], sizes = [16, 8], strides = [1, 1]} : vector<16x32xf32> to vector<16x8xf32>
    %372 = arith.truncf %371 : vector<16x8xf32> to vector<16x8xbf16>
    %373 = vector.extract_strided_slice %343 {offsets = [0, 8], sizes = [16, 8], strides = [1, 1]} : vector<16x32xf32> to vector<16x8xf32>
    %374 = arith.truncf %373 : vector<16x8xf32> to vector<16x8xbf16>
    %cst_179 = arith.constant dense<0.000000e+00> : vector<16x16xf32>
    %375 = tpu.matmul %372, %374, %cst_179 {dimension_numbers = #tpu.dot_dimension_numbers<[1], [1], [0], [0], [0, 0, 1, 0], [], []>} : vector<16x8xbf16>, vector<16x8xbf16>, vector<16x16xf32> -> vector<16x16xf32>
    %c0_180 = arith.constant 0 : index
    %c5 = arith.constant 5 : index
    %c0_181 = arith.constant 0 : index
    %c0_182 = arith.constant 0 : index
    %376 = vector.load %arg3[%c0_180, %c5, %c0_181, %c0_182] : memref<1x12x16x16xf32, #tpu.memory_space<vmem>>, vector<1x1x16x16xf32>
    %377 = vector.shape_cast %376 : vector<1x1x16x16xf32> to vector<16x16xf32>
    %378 = arith.addf %375, %377 : vector<16x16xf32>
    %cst_183 = arith.constant dense<0xFF800000> : vector<16xf32>
    %379 = vector.multi_reduction <maximumf>, %378, %cst_183 [1] : vector<16x16xf32> to vector<16xf32>
    %380 = vector.shape_cast %379 : vector<16xf32> to vector<16x1xf32>
    %381 = vector.broadcast %380 : vector<16x1xf32> to vector<16x16xf32>
    %382 = arith.subf %378, %381 : vector<16x16xf32>
    %383 = math.exp %382 : vector<16x16xf32>
    %cst_184 = arith.constant dense<0.000000e+00> : vector<16xf32>
    %384 = vector.multi_reduction <add>, %383, %cst_184 [1] : vector<16x16xf32> to vector<16xf32>
    %385 = vector.shape_cast %384 : vector<16xf32> to vector<16x1xf32>
    %386 = tpu.reciprocal %385 {approx = true} : vector<16x1xf32> -> vector<16x1xf32>
    %387 = vector.broadcast %386 : vector<16x1xf32> to vector<16x16xf32>
    %388 = arith.mulf %383, %387 : vector<16x16xf32>
    %389 = arith.truncf %388 : vector<16x16xf32> to vector<16x16xbf16>
    %390 = vector.extract_strided_slice %344 {offsets = [0, 8], sizes = [16, 8], strides = [1, 1]} : vector<16x32xf32> to vector<16x8xf32>
    %391 = arith.truncf %390 : vector<16x8xf32> to vector<16x8xbf16>
    %cst_185 = arith.constant dense<0.000000e+00> : vector<16x8xf32>
    %392 = tpu.matmul %389, %391, %cst_185 {dimension_numbers = #tpu.dot_dimension_numbers<[1], [0], [0], [1], [0, 0, 1, 1], [], []>} : vector<16x16xbf16>, vector<16x8xbf16>, vector<16x8xf32> -> vector<16x8xf32>
    %393 = arith.truncf %392 : vector<16x8xf32> to vector<16x8xbf16>
    %c2_186 = arith.constant 2 : index
    %c1_187 = arith.constant 1 : index
    %c0_188 = arith.constant 0 : index
    %c0_189 = arith.constant 0 : index
    %394 = vector.load %arg6[%c2_186, %c1_187, %c0_188, %c0_189] : memref<6x4x8x32xbf16, #tpu.memory_space<vmem>>, vector<1x1x8x32xbf16>
    %395 = vector.shape_cast %394 : vector<1x1x8x32xbf16> to vector<8x32xbf16>
    %cst_190 = arith.constant dense<0.000000e+00> : vector<16x32xf32>
    %396 = tpu.matmul %393, %395, %cst_190 {dimension_numbers = #tpu.dot_dimension_numbers<[1], [0], [0], [1], [0, 0, 1, 1], [], []>} : vector<16x8xbf16>, vector<8x32xbf16>, vector<16x32xf32> -> vector<16x32xf32>
    %397 = arith.addf %370, %396 : vector<16x32xf32>
    %398 = vector.extract_strided_slice %342 {offsets = [0, 16], sizes = [16, 8], strides = [1, 1]} : vector<16x32xf32> to vector<16x8xf32>
    %399 = arith.truncf %398 : vector<16x8xf32> to vector<16x8xbf16>
    %400 = vector.extract_strided_slice %343 {offsets = [0, 16], sizes = [16, 8], strides = [1, 1]} : vector<16x32xf32> to vector<16x8xf32>
    %401 = arith.truncf %400 : vector<16x8xf32> to vector<16x8xbf16>
    %cst_191 = arith.constant dense<0.000000e+00> : vector<16x16xf32>
    %402 = tpu.matmul %399, %401, %cst_191 {dimension_numbers = #tpu.dot_dimension_numbers<[1], [1], [0], [0], [0, 0, 1, 0], [], []>} : vector<16x8xbf16>, vector<16x8xbf16>, vector<16x16xf32> -> vector<16x16xf32>
    %c0_192 = arith.constant 0 : index
    %c6 = arith.constant 6 : index
    %c0_193 = arith.constant 0 : index
    %c0_194 = arith.constant 0 : index
    %403 = vector.load %arg3[%c0_192, %c6, %c0_193, %c0_194] : memref<1x12x16x16xf32, #tpu.memory_space<vmem>>, vector<1x1x16x16xf32>
    %404 = vector.shape_cast %403 : vector<1x1x16x16xf32> to vector<16x16xf32>
    %405 = arith.addf %402, %404 : vector<16x16xf32>
    %cst_195 = arith.constant dense<0xFF800000> : vector<16xf32>
    %406 = vector.multi_reduction <maximumf>, %405, %cst_195 [1] : vector<16x16xf32> to vector<16xf32>
    %407 = vector.shape_cast %406 : vector<16xf32> to vector<16x1xf32>
    %408 = vector.broadcast %407 : vector<16x1xf32> to vector<16x16xf32>
    %409 = arith.subf %405, %408 : vector<16x16xf32>
    %410 = math.exp %409 : vector<16x16xf32>
    %cst_196 = arith.constant dense<0.000000e+00> : vector<16xf32>
    %411 = vector.multi_reduction <add>, %410, %cst_196 [1] : vector<16x16xf32> to vector<16xf32>
    %412 = vector.shape_cast %411 : vector<16xf32> to vector<16x1xf32>
    %413 = tpu.reciprocal %412 {approx = true} : vector<16x1xf32> -> vector<16x1xf32>
    %414 = vector.broadcast %413 : vector<16x1xf32> to vector<16x16xf32>
    %415 = arith.mulf %410, %414 : vector<16x16xf32>
    %416 = arith.truncf %415 : vector<16x16xf32> to vector<16x16xbf16>
    %417 = vector.extract_strided_slice %344 {offsets = [0, 16], sizes = [16, 8], strides = [1, 1]} : vector<16x32xf32> to vector<16x8xf32>
    %418 = arith.truncf %417 : vector<16x8xf32> to vector<16x8xbf16>
    %cst_197 = arith.constant dense<0.000000e+00> : vector<16x8xf32>
    %419 = tpu.matmul %416, %418, %cst_197 {dimension_numbers = #tpu.dot_dimension_numbers<[1], [0], [0], [1], [0, 0, 1, 1], [], []>} : vector<16x16xbf16>, vector<16x8xbf16>, vector<16x8xf32> -> vector<16x8xf32>
    %420 = arith.truncf %419 : vector<16x8xf32> to vector<16x8xbf16>
    %c2_198 = arith.constant 2 : index
    %c2_199 = arith.constant 2 : index
    %c0_200 = arith.constant 0 : index
    %c0_201 = arith.constant 0 : index
    %421 = vector.load %arg6[%c2_198, %c2_199, %c0_200, %c0_201] : memref<6x4x8x32xbf16, #tpu.memory_space<vmem>>, vector<1x1x8x32xbf16>
    %422 = vector.shape_cast %421 : vector<1x1x8x32xbf16> to vector<8x32xbf16>
    %cst_202 = arith.constant dense<0.000000e+00> : vector<16x32xf32>
    %423 = tpu.matmul %420, %422, %cst_202 {dimension_numbers = #tpu.dot_dimension_numbers<[1], [0], [0], [1], [0, 0, 1, 1], [], []>} : vector<16x8xbf16>, vector<8x32xbf16>, vector<16x32xf32> -> vector<16x32xf32>
    %424 = arith.addf %397, %423 : vector<16x32xf32>
    %425 = vector.extract_strided_slice %342 {offsets = [0, 24], sizes = [16, 8], strides = [1, 1]} : vector<16x32xf32> to vector<16x8xf32>
    %426 = arith.truncf %425 : vector<16x8xf32> to vector<16x8xbf16>
    %427 = vector.extract_strided_slice %343 {offsets = [0, 24], sizes = [16, 8], strides = [1, 1]} : vector<16x32xf32> to vector<16x8xf32>
    %428 = arith.truncf %427 : vector<16x8xf32> to vector<16x8xbf16>
    %cst_203 = arith.constant dense<0.000000e+00> : vector<16x16xf32>
    %429 = tpu.matmul %426, %428, %cst_203 {dimension_numbers = #tpu.dot_dimension_numbers<[1], [1], [0], [0], [0, 0, 1, 0], [], []>} : vector<16x8xbf16>, vector<16x8xbf16>, vector<16x16xf32> -> vector<16x16xf32>
    %c0_204 = arith.constant 0 : index
    %c7 = arith.constant 7 : index
    %c0_205 = arith.constant 0 : index
    %c0_206 = arith.constant 0 : index
    %430 = vector.load %arg3[%c0_204, %c7, %c0_205, %c0_206] : memref<1x12x16x16xf32, #tpu.memory_space<vmem>>, vector<1x1x16x16xf32>
    %431 = vector.shape_cast %430 : vector<1x1x16x16xf32> to vector<16x16xf32>
    %432 = arith.addf %429, %431 : vector<16x16xf32>
    %cst_207 = arith.constant dense<0xFF800000> : vector<16xf32>
    %433 = vector.multi_reduction <maximumf>, %432, %cst_207 [1] : vector<16x16xf32> to vector<16xf32>
    %434 = vector.shape_cast %433 : vector<16xf32> to vector<16x1xf32>
    %435 = vector.broadcast %434 : vector<16x1xf32> to vector<16x16xf32>
    %436 = arith.subf %432, %435 : vector<16x16xf32>
    %437 = math.exp %436 : vector<16x16xf32>
    %cst_208 = arith.constant dense<0.000000e+00> : vector<16xf32>
    %438 = vector.multi_reduction <add>, %437, %cst_208 [1] : vector<16x16xf32> to vector<16xf32>
    %439 = vector.shape_cast %438 : vector<16xf32> to vector<16x1xf32>
    %440 = tpu.reciprocal %439 {approx = true} : vector<16x1xf32> -> vector<16x1xf32>
    %441 = vector.broadcast %440 : vector<16x1xf32> to vector<16x16xf32>
    %442 = arith.mulf %437, %441 : vector<16x16xf32>
    %443 = arith.truncf %442 : vector<16x16xf32> to vector<16x16xbf16>
    %444 = vector.extract_strided_slice %344 {offsets = [0, 24], sizes = [16, 8], strides = [1, 1]} : vector<16x32xf32> to vector<16x8xf32>
    %445 = arith.truncf %444 : vector<16x8xf32> to vector<16x8xbf16>
    %cst_209 = arith.constant dense<0.000000e+00> : vector<16x8xf32>
    %446 = tpu.matmul %443, %445, %cst_209 {dimension_numbers = #tpu.dot_dimension_numbers<[1], [0], [0], [1], [0, 0, 1, 1], [], []>} : vector<16x16xbf16>, vector<16x8xbf16>, vector<16x8xf32> -> vector<16x8xf32>
    %447 = arith.truncf %446 : vector<16x8xf32> to vector<16x8xbf16>
    %c2_210 = arith.constant 2 : index
    %c3_211 = arith.constant 3 : index
    %c0_212 = arith.constant 0 : index
    %c0_213 = arith.constant 0 : index
    %448 = vector.load %arg6[%c2_210, %c3_211, %c0_212, %c0_213] : memref<6x4x8x32xbf16, #tpu.memory_space<vmem>>, vector<1x1x8x32xbf16>
    %449 = vector.shape_cast %448 : vector<1x1x8x32xbf16> to vector<8x32xbf16>
    %cst_214 = arith.constant dense<0.000000e+00> : vector<16x32xf32>
    %450 = tpu.matmul %447, %449, %cst_214 {dimension_numbers = #tpu.dot_dimension_numbers<[1], [0], [0], [1], [0, 0, 1, 1], [], []>} : vector<16x8xbf16>, vector<8x32xbf16>, vector<16x32xf32> -> vector<16x32xf32>
    %451 = arith.addf %424, %450 : vector<16x32xf32>
    %452 = arith.addf %1, %451 : vector<16x32xf32>
    %453 = arith.mulf %452, %452 : vector<16x32xf32>
    %cst_215 = arith.constant dense<0.000000e+00> : vector<16xf32>
    %454 = vector.multi_reduction <add>, %453, %cst_215 [1] : vector<16x32xf32> to vector<16xf32>
    %455 = vector.shape_cast %454 : vector<16xf32> to vector<16x1xf32>
    %cst_216 = arith.constant 3.200000e+01 : f32
    %456 = vector.broadcast %cst_216 : f32 to vector<16x1xf32>
    %457 = arith.divf %455, %456 : vector<16x1xf32>
    %cst_217 = arith.constant 9.99999997E-7 : f32
    %458 = vector.broadcast %cst_217 : f32 to vector<16x1xf32>
    %459 = arith.addf %457, %458 : vector<16x1xf32>
    %460 = math.rsqrt %459 : vector<16x1xf32>
    %461 = vector.broadcast %460 : vector<16x1xf32> to vector<16x32xf32>
    %462 = arith.mulf %452, %461 : vector<16x32xf32>
    %c5_218 = arith.constant 5 : index
    %c0_219 = arith.constant 0 : index
    %c0_220 = arith.constant 0 : index
    %463 = vector.load %arg4[%c5_218, %c0_219, %c0_220] : memref<12x1x32xf32, #tpu.memory_space<vmem>>, vector<1x1x32xf32>
    %464 = vector.shape_cast %463 : vector<1x1x32xf32> to vector<1x32xf32>
    %465 = vector.broadcast %464 : vector<1x32xf32> to vector<16x32xf32>
    %466 = arith.mulf %462, %465 : vector<16x32xf32>
    %c0_221 = arith.constant 0 : index
    %c0_222 = arith.constant 0 : index
    %c0_223 = arith.constant 0 : index
    %467 = vector.load %arg9[%c0_221, %c0_222, %c0_223] : memref<2x32x32xbf16, #tpu.memory_space<vmem>>, vector<1x32x32xbf16>
    %468 = vector.shape_cast %467 : vector<1x32x32xbf16> to vector<32x32xbf16>
    %469 = arith.truncf %466 : vector<16x32xf32> to vector<16x32xbf16>
    %cst_224 = arith.constant dense<0.000000e+00> : vector<16x32xf32>
    %470 = tpu.matmul %469, %468, %cst_224 {dimension_numbers = #tpu.dot_dimension_numbers<[1], [0], [0], [1], [0, 0, 1, 1], [], []>} : vector<16x32xbf16>, vector<32x32xbf16>, vector<16x32xf32> -> vector<16x32xf32>
    %c0_225 = arith.constant 0 : index
    %c0_226 = arith.constant 0 : index
    %c0_227 = arith.constant 0 : index
    %471 = vector.load %arg10[%c0_225, %c0_226, %c0_227] : memref<2x32x64xbf16, #tpu.memory_space<vmem>>, vector<1x32x64xbf16>
    %472 = vector.shape_cast %471 : vector<1x32x64xbf16> to vector<32x64xbf16>
    %473 = arith.truncf %323 : vector<16x32xf32> to vector<16x32xbf16>
    %cst_228 = arith.constant dense<0.000000e+00> : vector<16x64xf32>
    %474 = tpu.matmul %473, %472, %cst_228 {dimension_numbers = #tpu.dot_dimension_numbers<[1], [0], [0], [1], [0, 0, 1, 1], [], []>} : vector<16x32xbf16>, vector<32x64xbf16>, vector<16x64xf32> -> vector<16x64xf32>
    %475 = vector.extract_strided_slice %474 {offsets = [0, 0], sizes = [16, 32], strides = [1, 1]} : vector<16x64xf32> to vector<16x32xf32>
    %476 = vector.extract_strided_slice %474 {offsets = [0, 32], sizes = [16, 32], strides = [1, 1]} : vector<16x64xf32> to vector<16x32xf32>
    %477 = vector.extract_strided_slice %470 {offsets = [0, 0], sizes = [16, 8], strides = [1, 1]} : vector<16x32xf32> to vector<16x8xf32>
    %478 = arith.truncf %477 : vector<16x8xf32> to vector<16x8xbf16>
    %479 = vector.extract_strided_slice %475 {offsets = [0, 0], sizes = [16, 8], strides = [1, 1]} : vector<16x32xf32> to vector<16x8xf32>
    %480 = arith.truncf %479 : vector<16x8xf32> to vector<16x8xbf16>
    %cst_229 = arith.constant dense<0.000000e+00> : vector<16x16xf32>
    %481 = tpu.matmul %478, %480, %cst_229 {dimension_numbers = #tpu.dot_dimension_numbers<[1], [1], [0], [0], [0, 0, 1, 0], [], []>} : vector<16x8xbf16>, vector<16x8xbf16>, vector<16x16xf32> -> vector<16x16xf32>
    %c0_230 = arith.constant 0 : index
    %c8 = arith.constant 8 : index
    %c0_231 = arith.constant 0 : index
    %c0_232 = arith.constant 0 : index
    %482 = vector.load %arg3[%c0_230, %c8, %c0_231, %c0_232] : memref<1x12x16x16xf32, #tpu.memory_space<vmem>>, vector<1x1x16x16xf32>
    %483 = vector.shape_cast %482 : vector<1x1x16x16xf32> to vector<16x16xf32>
    %484 = arith.addf %481, %483 : vector<16x16xf32>
    %cst_233 = arith.constant dense<0xFF800000> : vector<16xf32>
    %485 = vector.multi_reduction <maximumf>, %484, %cst_233 [1] : vector<16x16xf32> to vector<16xf32>
    %486 = vector.shape_cast %485 : vector<16xf32> to vector<16x1xf32>
    %487 = vector.broadcast %486 : vector<16x1xf32> to vector<16x16xf32>
    %488 = arith.subf %484, %487 : vector<16x16xf32>
    %489 = math.exp %488 : vector<16x16xf32>
    %cst_234 = arith.constant dense<0.000000e+00> : vector<16xf32>
    %490 = vector.multi_reduction <add>, %489, %cst_234 [1] : vector<16x16xf32> to vector<16xf32>
    %491 = vector.shape_cast %490 : vector<16xf32> to vector<16x1xf32>
    %492 = tpu.reciprocal %491 {approx = true} : vector<16x1xf32> -> vector<16x1xf32>
    %493 = vector.broadcast %492 : vector<16x1xf32> to vector<16x16xf32>
    %494 = arith.mulf %489, %493 : vector<16x16xf32>
    %495 = arith.truncf %494 : vector<16x16xf32> to vector<16x16xbf16>
    %496 = vector.extract_strided_slice %476 {offsets = [0, 0], sizes = [16, 8], strides = [1, 1]} : vector<16x32xf32> to vector<16x8xf32>
    %497 = arith.truncf %496 : vector<16x8xf32> to vector<16x8xbf16>
    %cst_235 = arith.constant dense<0.000000e+00> : vector<16x8xf32>
    %498 = tpu.matmul %495, %497, %cst_235 {dimension_numbers = #tpu.dot_dimension_numbers<[1], [0], [0], [1], [0, 0, 1, 1], [], []>} : vector<16x16xbf16>, vector<16x8xbf16>, vector<16x8xf32> -> vector<16x8xf32>
    %499 = arith.truncf %498 : vector<16x8xf32> to vector<16x8xbf16>
    %c4_236 = arith.constant 4 : index
    %c0_237 = arith.constant 0 : index
    %c0_238 = arith.constant 0 : index
    %c0_239 = arith.constant 0 : index
    %500 = vector.load %arg6[%c4_236, %c0_237, %c0_238, %c0_239] : memref<6x4x8x32xbf16, #tpu.memory_space<vmem>>, vector<1x1x8x32xbf16>
    %501 = vector.shape_cast %500 : vector<1x1x8x32xbf16> to vector<8x32xbf16>
    %cst_240 = arith.constant dense<0.000000e+00> : vector<16x32xf32>
    %502 = tpu.matmul %499, %501, %cst_240 {dimension_numbers = #tpu.dot_dimension_numbers<[1], [0], [0], [1], [0, 0, 1, 1], [], []>} : vector<16x8xbf16>, vector<8x32xbf16>, vector<16x32xf32> -> vector<16x32xf32>
    %503 = vector.extract_strided_slice %470 {offsets = [0, 8], sizes = [16, 8], strides = [1, 1]} : vector<16x32xf32> to vector<16x8xf32>
    %504 = arith.truncf %503 : vector<16x8xf32> to vector<16x8xbf16>
    %505 = vector.extract_strided_slice %475 {offsets = [0, 8], sizes = [16, 8], strides = [1, 1]} : vector<16x32xf32> to vector<16x8xf32>
    %506 = arith.truncf %505 : vector<16x8xf32> to vector<16x8xbf16>
    %cst_241 = arith.constant dense<0.000000e+00> : vector<16x16xf32>
    %507 = tpu.matmul %504, %506, %cst_241 {dimension_numbers = #tpu.dot_dimension_numbers<[1], [1], [0], [0], [0, 0, 1, 0], [], []>} : vector<16x8xbf16>, vector<16x8xbf16>, vector<16x16xf32> -> vector<16x16xf32>
    %c0_242 = arith.constant 0 : index
    %c9 = arith.constant 9 : index
    %c0_243 = arith.constant 0 : index
    %c0_244 = arith.constant 0 : index
    %508 = vector.load %arg3[%c0_242, %c9, %c0_243, %c0_244] : memref<1x12x16x16xf32, #tpu.memory_space<vmem>>, vector<1x1x16x16xf32>
    %509 = vector.shape_cast %508 : vector<1x1x16x16xf32> to vector<16x16xf32>
    %510 = arith.addf %507, %509 : vector<16x16xf32>
    %cst_245 = arith.constant dense<0xFF800000> : vector<16xf32>
    %511 = vector.multi_reduction <maximumf>, %510, %cst_245 [1] : vector<16x16xf32> to vector<16xf32>
    %512 = vector.shape_cast %511 : vector<16xf32> to vector<16x1xf32>
    %513 = vector.broadcast %512 : vector<16x1xf32> to vector<16x16xf32>
    %514 = arith.subf %510, %513 : vector<16x16xf32>
    %515 = math.exp %514 : vector<16x16xf32>
    %cst_246 = arith.constant dense<0.000000e+00> : vector<16xf32>
    %516 = vector.multi_reduction <add>, %515, %cst_246 [1] : vector<16x16xf32> to vector<16xf32>
    %517 = vector.shape_cast %516 : vector<16xf32> to vector<16x1xf32>
    %518 = tpu.reciprocal %517 {approx = true} : vector<16x1xf32> -> vector<16x1xf32>
    %519 = vector.broadcast %518 : vector<16x1xf32> to vector<16x16xf32>
    %520 = arith.mulf %515, %519 : vector<16x16xf32>
    %521 = arith.truncf %520 : vector<16x16xf32> to vector<16x16xbf16>
    %522 = vector.extract_strided_slice %476 {offsets = [0, 8], sizes = [16, 8], strides = [1, 1]} : vector<16x32xf32> to vector<16x8xf32>
    %523 = arith.truncf %522 : vector<16x8xf32> to vector<16x8xbf16>
    %cst_247 = arith.constant dense<0.000000e+00> : vector<16x8xf32>
    %524 = tpu.matmul %521, %523, %cst_247 {dimension_numbers = #tpu.dot_dimension_numbers<[1], [0], [0], [1], [0, 0, 1, 1], [], []>} : vector<16x16xbf16>, vector<16x8xbf16>, vector<16x8xf32> -> vector<16x8xf32>
    %525 = arith.truncf %524 : vector<16x8xf32> to vector<16x8xbf16>
    %c4_248 = arith.constant 4 : index
    %c1_249 = arith.constant 1 : index
    %c0_250 = arith.constant 0 : index
    %c0_251 = arith.constant 0 : index
    %526 = vector.load %arg6[%c4_248, %c1_249, %c0_250, %c0_251] : memref<6x4x8x32xbf16, #tpu.memory_space<vmem>>, vector<1x1x8x32xbf16>
    %527 = vector.shape_cast %526 : vector<1x1x8x32xbf16> to vector<8x32xbf16>
    %cst_252 = arith.constant dense<0.000000e+00> : vector<16x32xf32>
    %528 = tpu.matmul %525, %527, %cst_252 {dimension_numbers = #tpu.dot_dimension_numbers<[1], [0], [0], [1], [0, 0, 1, 1], [], []>} : vector<16x8xbf16>, vector<8x32xbf16>, vector<16x32xf32> -> vector<16x32xf32>
    %529 = arith.addf %502, %528 : vector<16x32xf32>
    %530 = vector.extract_strided_slice %470 {offsets = [0, 16], sizes = [16, 8], strides = [1, 1]} : vector<16x32xf32> to vector<16x8xf32>
    %531 = arith.truncf %530 : vector<16x8xf32> to vector<16x8xbf16>
    %532 = vector.extract_strided_slice %475 {offsets = [0, 16], sizes = [16, 8], strides = [1, 1]} : vector<16x32xf32> to vector<16x8xf32>
    %533 = arith.truncf %532 : vector<16x8xf32> to vector<16x8xbf16>
    %cst_253 = arith.constant dense<0.000000e+00> : vector<16x16xf32>
    %534 = tpu.matmul %531, %533, %cst_253 {dimension_numbers = #tpu.dot_dimension_numbers<[1], [1], [0], [0], [0, 0, 1, 0], [], []>} : vector<16x8xbf16>, vector<16x8xbf16>, vector<16x16xf32> -> vector<16x16xf32>
    %c0_254 = arith.constant 0 : index
    %c10_255 = arith.constant 10 : index
    %c0_256 = arith.constant 0 : index
    %c0_257 = arith.constant 0 : index
    %535 = vector.load %arg3[%c0_254, %c10_255, %c0_256, %c0_257] : memref<1x12x16x16xf32, #tpu.memory_space<vmem>>, vector<1x1x16x16xf32>
    %536 = vector.shape_cast %535 : vector<1x1x16x16xf32> to vector<16x16xf32>
    %537 = arith.addf %534, %536 : vector<16x16xf32>
    %cst_258 = arith.constant dense<0xFF800000> : vector<16xf32>
    %538 = vector.multi_reduction <maximumf>, %537, %cst_258 [1] : vector<16x16xf32> to vector<16xf32>
    %539 = vector.shape_cast %538 : vector<16xf32> to vector<16x1xf32>
    %540 = vector.broadcast %539 : vector<16x1xf32> to vector<16x16xf32>
    %541 = arith.subf %537, %540 : vector<16x16xf32>
    %542 = math.exp %541 : vector<16x16xf32>
    %cst_259 = arith.constant dense<0.000000e+00> : vector<16xf32>
    %543 = vector.multi_reduction <add>, %542, %cst_259 [1] : vector<16x16xf32> to vector<16xf32>
    %544 = vector.shape_cast %543 : vector<16xf32> to vector<16x1xf32>
    %545 = tpu.reciprocal %544 {approx = true} : vector<16x1xf32> -> vector<16x1xf32>
    %546 = vector.broadcast %545 : vector<16x1xf32> to vector<16x16xf32>
    %547 = arith.mulf %542, %546 : vector<16x16xf32>
    %548 = arith.truncf %547 : vector<16x16xf32> to vector<16x16xbf16>
    %549 = vector.extract_strided_slice %476 {offsets = [0, 16], sizes = [16, 8], strides = [1, 1]} : vector<16x32xf32> to vector<16x8xf32>
    %550 = arith.truncf %549 : vector<16x8xf32> to vector<16x8xbf16>
    %cst_260 = arith.constant dense<0.000000e+00> : vector<16x8xf32>
    %551 = tpu.matmul %548, %550, %cst_260 {dimension_numbers = #tpu.dot_dimension_numbers<[1], [0], [0], [1], [0, 0, 1, 1], [], []>} : vector<16x16xbf16>, vector<16x8xbf16>, vector<16x8xf32> -> vector<16x8xf32>
    %552 = arith.truncf %551 : vector<16x8xf32> to vector<16x8xbf16>
    %c4_261 = arith.constant 4 : index
    %c2_262 = arith.constant 2 : index
    %c0_263 = arith.constant 0 : index
    %c0_264 = arith.constant 0 : index
    %553 = vector.load %arg6[%c4_261, %c2_262, %c0_263, %c0_264] : memref<6x4x8x32xbf16, #tpu.memory_space<vmem>>, vector<1x1x8x32xbf16>
    %554 = vector.shape_cast %553 : vector<1x1x8x32xbf16> to vector<8x32xbf16>
    %cst_265 = arith.constant dense<0.000000e+00> : vector<16x32xf32>
    %555 = tpu.matmul %552, %554, %cst_265 {dimension_numbers = #tpu.dot_dimension_numbers<[1], [0], [0], [1], [0, 0, 1, 1], [], []>} : vector<16x8xbf16>, vector<8x32xbf16>, vector<16x32xf32> -> vector<16x32xf32>
    %556 = arith.addf %529, %555 : vector<16x32xf32>
    %557 = vector.extract_strided_slice %470 {offsets = [0, 24], sizes = [16, 8], strides = [1, 1]} : vector<16x32xf32> to vector<16x8xf32>
    %558 = arith.truncf %557 : vector<16x8xf32> to vector<16x8xbf16>
    %559 = vector.extract_strided_slice %475 {offsets = [0, 24], sizes = [16, 8], strides = [1, 1]} : vector<16x32xf32> to vector<16x8xf32>
    %560 = arith.truncf %559 : vector<16x8xf32> to vector<16x8xbf16>
    %cst_266 = arith.constant dense<0.000000e+00> : vector<16x16xf32>
    %561 = tpu.matmul %558, %560, %cst_266 {dimension_numbers = #tpu.dot_dimension_numbers<[1], [1], [0], [0], [0, 0, 1, 0], [], []>} : vector<16x8xbf16>, vector<16x8xbf16>, vector<16x16xf32> -> vector<16x16xf32>
    %c0_267 = arith.constant 0 : index
    %c11 = arith.constant 11 : index
    %c0_268 = arith.constant 0 : index
    %c0_269 = arith.constant 0 : index
    %562 = vector.load %arg3[%c0_267, %c11, %c0_268, %c0_269] : memref<1x12x16x16xf32, #tpu.memory_space<vmem>>, vector<1x1x16x16xf32>
    %563 = vector.shape_cast %562 : vector<1x1x16x16xf32> to vector<16x16xf32>
    %564 = arith.addf %561, %563 : vector<16x16xf32>
    %cst_270 = arith.constant dense<0xFF800000> : vector<16xf32>
    %565 = vector.multi_reduction <maximumf>, %564, %cst_270 [1] : vector<16x16xf32> to vector<16xf32>
    %566 = vector.shape_cast %565 : vector<16xf32> to vector<16x1xf32>
    %567 = vector.broadcast %566 : vector<16x1xf32> to vector<16x16xf32>
    %568 = arith.subf %564, %567 : vector<16x16xf32>
    %569 = math.exp %568 : vector<16x16xf32>
    %cst_271 = arith.constant dense<0.000000e+00> : vector<16xf32>
    %570 = vector.multi_reduction <add>, %569, %cst_271 [1] : vector<16x16xf32> to vector<16xf32>
    %571 = vector.shape_cast %570 : vector<16xf32> to vector<16x1xf32>
    %572 = tpu.reciprocal %571 {approx = true} : vector<16x1xf32> -> vector<16x1xf32>
    %573 = vector.broadcast %572 : vector<16x1xf32> to vector<16x16xf32>
    %574 = arith.mulf %569, %573 : vector<16x16xf32>
    %575 = arith.truncf %574 : vector<16x16xf32> to vector<16x16xbf16>
    %576 = vector.extract_strided_slice %476 {offsets = [0, 24], sizes = [16, 8], strides = [1, 1]} : vector<16x32xf32> to vector<16x8xf32>
    %577 = arith.truncf %576 : vector<16x8xf32> to vector<16x8xbf16>
    %cst_272 = arith.constant dense<0.000000e+00> : vector<16x8xf32>
    %578 = tpu.matmul %575, %577, %cst_272 {dimension_numbers = #tpu.dot_dimension_numbers<[1], [0], [0], [1], [0, 0, 1, 1], [], []>} : vector<16x16xbf16>, vector<16x8xbf16>, vector<16x8xf32> -> vector<16x8xf32>
    %579 = arith.truncf %578 : vector<16x8xf32> to vector<16x8xbf16>
    %c4_273 = arith.constant 4 : index
    %c3_274 = arith.constant 3 : index
    %c0_275 = arith.constant 0 : index
    %c0_276 = arith.constant 0 : index
    %580 = vector.load %arg6[%c4_273, %c3_274, %c0_275, %c0_276] : memref<6x4x8x32xbf16, #tpu.memory_space<vmem>>, vector<1x1x8x32xbf16>
    %581 = vector.shape_cast %580 : vector<1x1x8x32xbf16> to vector<8x32xbf16>
    %cst_277 = arith.constant dense<0.000000e+00> : vector<16x32xf32>
    %582 = tpu.matmul %579, %581, %cst_277 {dimension_numbers = #tpu.dot_dimension_numbers<[1], [0], [0], [1], [0, 0, 1, 1], [], []>} : vector<16x8xbf16>, vector<8x32xbf16>, vector<16x32xf32> -> vector<16x32xf32>
    %583 = arith.addf %556, %582 : vector<16x32xf32>
    %584 = arith.addf %452, %583 : vector<16x32xf32>
    %585 = arith.mulf %584, %584 : vector<16x32xf32>
    %cst_278 = arith.constant dense<0.000000e+00> : vector<16xf32>
    %586 = vector.multi_reduction <add>, %585, %cst_278 [1] : vector<16x32xf32> to vector<16xf32>
    %587 = vector.shape_cast %586 : vector<16xf32> to vector<16x1xf32>
    %cst_279 = arith.constant 3.200000e+01 : f32
    %588 = vector.broadcast %cst_279 : f32 to vector<16x1xf32>
    %589 = arith.divf %587, %588 : vector<16x1xf32>
    %cst_280 = arith.constant 9.99999997E-7 : f32
    %590 = vector.broadcast %cst_280 : f32 to vector<16x1xf32>
    %591 = arith.addf %589, %590 : vector<16x1xf32>
    %592 = math.rsqrt %591 : vector<16x1xf32>
    %593 = vector.broadcast %592 : vector<16x1xf32> to vector<16x32xf32>
    %594 = arith.mulf %584, %593 : vector<16x32xf32>
    %c6_281 = arith.constant 6 : index
    %c0_282 = arith.constant 0 : index
    %c0_283 = arith.constant 0 : index
    %595 = vector.load %arg4[%c6_281, %c0_282, %c0_283] : memref<12x1x32xf32, #tpu.memory_space<vmem>>, vector<1x1x32xf32>
    %596 = vector.shape_cast %595 : vector<1x1x32xf32> to vector<1x32xf32>
    %597 = vector.broadcast %596 : vector<1x32xf32> to vector<16x32xf32>
    %598 = arith.mulf %594, %597 : vector<16x32xf32>
    %c2_284 = arith.constant 2 : index
    %c0_285 = arith.constant 0 : index
    %c0_286 = arith.constant 0 : index
    %599 = vector.load %arg7[%c2_284, %c0_285, %c0_286] : memref<4x32x64xbf16, #tpu.memory_space<vmem>>, vector<1x32x64xbf16>
    %600 = vector.shape_cast %599 : vector<1x32x64xbf16> to vector<32x64xbf16>
    %601 = arith.truncf %598 : vector<16x32xf32> to vector<16x32xbf16>
    %cst_287 = arith.constant dense<0.000000e+00> : vector<16x64xf32>
    %602 = tpu.matmul %601, %600, %cst_287 {dimension_numbers = #tpu.dot_dimension_numbers<[1], [0], [0], [1], [0, 0, 1, 1], [], []>} : vector<16x32xbf16>, vector<32x64xbf16>, vector<16x64xf32> -> vector<16x64xf32>
    %cst_288 = arith.constant 0.000000e+00 : f32
    %603 = vector.broadcast %cst_288 : f32 to vector<16x64xf32>
    %604 = arith.maximumf %602, %603 : vector<16x64xf32>
    %c2_289 = arith.constant 2 : index
    %c0_290 = arith.constant 0 : index
    %c0_291 = arith.constant 0 : index
    %605 = vector.load %arg8[%c2_289, %c0_290, %c0_291] : memref<4x64x32xbf16, #tpu.memory_space<vmem>>, vector<1x64x32xbf16>
    %606 = vector.shape_cast %605 : vector<1x64x32xbf16> to vector<64x32xbf16>
    %607 = arith.truncf %604 : vector<16x64xf32> to vector<16x64xbf16>
    %cst_292 = arith.constant dense<0.000000e+00> : vector<16x32xf32>
    %608 = tpu.matmul %607, %606, %cst_292 {dimension_numbers = #tpu.dot_dimension_numbers<[1], [0], [0], [1], [0, 0, 1, 1], [], []>} : vector<16x64xbf16>, vector<64x32xbf16>, vector<16x32xf32> -> vector<16x32xf32>
    %609 = arith.addf %584, %608 : vector<16x32xf32>
    %610 = arith.mulf %609, %609 : vector<16x32xf32>
    %cst_293 = arith.constant dense<0.000000e+00> : vector<16xf32>
    %611 = vector.multi_reduction <add>, %610, %cst_293 [1] : vector<16x32xf32> to vector<16xf32>
    %612 = vector.shape_cast %611 : vector<16xf32> to vector<16x1xf32>
    %cst_294 = arith.constant 3.200000e+01 : f32
    %613 = vector.broadcast %cst_294 : f32 to vector<16x1xf32>
    %614 = arith.divf %612, %613 : vector<16x1xf32>
    %cst_295 = arith.constant 9.99999997E-7 : f32
    %615 = vector.broadcast %cst_295 : f32 to vector<16x1xf32>
    %616 = arith.addf %614, %615 : vector<16x1xf32>
    %617 = math.rsqrt %616 : vector<16x1xf32>
    %618 = vector.broadcast %617 : vector<16x1xf32> to vector<16x32xf32>
    %619 = arith.mulf %609, %618 : vector<16x32xf32>
    %c7_296 = arith.constant 7 : index
    %c0_297 = arith.constant 0 : index
    %c0_298 = arith.constant 0 : index
    %620 = vector.load %arg4[%c7_296, %c0_297, %c0_298] : memref<12x1x32xf32, #tpu.memory_space<vmem>>, vector<1x1x32xf32>
    %621 = vector.shape_cast %620 : vector<1x1x32xf32> to vector<1x32xf32>
    %622 = vector.broadcast %621 : vector<1x32xf32> to vector<16x32xf32>
    %623 = arith.mulf %619, %622 : vector<16x32xf32>
    %c3_299 = arith.constant 3 : index
    %c0_300 = arith.constant 0 : index
    %c0_301 = arith.constant 0 : index
    %624 = vector.load %arg5[%c3_299, %c0_300, %c0_301] : memref<4x32x96xbf16, #tpu.memory_space<vmem>>, vector<1x32x96xbf16>
    %625 = vector.shape_cast %624 : vector<1x32x96xbf16> to vector<32x96xbf16>
    %626 = arith.truncf %623 : vector<16x32xf32> to vector<16x32xbf16>
    %cst_302 = arith.constant dense<0.000000e+00> : vector<16x96xf32>
    %627 = tpu.matmul %626, %625, %cst_302 {dimension_numbers = #tpu.dot_dimension_numbers<[1], [0], [0], [1], [0, 0, 1, 1], [], []>} : vector<16x32xbf16>, vector<32x96xbf16>, vector<16x96xf32> -> vector<16x96xf32>
    %628 = vector.extract_strided_slice %627 {offsets = [0, 0], sizes = [16, 32], strides = [1, 1]} : vector<16x96xf32> to vector<16x32xf32>
    %629 = vector.extract_strided_slice %627 {offsets = [0, 32], sizes = [16, 32], strides = [1, 1]} : vector<16x96xf32> to vector<16x32xf32>
    %630 = vector.extract_strided_slice %627 {offsets = [0, 64], sizes = [16, 32], strides = [1, 1]} : vector<16x96xf32> to vector<16x32xf32>
    %631 = vector.extract_strided_slice %628 {offsets = [0, 0], sizes = [16, 8], strides = [1, 1]} : vector<16x32xf32> to vector<16x8xf32>
    %632 = arith.truncf %631 : vector<16x8xf32> to vector<16x8xbf16>
    %633 = vector.extract_strided_slice %629 {offsets = [0, 0], sizes = [16, 8], strides = [1, 1]} : vector<16x32xf32> to vector<16x8xf32>
    %634 = arith.truncf %633 : vector<16x8xf32> to vector<16x8xbf16>
    %cst_303 = arith.constant dense<0.000000e+00> : vector<16x16xf32>
    %635 = tpu.matmul %632, %634, %cst_303 {dimension_numbers = #tpu.dot_dimension_numbers<[1], [1], [0], [0], [0, 0, 1, 0], [], []>} : vector<16x8xbf16>, vector<16x8xbf16>, vector<16x16xf32> -> vector<16x16xf32>
    %c0_304 = arith.constant 0 : index
    %c4_305 = arith.constant 4 : index
    %c0_306 = arith.constant 0 : index
    %c0_307 = arith.constant 0 : index
    %636 = vector.load %arg3[%c0_304, %c4_305, %c0_306, %c0_307] : memref<1x12x16x16xf32, #tpu.memory_space<vmem>>, vector<1x1x16x16xf32>
    %637 = vector.shape_cast %636 : vector<1x1x16x16xf32> to vector<16x16xf32>
    %638 = arith.addf %635, %637 : vector<16x16xf32>
    %cst_308 = arith.constant dense<0xFF800000> : vector<16xf32>
    %639 = vector.multi_reduction <maximumf>, %638, %cst_308 [1] : vector<16x16xf32> to vector<16xf32>
    %640 = vector.shape_cast %639 : vector<16xf32> to vector<16x1xf32>
    %641 = vector.broadcast %640 : vector<16x1xf32> to vector<16x16xf32>
    %642 = arith.subf %638, %641 : vector<16x16xf32>
    %643 = math.exp %642 : vector<16x16xf32>
    %cst_309 = arith.constant dense<0.000000e+00> : vector<16xf32>
    %644 = vector.multi_reduction <add>, %643, %cst_309 [1] : vector<16x16xf32> to vector<16xf32>
    %645 = vector.shape_cast %644 : vector<16xf32> to vector<16x1xf32>
    %646 = tpu.reciprocal %645 {approx = true} : vector<16x1xf32> -> vector<16x1xf32>
    %647 = vector.broadcast %646 : vector<16x1xf32> to vector<16x16xf32>
    %648 = arith.mulf %643, %647 : vector<16x16xf32>
    %649 = arith.truncf %648 : vector<16x16xf32> to vector<16x16xbf16>
    %650 = vector.extract_strided_slice %630 {offsets = [0, 0], sizes = [16, 8], strides = [1, 1]} : vector<16x32xf32> to vector<16x8xf32>
    %651 = arith.truncf %650 : vector<16x8xf32> to vector<16x8xbf16>
    %cst_310 = arith.constant dense<0.000000e+00> : vector<16x8xf32>
    %652 = tpu.matmul %649, %651, %cst_310 {dimension_numbers = #tpu.dot_dimension_numbers<[1], [0], [0], [1], [0, 0, 1, 1], [], []>} : vector<16x16xbf16>, vector<16x8xbf16>, vector<16x8xf32> -> vector<16x8xf32>
    %653 = arith.truncf %652 : vector<16x8xf32> to vector<16x8xbf16>
    %c3_311 = arith.constant 3 : index
    %c0_312 = arith.constant 0 : index
    %c0_313 = arith.constant 0 : index
    %c0_314 = arith.constant 0 : index
    %654 = vector.load %arg6[%c3_311, %c0_312, %c0_313, %c0_314] : memref<6x4x8x32xbf16, #tpu.memory_space<vmem>>, vector<1x1x8x32xbf16>
    %655 = vector.shape_cast %654 : vector<1x1x8x32xbf16> to vector<8x32xbf16>
    %cst_315 = arith.constant dense<0.000000e+00> : vector<16x32xf32>
    %656 = tpu.matmul %653, %655, %cst_315 {dimension_numbers = #tpu.dot_dimension_numbers<[1], [0], [0], [1], [0, 0, 1, 1], [], []>} : vector<16x8xbf16>, vector<8x32xbf16>, vector<16x32xf32> -> vector<16x32xf32>
    %657 = vector.extract_strided_slice %628 {offsets = [0, 8], sizes = [16, 8], strides = [1, 1]} : vector<16x32xf32> to vector<16x8xf32>
    %658 = arith.truncf %657 : vector<16x8xf32> to vector<16x8xbf16>
    %659 = vector.extract_strided_slice %629 {offsets = [0, 8], sizes = [16, 8], strides = [1, 1]} : vector<16x32xf32> to vector<16x8xf32>
    %660 = arith.truncf %659 : vector<16x8xf32> to vector<16x8xbf16>
    %cst_316 = arith.constant dense<0.000000e+00> : vector<16x16xf32>
    %661 = tpu.matmul %658, %660, %cst_316 {dimension_numbers = #tpu.dot_dimension_numbers<[1], [1], [0], [0], [0, 0, 1, 0], [], []>} : vector<16x8xbf16>, vector<16x8xbf16>, vector<16x16xf32> -> vector<16x16xf32>
    %c0_317 = arith.constant 0 : index
    %c5_318 = arith.constant 5 : index
    %c0_319 = arith.constant 0 : index
    %c0_320 = arith.constant 0 : index
    %662 = vector.load %arg3[%c0_317, %c5_318, %c0_319, %c0_320] : memref<1x12x16x16xf32, #tpu.memory_space<vmem>>, vector<1x1x16x16xf32>
    %663 = vector.shape_cast %662 : vector<1x1x16x16xf32> to vector<16x16xf32>
    %664 = arith.addf %661, %663 : vector<16x16xf32>
    %cst_321 = arith.constant dense<0xFF800000> : vector<16xf32>
    %665 = vector.multi_reduction <maximumf>, %664, %cst_321 [1] : vector<16x16xf32> to vector<16xf32>
    %666 = vector.shape_cast %665 : vector<16xf32> to vector<16x1xf32>
    %667 = vector.broadcast %666 : vector<16x1xf32> to vector<16x16xf32>
    %668 = arith.subf %664, %667 : vector<16x16xf32>
    %669 = math.exp %668 : vector<16x16xf32>
    %cst_322 = arith.constant dense<0.000000e+00> : vector<16xf32>
    %670 = vector.multi_reduction <add>, %669, %cst_322 [1] : vector<16x16xf32> to vector<16xf32>
    %671 = vector.shape_cast %670 : vector<16xf32> to vector<16x1xf32>
    %672 = tpu.reciprocal %671 {approx = true} : vector<16x1xf32> -> vector<16x1xf32>
    %673 = vector.broadcast %672 : vector<16x1xf32> to vector<16x16xf32>
    %674 = arith.mulf %669, %673 : vector<16x16xf32>
    %675 = arith.truncf %674 : vector<16x16xf32> to vector<16x16xbf16>
    %676 = vector.extract_strided_slice %630 {offsets = [0, 8], sizes = [16, 8], strides = [1, 1]} : vector<16x32xf32> to vector<16x8xf32>
    %677 = arith.truncf %676 : vector<16x8xf32> to vector<16x8xbf16>
    %cst_323 = arith.constant dense<0.000000e+00> : vector<16x8xf32>
    %678 = tpu.matmul %675, %677, %cst_323 {dimension_numbers = #tpu.dot_dimension_numbers<[1], [0], [0], [1], [0, 0, 1, 1], [], []>} : vector<16x16xbf16>, vector<16x8xbf16>, vector<16x8xf32> -> vector<16x8xf32>
    %679 = arith.truncf %678 : vector<16x8xf32> to vector<16x8xbf16>
    %c3_324 = arith.constant 3 : index
    %c1_325 = arith.constant 1 : index
    %c0_326 = arith.constant 0 : index
    %c0_327 = arith.constant 0 : index
    %680 = vector.load %arg6[%c3_324, %c1_325, %c0_326, %c0_327] : memref<6x4x8x32xbf16, #tpu.memory_space<vmem>>, vector<1x1x8x32xbf16>
    %681 = vector.shape_cast %680 : vector<1x1x8x32xbf16> to vector<8x32xbf16>
    %cst_328 = arith.constant dense<0.000000e+00> : vector<16x32xf32>
    %682 = tpu.matmul %679, %681, %cst_328 {dimension_numbers = #tpu.dot_dimension_numbers<[1], [0], [0], [1], [0, 0, 1, 1], [], []>} : vector<16x8xbf16>, vector<8x32xbf16>, vector<16x32xf32> -> vector<16x32xf32>
    %683 = arith.addf %656, %682 : vector<16x32xf32>
    %684 = vector.extract_strided_slice %628 {offsets = [0, 16], sizes = [16, 8], strides = [1, 1]} : vector<16x32xf32> to vector<16x8xf32>
    %685 = arith.truncf %684 : vector<16x8xf32> to vector<16x8xbf16>
    %686 = vector.extract_strided_slice %629 {offsets = [0, 16], sizes = [16, 8], strides = [1, 1]} : vector<16x32xf32> to vector<16x8xf32>
    %687 = arith.truncf %686 : vector<16x8xf32> to vector<16x8xbf16>
    %cst_329 = arith.constant dense<0.000000e+00> : vector<16x16xf32>
    %688 = tpu.matmul %685, %687, %cst_329 {dimension_numbers = #tpu.dot_dimension_numbers<[1], [1], [0], [0], [0, 0, 1, 0], [], []>} : vector<16x8xbf16>, vector<16x8xbf16>, vector<16x16xf32> -> vector<16x16xf32>
    %c0_330 = arith.constant 0 : index
    %c6_331 = arith.constant 6 : index
    %c0_332 = arith.constant 0 : index
    %c0_333 = arith.constant 0 : index
    %689 = vector.load %arg3[%c0_330, %c6_331, %c0_332, %c0_333] : memref<1x12x16x16xf32, #tpu.memory_space<vmem>>, vector<1x1x16x16xf32>
    %690 = vector.shape_cast %689 : vector<1x1x16x16xf32> to vector<16x16xf32>
    %691 = arith.addf %688, %690 : vector<16x16xf32>
    %cst_334 = arith.constant dense<0xFF800000> : vector<16xf32>
    %692 = vector.multi_reduction <maximumf>, %691, %cst_334 [1] : vector<16x16xf32> to vector<16xf32>
    %693 = vector.shape_cast %692 : vector<16xf32> to vector<16x1xf32>
    %694 = vector.broadcast %693 : vector<16x1xf32> to vector<16x16xf32>
    %695 = arith.subf %691, %694 : vector<16x16xf32>
    %696 = math.exp %695 : vector<16x16xf32>
    %cst_335 = arith.constant dense<0.000000e+00> : vector<16xf32>
    %697 = vector.multi_reduction <add>, %696, %cst_335 [1] : vector<16x16xf32> to vector<16xf32>
    %698 = vector.shape_cast %697 : vector<16xf32> to vector<16x1xf32>
    %699 = tpu.reciprocal %698 {approx = true} : vector<16x1xf32> -> vector<16x1xf32>
    %700 = vector.broadcast %699 : vector<16x1xf32> to vector<16x16xf32>
    %701 = arith.mulf %696, %700 : vector<16x16xf32>
    %702 = arith.truncf %701 : vector<16x16xf32> to vector<16x16xbf16>
    %703 = vector.extract_strided_slice %630 {offsets = [0, 16], sizes = [16, 8], strides = [1, 1]} : vector<16x32xf32> to vector<16x8xf32>
    %704 = arith.truncf %703 : vector<16x8xf32> to vector<16x8xbf16>
    %cst_336 = arith.constant dense<0.000000e+00> : vector<16x8xf32>
    %705 = tpu.matmul %702, %704, %cst_336 {dimension_numbers = #tpu.dot_dimension_numbers<[1], [0], [0], [1], [0, 0, 1, 1], [], []>} : vector<16x16xbf16>, vector<16x8xbf16>, vector<16x8xf32> -> vector<16x8xf32>
    %706 = arith.truncf %705 : vector<16x8xf32> to vector<16x8xbf16>
    %c3_337 = arith.constant 3 : index
    %c2_338 = arith.constant 2 : index
    %c0_339 = arith.constant 0 : index
    %c0_340 = arith.constant 0 : index
    %707 = vector.load %arg6[%c3_337, %c2_338, %c0_339, %c0_340] : memref<6x4x8x32xbf16, #tpu.memory_space<vmem>>, vector<1x1x8x32xbf16>
    %708 = vector.shape_cast %707 : vector<1x1x8x32xbf16> to vector<8x32xbf16>
    %cst_341 = arith.constant dense<0.000000e+00> : vector<16x32xf32>
    %709 = tpu.matmul %706, %708, %cst_341 {dimension_numbers = #tpu.dot_dimension_numbers<[1], [0], [0], [1], [0, 0, 1, 1], [], []>} : vector<16x8xbf16>, vector<8x32xbf16>, vector<16x32xf32> -> vector<16x32xf32>
    %710 = arith.addf %683, %709 : vector<16x32xf32>
    %711 = vector.extract_strided_slice %628 {offsets = [0, 24], sizes = [16, 8], strides = [1, 1]} : vector<16x32xf32> to vector<16x8xf32>
    %712 = arith.truncf %711 : vector<16x8xf32> to vector<16x8xbf16>
    %713 = vector.extract_strided_slice %629 {offsets = [0, 24], sizes = [16, 8], strides = [1, 1]} : vector<16x32xf32> to vector<16x8xf32>
    %714 = arith.truncf %713 : vector<16x8xf32> to vector<16x8xbf16>
    %cst_342 = arith.constant dense<0.000000e+00> : vector<16x16xf32>
    %715 = tpu.matmul %712, %714, %cst_342 {dimension_numbers = #tpu.dot_dimension_numbers<[1], [1], [0], [0], [0, 0, 1, 0], [], []>} : vector<16x8xbf16>, vector<16x8xbf16>, vector<16x16xf32> -> vector<16x16xf32>
    %c0_343 = arith.constant 0 : index
    %c7_344 = arith.constant 7 : index
    %c0_345 = arith.constant 0 : index
    %c0_346 = arith.constant 0 : index
    %716 = vector.load %arg3[%c0_343, %c7_344, %c0_345, %c0_346] : memref<1x12x16x16xf32, #tpu.memory_space<vmem>>, vector<1x1x16x16xf32>
    %717 = vector.shape_cast %716 : vector<1x1x16x16xf32> to vector<16x16xf32>
    %718 = arith.addf %715, %717 : vector<16x16xf32>
    %cst_347 = arith.constant dense<0xFF800000> : vector<16xf32>
    %719 = vector.multi_reduction <maximumf>, %718, %cst_347 [1] : vector<16x16xf32> to vector<16xf32>
    %720 = vector.shape_cast %719 : vector<16xf32> to vector<16x1xf32>
    %721 = vector.broadcast %720 : vector<16x1xf32> to vector<16x16xf32>
    %722 = arith.subf %718, %721 : vector<16x16xf32>
    %723 = math.exp %722 : vector<16x16xf32>
    %cst_348 = arith.constant dense<0.000000e+00> : vector<16xf32>
    %724 = vector.multi_reduction <add>, %723, %cst_348 [1] : vector<16x16xf32> to vector<16xf32>
    %725 = vector.shape_cast %724 : vector<16xf32> to vector<16x1xf32>
    %726 = tpu.reciprocal %725 {approx = true} : vector<16x1xf32> -> vector<16x1xf32>
    %727 = vector.broadcast %726 : vector<16x1xf32> to vector<16x16xf32>
    %728 = arith.mulf %723, %727 : vector<16x16xf32>
    %729 = arith.truncf %728 : vector<16x16xf32> to vector<16x16xbf16>
    %730 = vector.extract_strided_slice %630 {offsets = [0, 24], sizes = [16, 8], strides = [1, 1]} : vector<16x32xf32> to vector<16x8xf32>
    %731 = arith.truncf %730 : vector<16x8xf32> to vector<16x8xbf16>
    %cst_349 = arith.constant dense<0.000000e+00> : vector<16x8xf32>
    %732 = tpu.matmul %729, %731, %cst_349 {dimension_numbers = #tpu.dot_dimension_numbers<[1], [0], [0], [1], [0, 0, 1, 1], [], []>} : vector<16x16xbf16>, vector<16x8xbf16>, vector<16x8xf32> -> vector<16x8xf32>
    %733 = arith.truncf %732 : vector<16x8xf32> to vector<16x8xbf16>
    %c3_350 = arith.constant 3 : index
    %c3_351 = arith.constant 3 : index
    %c0_352 = arith.constant 0 : index
    %c0_353 = arith.constant 0 : index
    %734 = vector.load %arg6[%c3_350, %c3_351, %c0_352, %c0_353] : memref<6x4x8x32xbf16, #tpu.memory_space<vmem>>, vector<1x1x8x32xbf16>
    %735 = vector.shape_cast %734 : vector<1x1x8x32xbf16> to vector<8x32xbf16>
    %cst_354 = arith.constant dense<0.000000e+00> : vector<16x32xf32>
    %736 = tpu.matmul %733, %735, %cst_354 {dimension_numbers = #tpu.dot_dimension_numbers<[1], [0], [0], [1], [0, 0, 1, 1], [], []>} : vector<16x8xbf16>, vector<8x32xbf16>, vector<16x32xf32> -> vector<16x32xf32>
    %737 = arith.addf %710, %736 : vector<16x32xf32>
    %738 = arith.addf %609, %737 : vector<16x32xf32>
    %739 = arith.mulf %738, %738 : vector<16x32xf32>
    %cst_355 = arith.constant dense<0.000000e+00> : vector<16xf32>
    %740 = vector.multi_reduction <add>, %739, %cst_355 [1] : vector<16x32xf32> to vector<16xf32>
    %741 = vector.shape_cast %740 : vector<16xf32> to vector<16x1xf32>
    %cst_356 = arith.constant 3.200000e+01 : f32
    %742 = vector.broadcast %cst_356 : f32 to vector<16x1xf32>
    %743 = arith.divf %741, %742 : vector<16x1xf32>
    %cst_357 = arith.constant 9.99999997E-7 : f32
    %744 = vector.broadcast %cst_357 : f32 to vector<16x1xf32>
    %745 = arith.addf %743, %744 : vector<16x1xf32>
    %746 = math.rsqrt %745 : vector<16x1xf32>
    %747 = vector.broadcast %746 : vector<16x1xf32> to vector<16x32xf32>
    %748 = arith.mulf %738, %747 : vector<16x32xf32>
    %c8_358 = arith.constant 8 : index
    %c0_359 = arith.constant 0 : index
    %c0_360 = arith.constant 0 : index
    %749 = vector.load %arg4[%c8_358, %c0_359, %c0_360] : memref<12x1x32xf32, #tpu.memory_space<vmem>>, vector<1x1x32xf32>
    %750 = vector.shape_cast %749 : vector<1x1x32xf32> to vector<1x32xf32>
    %751 = vector.broadcast %750 : vector<1x32xf32> to vector<16x32xf32>
    %752 = arith.mulf %748, %751 : vector<16x32xf32>
    %c1_361 = arith.constant 1 : index
    %c0_362 = arith.constant 0 : index
    %c0_363 = arith.constant 0 : index
    %753 = vector.load %arg9[%c1_361, %c0_362, %c0_363] : memref<2x32x32xbf16, #tpu.memory_space<vmem>>, vector<1x32x32xbf16>
    %754 = vector.shape_cast %753 : vector<1x32x32xbf16> to vector<32x32xbf16>
    %755 = arith.truncf %752 : vector<16x32xf32> to vector<16x32xbf16>
    %cst_364 = arith.constant dense<0.000000e+00> : vector<16x32xf32>
    %756 = tpu.matmul %755, %754, %cst_364 {dimension_numbers = #tpu.dot_dimension_numbers<[1], [0], [0], [1], [0, 0, 1, 1], [], []>} : vector<16x32xbf16>, vector<32x32xbf16>, vector<16x32xf32> -> vector<16x32xf32>
    %c1_365 = arith.constant 1 : index
    %c0_366 = arith.constant 0 : index
    %c0_367 = arith.constant 0 : index
    %757 = vector.load %arg10[%c1_365, %c0_366, %c0_367] : memref<2x32x64xbf16, #tpu.memory_space<vmem>>, vector<1x32x64xbf16>
    %758 = vector.shape_cast %757 : vector<1x32x64xbf16> to vector<32x64xbf16>
    %759 = arith.truncf %323 : vector<16x32xf32> to vector<16x32xbf16>
    %cst_368 = arith.constant dense<0.000000e+00> : vector<16x64xf32>
    %760 = tpu.matmul %759, %758, %cst_368 {dimension_numbers = #tpu.dot_dimension_numbers<[1], [0], [0], [1], [0, 0, 1, 1], [], []>} : vector<16x32xbf16>, vector<32x64xbf16>, vector<16x64xf32> -> vector<16x64xf32>
    %761 = vector.extract_strided_slice %760 {offsets = [0, 0], sizes = [16, 32], strides = [1, 1]} : vector<16x64xf32> to vector<16x32xf32>
    %762 = vector.extract_strided_slice %760 {offsets = [0, 32], sizes = [16, 32], strides = [1, 1]} : vector<16x64xf32> to vector<16x32xf32>
    %763 = vector.extract_strided_slice %756 {offsets = [0, 0], sizes = [16, 8], strides = [1, 1]} : vector<16x32xf32> to vector<16x8xf32>
    %764 = arith.truncf %763 : vector<16x8xf32> to vector<16x8xbf16>
    %765 = vector.extract_strided_slice %761 {offsets = [0, 0], sizes = [16, 8], strides = [1, 1]} : vector<16x32xf32> to vector<16x8xf32>
    %766 = arith.truncf %765 : vector<16x8xf32> to vector<16x8xbf16>
    %cst_369 = arith.constant dense<0.000000e+00> : vector<16x16xf32>
    %767 = tpu.matmul %764, %766, %cst_369 {dimension_numbers = #tpu.dot_dimension_numbers<[1], [1], [0], [0], [0, 0, 1, 0], [], []>} : vector<16x8xbf16>, vector<16x8xbf16>, vector<16x16xf32> -> vector<16x16xf32>
    %c0_370 = arith.constant 0 : index
    %c8_371 = arith.constant 8 : index
    %c0_372 = arith.constant 0 : index
    %c0_373 = arith.constant 0 : index
    %768 = vector.load %arg3[%c0_370, %c8_371, %c0_372, %c0_373] : memref<1x12x16x16xf32, #tpu.memory_space<vmem>>, vector<1x1x16x16xf32>
    %769 = vector.shape_cast %768 : vector<1x1x16x16xf32> to vector<16x16xf32>
    %770 = arith.addf %767, %769 : vector<16x16xf32>
    %cst_374 = arith.constant dense<0xFF800000> : vector<16xf32>
    %771 = vector.multi_reduction <maximumf>, %770, %cst_374 [1] : vector<16x16xf32> to vector<16xf32>
    %772 = vector.shape_cast %771 : vector<16xf32> to vector<16x1xf32>
    %773 = vector.broadcast %772 : vector<16x1xf32> to vector<16x16xf32>
    %774 = arith.subf %770, %773 : vector<16x16xf32>
    %775 = math.exp %774 : vector<16x16xf32>
    %cst_375 = arith.constant dense<0.000000e+00> : vector<16xf32>
    %776 = vector.multi_reduction <add>, %775, %cst_375 [1] : vector<16x16xf32> to vector<16xf32>
    %777 = vector.shape_cast %776 : vector<16xf32> to vector<16x1xf32>
    %778 = tpu.reciprocal %777 {approx = true} : vector<16x1xf32> -> vector<16x1xf32>
    %779 = vector.broadcast %778 : vector<16x1xf32> to vector<16x16xf32>
    %780 = arith.mulf %775, %779 : vector<16x16xf32>
    %781 = arith.truncf %780 : vector<16x16xf32> to vector<16x16xbf16>
    %782 = vector.extract_strided_slice %762 {offsets = [0, 0], sizes = [16, 8], strides = [1, 1]} : vector<16x32xf32> to vector<16x8xf32>
    %783 = arith.truncf %782 : vector<16x8xf32> to vector<16x8xbf16>
    %cst_376 = arith.constant dense<0.000000e+00> : vector<16x8xf32>
    %784 = tpu.matmul %781, %783, %cst_376 {dimension_numbers = #tpu.dot_dimension_numbers<[1], [0], [0], [1], [0, 0, 1, 1], [], []>} : vector<16x16xbf16>, vector<16x8xbf16>, vector<16x8xf32> -> vector<16x8xf32>
    %785 = arith.truncf %784 : vector<16x8xf32> to vector<16x8xbf16>
    %c5_377 = arith.constant 5 : index
    %c0_378 = arith.constant 0 : index
    %c0_379 = arith.constant 0 : index
    %c0_380 = arith.constant 0 : index
    %786 = vector.load %arg6[%c5_377, %c0_378, %c0_379, %c0_380] : memref<6x4x8x32xbf16, #tpu.memory_space<vmem>>, vector<1x1x8x32xbf16>
    %787 = vector.shape_cast %786 : vector<1x1x8x32xbf16> to vector<8x32xbf16>
    %cst_381 = arith.constant dense<0.000000e+00> : vector<16x32xf32>
    %788 = tpu.matmul %785, %787, %cst_381 {dimension_numbers = #tpu.dot_dimension_numbers<[1], [0], [0], [1], [0, 0, 1, 1], [], []>} : vector<16x8xbf16>, vector<8x32xbf16>, vector<16x32xf32> -> vector<16x32xf32>
    %789 = vector.extract_strided_slice %756 {offsets = [0, 8], sizes = [16, 8], strides = [1, 1]} : vector<16x32xf32> to vector<16x8xf32>
    %790 = arith.truncf %789 : vector<16x8xf32> to vector<16x8xbf16>
    %791 = vector.extract_strided_slice %761 {offsets = [0, 8], sizes = [16, 8], strides = [1, 1]} : vector<16x32xf32> to vector<16x8xf32>
    %792 = arith.truncf %791 : vector<16x8xf32> to vector<16x8xbf16>
    %cst_382 = arith.constant dense<0.000000e+00> : vector<16x16xf32>
    %793 = tpu.matmul %790, %792, %cst_382 {dimension_numbers = #tpu.dot_dimension_numbers<[1], [1], [0], [0], [0, 0, 1, 0], [], []>} : vector<16x8xbf16>, vector<16x8xbf16>, vector<16x16xf32> -> vector<16x16xf32>
    %c0_383 = arith.constant 0 : index
    %c9_384 = arith.constant 9 : index
    %c0_385 = arith.constant 0 : index
    %c0_386 = arith.constant 0 : index
    %794 = vector.load %arg3[%c0_383, %c9_384, %c0_385, %c0_386] : memref<1x12x16x16xf32, #tpu.memory_space<vmem>>, vector<1x1x16x16xf32>
    %795 = vector.shape_cast %794 : vector<1x1x16x16xf32> to vector<16x16xf32>
    %796 = arith.addf %793, %795 : vector<16x16xf32>
    %cst_387 = arith.constant dense<0xFF800000> : vector<16xf32>
    %797 = vector.multi_reduction <maximumf>, %796, %cst_387 [1] : vector<16x16xf32> to vector<16xf32>
    %798 = vector.shape_cast %797 : vector<16xf32> to vector<16x1xf32>
    %799 = vector.broadcast %798 : vector<16x1xf32> to vector<16x16xf32>
    %800 = arith.subf %796, %799 : vector<16x16xf32>
    %801 = math.exp %800 : vector<16x16xf32>
    %cst_388 = arith.constant dense<0.000000e+00> : vector<16xf32>
    %802 = vector.multi_reduction <add>, %801, %cst_388 [1] : vector<16x16xf32> to vector<16xf32>
    %803 = vector.shape_cast %802 : vector<16xf32> to vector<16x1xf32>
    %804 = tpu.reciprocal %803 {approx = true} : vector<16x1xf32> -> vector<16x1xf32>
    %805 = vector.broadcast %804 : vector<16x1xf32> to vector<16x16xf32>
    %806 = arith.mulf %801, %805 : vector<16x16xf32>
    %807 = arith.truncf %806 : vector<16x16xf32> to vector<16x16xbf16>
    %808 = vector.extract_strided_slice %762 {offsets = [0, 8], sizes = [16, 8], strides = [1, 1]} : vector<16x32xf32> to vector<16x8xf32>
    %809 = arith.truncf %808 : vector<16x8xf32> to vector<16x8xbf16>
    %cst_389 = arith.constant dense<0.000000e+00> : vector<16x8xf32>
    %810 = tpu.matmul %807, %809, %cst_389 {dimension_numbers = #tpu.dot_dimension_numbers<[1], [0], [0], [1], [0, 0, 1, 1], [], []>} : vector<16x16xbf16>, vector<16x8xbf16>, vector<16x8xf32> -> vector<16x8xf32>
    %811 = arith.truncf %810 : vector<16x8xf32> to vector<16x8xbf16>
    %c5_390 = arith.constant 5 : index
    %c1_391 = arith.constant 1 : index
    %c0_392 = arith.constant 0 : index
    %c0_393 = arith.constant 0 : index
    %812 = vector.load %arg6[%c5_390, %c1_391, %c0_392, %c0_393] : memref<6x4x8x32xbf16, #tpu.memory_space<vmem>>, vector<1x1x8x32xbf16>
    %813 = vector.shape_cast %812 : vector<1x1x8x32xbf16> to vector<8x32xbf16>
    %cst_394 = arith.constant dense<0.000000e+00> : vector<16x32xf32>
    %814 = tpu.matmul %811, %813, %cst_394 {dimension_numbers = #tpu.dot_dimension_numbers<[1], [0], [0], [1], [0, 0, 1, 1], [], []>} : vector<16x8xbf16>, vector<8x32xbf16>, vector<16x32xf32> -> vector<16x32xf32>
    %815 = arith.addf %788, %814 : vector<16x32xf32>
    %816 = vector.extract_strided_slice %756 {offsets = [0, 16], sizes = [16, 8], strides = [1, 1]} : vector<16x32xf32> to vector<16x8xf32>
    %817 = arith.truncf %816 : vector<16x8xf32> to vector<16x8xbf16>
    %818 = vector.extract_strided_slice %761 {offsets = [0, 16], sizes = [16, 8], strides = [1, 1]} : vector<16x32xf32> to vector<16x8xf32>
    %819 = arith.truncf %818 : vector<16x8xf32> to vector<16x8xbf16>
    %cst_395 = arith.constant dense<0.000000e+00> : vector<16x16xf32>
    %820 = tpu.matmul %817, %819, %cst_395 {dimension_numbers = #tpu.dot_dimension_numbers<[1], [1], [0], [0], [0, 0, 1, 0], [], []>} : vector<16x8xbf16>, vector<16x8xbf16>, vector<16x16xf32> -> vector<16x16xf32>
    %c0_396 = arith.constant 0 : index
    %c10_397 = arith.constant 10 : index
    %c0_398 = arith.constant 0 : index
    %c0_399 = arith.constant 0 : index
    %821 = vector.load %arg3[%c0_396, %c10_397, %c0_398, %c0_399] : memref<1x12x16x16xf32, #tpu.memory_space<vmem>>, vector<1x1x16x16xf32>
    %822 = vector.shape_cast %821 : vector<1x1x16x16xf32> to vector<16x16xf32>
    %823 = arith.addf %820, %822 : vector<16x16xf32>
    %cst_400 = arith.constant dense<0xFF800000> : vector<16xf32>
    %824 = vector.multi_reduction <maximumf>, %823, %cst_400 [1] : vector<16x16xf32> to vector<16xf32>
    %825 = vector.shape_cast %824 : vector<16xf32> to vector<16x1xf32>
    %826 = vector.broadcast %825 : vector<16x1xf32> to vector<16x16xf32>
    %827 = arith.subf %823, %826 : vector<16x16xf32>
    %828 = math.exp %827 : vector<16x16xf32>
    %cst_401 = arith.constant dense<0.000000e+00> : vector<16xf32>
    %829 = vector.multi_reduction <add>, %828, %cst_401 [1] : vector<16x16xf32> to vector<16xf32>
    %830 = vector.shape_cast %829 : vector<16xf32> to vector<16x1xf32>
    %831 = tpu.reciprocal %830 {approx = true} : vector<16x1xf32> -> vector<16x1xf32>
    %832 = vector.broadcast %831 : vector<16x1xf32> to vector<16x16xf32>
    %833 = arith.mulf %828, %832 : vector<16x16xf32>
    %834 = arith.truncf %833 : vector<16x16xf32> to vector<16x16xbf16>
    %835 = vector.extract_strided_slice %762 {offsets = [0, 16], sizes = [16, 8], strides = [1, 1]} : vector<16x32xf32> to vector<16x8xf32>
    %836 = arith.truncf %835 : vector<16x8xf32> to vector<16x8xbf16>
    %cst_402 = arith.constant dense<0.000000e+00> : vector<16x8xf32>
    %837 = tpu.matmul %834, %836, %cst_402 {dimension_numbers = #tpu.dot_dimension_numbers<[1], [0], [0], [1], [0, 0, 1, 1], [], []>} : vector<16x16xbf16>, vector<16x8xbf16>, vector<16x8xf32> -> vector<16x8xf32>
    %838 = arith.truncf %837 : vector<16x8xf32> to vector<16x8xbf16>
    %c5_403 = arith.constant 5 : index
    %c2_404 = arith.constant 2 : index
    %c0_405 = arith.constant 0 : index
    %c0_406 = arith.constant 0 : index
    %839 = vector.load %arg6[%c5_403, %c2_404, %c0_405, %c0_406] : memref<6x4x8x32xbf16, #tpu.memory_space<vmem>>, vector<1x1x8x32xbf16>
    %840 = vector.shape_cast %839 : vector<1x1x8x32xbf16> to vector<8x32xbf16>
    %cst_407 = arith.constant dense<0.000000e+00> : vector<16x32xf32>
    %841 = tpu.matmul %838, %840, %cst_407 {dimension_numbers = #tpu.dot_dimension_numbers<[1], [0], [0], [1], [0, 0, 1, 1], [], []>} : vector<16x8xbf16>, vector<8x32xbf16>, vector<16x32xf32> -> vector<16x32xf32>
    %842 = arith.addf %815, %841 : vector<16x32xf32>
    %843 = vector.extract_strided_slice %756 {offsets = [0, 24], sizes = [16, 8], strides = [1, 1]} : vector<16x32xf32> to vector<16x8xf32>
    %844 = arith.truncf %843 : vector<16x8xf32> to vector<16x8xbf16>
    %845 = vector.extract_strided_slice %761 {offsets = [0, 24], sizes = [16, 8], strides = [1, 1]} : vector<16x32xf32> to vector<16x8xf32>
    %846 = arith.truncf %845 : vector<16x8xf32> to vector<16x8xbf16>
    %cst_408 = arith.constant dense<0.000000e+00> : vector<16x16xf32>
    %847 = tpu.matmul %844, %846, %cst_408 {dimension_numbers = #tpu.dot_dimension_numbers<[1], [1], [0], [0], [0, 0, 1, 0], [], []>} : vector<16x8xbf16>, vector<16x8xbf16>, vector<16x16xf32> -> vector<16x16xf32>
    %c0_409 = arith.constant 0 : index
    %c11_410 = arith.constant 11 : index
    %c0_411 = arith.constant 0 : index
    %c0_412 = arith.constant 0 : index
    %848 = vector.load %arg3[%c0_409, %c11_410, %c0_411, %c0_412] : memref<1x12x16x16xf32, #tpu.memory_space<vmem>>, vector<1x1x16x16xf32>
    %849 = vector.shape_cast %848 : vector<1x1x16x16xf32> to vector<16x16xf32>
    %850 = arith.addf %847, %849 : vector<16x16xf32>
    %cst_413 = arith.constant dense<0xFF800000> : vector<16xf32>
    %851 = vector.multi_reduction <maximumf>, %850, %cst_413 [1] : vector<16x16xf32> to vector<16xf32>
    %852 = vector.shape_cast %851 : vector<16xf32> to vector<16x1xf32>
    %853 = vector.broadcast %852 : vector<16x1xf32> to vector<16x16xf32>
    %854 = arith.subf %850, %853 : vector<16x16xf32>
    %855 = math.exp %854 : vector<16x16xf32>
    %cst_414 = arith.constant dense<0.000000e+00> : vector<16xf32>
    %856 = vector.multi_reduction <add>, %855, %cst_414 [1] : vector<16x16xf32> to vector<16xf32>
    %857 = vector.shape_cast %856 : vector<16xf32> to vector<16x1xf32>
    %858 = tpu.reciprocal %857 {approx = true} : vector<16x1xf32> -> vector<16x1xf32>
    %859 = vector.broadcast %858 : vector<16x1xf32> to vector<16x16xf32>
    %860 = arith.mulf %855, %859 : vector<16x16xf32>
    %861 = arith.truncf %860 : vector<16x16xf32> to vector<16x16xbf16>
    %862 = vector.extract_strided_slice %762 {offsets = [0, 24], sizes = [16, 8], strides = [1, 1]} : vector<16x32xf32> to vector<16x8xf32>
    %863 = arith.truncf %862 : vector<16x8xf32> to vector<16x8xbf16>
    %cst_415 = arith.constant dense<0.000000e+00> : vector<16x8xf32>
    %864 = tpu.matmul %861, %863, %cst_415 {dimension_numbers = #tpu.dot_dimension_numbers<[1], [0], [0], [1], [0, 0, 1, 1], [], []>} : vector<16x16xbf16>, vector<16x8xbf16>, vector<16x8xf32> -> vector<16x8xf32>
    %865 = arith.truncf %864 : vector<16x8xf32> to vector<16x8xbf16>
    %c5_416 = arith.constant 5 : index
    %c3_417 = arith.constant 3 : index
    %c0_418 = arith.constant 0 : index
    %c0_419 = arith.constant 0 : index
    %866 = vector.load %arg6[%c5_416, %c3_417, %c0_418, %c0_419] : memref<6x4x8x32xbf16, #tpu.memory_space<vmem>>, vector<1x1x8x32xbf16>
    %867 = vector.shape_cast %866 : vector<1x1x8x32xbf16> to vector<8x32xbf16>
    %cst_420 = arith.constant dense<0.000000e+00> : vector<16x32xf32>
    %868 = tpu.matmul %865, %867, %cst_420 {dimension_numbers = #tpu.dot_dimension_numbers<[1], [0], [0], [1], [0, 0, 1, 1], [], []>} : vector<16x8xbf16>, vector<8x32xbf16>, vector<16x32xf32> -> vector<16x32xf32>
    %869 = arith.addf %842, %868 : vector<16x32xf32>
    %870 = arith.addf %738, %869 : vector<16x32xf32>
    %871 = arith.mulf %870, %870 : vector<16x32xf32>
    %cst_421 = arith.constant dense<0.000000e+00> : vector<16xf32>
    %872 = vector.multi_reduction <add>, %871, %cst_421 [1] : vector<16x32xf32> to vector<16xf32>
    %873 = vector.shape_cast %872 : vector<16xf32> to vector<16x1xf32>
    %cst_422 = arith.constant 3.200000e+01 : f32
    %874 = vector.broadcast %cst_422 : f32 to vector<16x1xf32>
    %875 = arith.divf %873, %874 : vector<16x1xf32>
    %cst_423 = arith.constant 9.99999997E-7 : f32
    %876 = vector.broadcast %cst_423 : f32 to vector<16x1xf32>
    %877 = arith.addf %875, %876 : vector<16x1xf32>
    %878 = math.rsqrt %877 : vector<16x1xf32>
    %879 = vector.broadcast %878 : vector<16x1xf32> to vector<16x32xf32>
    %880 = arith.mulf %870, %879 : vector<16x32xf32>
    %c9_424 = arith.constant 9 : index
    %c0_425 = arith.constant 0 : index
    %c0_426 = arith.constant 0 : index
    %881 = vector.load %arg4[%c9_424, %c0_425, %c0_426] : memref<12x1x32xf32, #tpu.memory_space<vmem>>, vector<1x1x32xf32>
    %882 = vector.shape_cast %881 : vector<1x1x32xf32> to vector<1x32xf32>
    %883 = vector.broadcast %882 : vector<1x32xf32> to vector<16x32xf32>
    %884 = arith.mulf %880, %883 : vector<16x32xf32>
    %c3_427 = arith.constant 3 : index
    %c0_428 = arith.constant 0 : index
    %c0_429 = arith.constant 0 : index
    %885 = vector.load %arg7[%c3_427, %c0_428, %c0_429] : memref<4x32x64xbf16, #tpu.memory_space<vmem>>, vector<1x32x64xbf16>
    %886 = vector.shape_cast %885 : vector<1x32x64xbf16> to vector<32x64xbf16>
    %887 = arith.truncf %884 : vector<16x32xf32> to vector<16x32xbf16>
    %cst_430 = arith.constant dense<0.000000e+00> : vector<16x64xf32>
    %888 = tpu.matmul %887, %886, %cst_430 {dimension_numbers = #tpu.dot_dimension_numbers<[1], [0], [0], [1], [0, 0, 1, 1], [], []>} : vector<16x32xbf16>, vector<32x64xbf16>, vector<16x64xf32> -> vector<16x64xf32>
    %cst_431 = arith.constant 0.000000e+00 : f32
    %889 = vector.broadcast %cst_431 : f32 to vector<16x64xf32>
    %890 = arith.maximumf %888, %889 : vector<16x64xf32>
    %c3_432 = arith.constant 3 : index
    %c0_433 = arith.constant 0 : index
    %c0_434 = arith.constant 0 : index
    %891 = vector.load %arg8[%c3_432, %c0_433, %c0_434] : memref<4x64x32xbf16, #tpu.memory_space<vmem>>, vector<1x64x32xbf16>
    %892 = vector.shape_cast %891 : vector<1x64x32xbf16> to vector<64x32xbf16>
    %893 = arith.truncf %890 : vector<16x64xf32> to vector<16x64xbf16>
    %cst_435 = arith.constant dense<0.000000e+00> : vector<16x32xf32>
    %894 = tpu.matmul %893, %892, %cst_435 {dimension_numbers = #tpu.dot_dimension_numbers<[1], [0], [0], [1], [0, 0, 1, 1], [], []>} : vector<16x64xbf16>, vector<64x32xbf16>, vector<16x32xf32> -> vector<16x32xf32>
    %895 = arith.addf %870, %894 : vector<16x32xf32>
    %896 = arith.mulf %895, %895 : vector<16x32xf32>
    %cst_436 = arith.constant dense<0.000000e+00> : vector<16xf32>
    %897 = vector.multi_reduction <add>, %896, %cst_436 [1] : vector<16x32xf32> to vector<16xf32>
    %898 = vector.shape_cast %897 : vector<16xf32> to vector<16x1xf32>
    %cst_437 = arith.constant 3.200000e+01 : f32
    %899 = vector.broadcast %cst_437 : f32 to vector<16x1xf32>
    %900 = arith.divf %898, %899 : vector<16x1xf32>
    %cst_438 = arith.constant 9.99999997E-7 : f32
    %901 = vector.broadcast %cst_438 : f32 to vector<16x1xf32>
    %902 = arith.addf %900, %901 : vector<16x1xf32>
    %903 = math.rsqrt %902 : vector<16x1xf32>
    %904 = vector.broadcast %903 : vector<16x1xf32> to vector<16x32xf32>
    %905 = arith.mulf %895, %904 : vector<16x32xf32>
    %c11_439 = arith.constant 11 : index
    %c0_440 = arith.constant 0 : index
    %c0_441 = arith.constant 0 : index
    %906 = vector.load %arg4[%c11_439, %c0_440, %c0_441] : memref<12x1x32xf32, #tpu.memory_space<vmem>>, vector<1x1x32xf32>
    %907 = vector.shape_cast %906 : vector<1x1x32xf32> to vector<1x32xf32>
    %908 = vector.broadcast %907 : vector<1x32xf32> to vector<16x32xf32>
    %909 = arith.mulf %905, %908 : vector<16x32xf32>
    %c0_442 = arith.constant 0 : index
    %c0_443 = arith.constant 0 : index
    %c0_444 = arith.constant 0 : index
    %910 = vector.load %arg13[%c0_442, %c0_443, %c0_444] : memref<1x16x32xf32, #tpu.memory_space<vmem>>, vector<1x16x32xf32>
    %911 = vector.shape_cast %910 : vector<1x16x32xf32> to vector<16x32xf32>
    %912 = vector.shape_cast %909 : vector<16x32xf32> to vector<1x16x32xf32>
    tpu.vector_store %arg13[%c0_442, %c0_443, %c0_444], %912 {strides = array<i32>} : memref<1x16x32xf32, #tpu.memory_space<vmem>>, vector<1x16x32xf32>,
    %c2_i32 = arith.constant 2 : i32
    %913 = arith.muli %arg0, %c2_i32 : i32
    %c0_i32 = arith.constant 0 : i32
    %914 = arith.addi %913, %c0_i32 : i32
    %915 = arith.index_cast %914 : i32 to index
    %916 = memref.load %arg1[%915] : memref<2xi32, #tpu.memory_space<smem>>
    %c0_445 = arith.constant 0 : index
    %917 = arith.index_cast %916 : i32 to index
    %c0_446 = arith.constant 0 : index
    %918 = vector.load %arg13[%c0_445, %917, %c0_446] : memref<1x16x32xf32, #tpu.memory_space<vmem>>, vector<1x1x32xf32>
    %919 = vector.shape_cast %918 : vector<1x1x32xf32> to vector<1x32xf32>
    %c2_i32_447 = arith.constant 2 : i32
    %920 = arith.muli %arg0, %c2_i32_447 : i32
    %c1_i32 = arith.constant 1 : i32
    %921 = arith.addi %920, %c1_i32 : i32
    %922 = arith.index_cast %921 : i32 to index
    %923 = memref.load %arg1[%922] : memref<2xi32, #tpu.memory_space<smem>>
    %c0_448 = arith.constant 0 : index
    %924 = arith.index_cast %923 : i32 to index
    %c0_449 = arith.constant 0 : index
    %925 = vector.load %arg13[%c0_448, %924, %c0_449] : memref<1x16x32xf32, #tpu.memory_space<vmem>>, vector<1x1x32xf32>
    %926 = vector.shape_cast %925 : vector<1x1x32xf32> to vector<1x32xf32>
    %927 = tpu.concatenate %919, %926 in 0 : vector<1x32xf32>, vector<1x32xf32> -> vector<2x32xf32>
    %928 = arith.truncf %927 : vector<2x32xf32> to vector<2x32xbf16>
    %c0_450 = arith.constant 0 : index
    %c0_451 = arith.constant 0 : index
    %929 = vector.load %arg11[%c0_450, %c0_451] : memref<32x128xbf16, #tpu.memory_space<vmem>>, vector<32x128xbf16>
    %cst_452 = arith.constant dense<0.000000e+00> : vector<2x128xf32>
    %930 = tpu.matmul %928, %929, %cst_452 {dimension_numbers = #tpu.dot_dimension_numbers<[1], [0], [0], [1], [0, 0, 1, 1], [], []>} : vector<2x32xbf16>, vector<32x128xbf16>, vector<2x128xf32> -> vector<2x128xf32>
    %c0_453 = arith.constant 0 : index
    %c0_454 = arith.constant 0 : index
    %c0_455 = arith.constant 0 : index
    %931 = vector.load %arg12[%c0_453, %c0_454, %c0_455] : memref<1x2x128xf32, #tpu.memory_space<vmem>>, vector<1x2x128xf32>
    %932 = vector.shape_cast %931 : vector<1x2x128xf32> to vector<2x128xf32>
    %933 = vector.shape_cast %930 : vector<2x128xf32> to vector<1x2x128xf32>
    tpu.vector_store %arg12[%c0_453, %c0_454, %c0_455], %933 {strides = array<i32>} : memref<1x2x128xf32, #tpu.memory_space<vmem>>, vector<1x2x128xf32>,
    return
  }
  func.func @transform_0(%arg0: i32, %arg1: memref<2xi32, #tpu.memory_space<smem>>) -> (i32, i32, i32) {
    %c0_i32 = arith.constant 0 : i32
    %c0_i32_0 = arith.constant 0 : i32
    %c0_i32_1 = arith.constant 0 : i32
    return %arg0, %c0_i32, %c0_i32_0 : i32, i32, i32
  }
  func.func @transform_1(%arg0: i32, %arg1: memref<2xi32, #tpu.memory_space<smem>>) -> (i32, i32, i32, i32) {
    %c0_i32 = arith.constant 0 : i32
    %c0_i32_0 = arith.constant 0 : i32
    %c0_i32_1 = arith.constant 0 : i32
    %c0_i32_2 = arith.constant 0 : i32
    return %arg0, %c0_i32, %c0_i32_0, %c0_i32_1 : i32, i32, i32, i32
  }
  func.func @transform_2(%arg0: i32, %arg1: memref<2xi32, #tpu.memory_space<smem>>) -> (i32, i32, i32) {
    %c0_i32 = arith.constant 0 : i32
    %c0_i32_0 = arith.constant 0 : i32
    %c0_i32_1 = arith.constant 0 : i32
    %c0_i32_2 = arith.constant 0 : i32
    return %c0_i32, %c0_i32_0, %c0_i32_1 : i32, i32, i32
  }
  func.func @transform_3(%arg0: i32, %arg1: memref<2xi32, #tpu.memory_space<smem>>) -> (i32, i32, i32) {
    %c0_i32 = arith.constant 0 : i32
    %c0_i32_0 = arith.constant 0 : i32
    %c0_i32_1 = arith.constant 0 : i32
    %c0_i32_2 = arith.constant 0 : i32
    return %c0_i32, %c0_i32_0, %c0_i32_1 : i32, i32, i32
  }
  func.func @transform_4(%arg0: i32, %arg1: memref<2xi32, #tpu.memory_space<smem>>) -> (i32, i32, i32, i32) {
    %c0_i32 = arith.constant 0 : i32
    %c0_i32_0 = arith.constant 0 : i32
    %c0_i32_1 = arith.constant 0 : i32
    %c0_i32_2 = arith.constant 0 : i32
    %c0_i32_3 = arith.constant 0 : i32
    return %c0_i32, %c0_i32_0, %c0_i32_1, %c0_i32_2 : i32, i32, i32, i32
  }
  func.func @transform_5(%arg0: i32, %arg1: memref<2xi32, #tpu.memory_space<smem>>) -> (i32, i32, i32) {
    %c0_i32 = arith.constant 0 : i32
    %c0_i32_0 = arith.constant 0 : i32
    %c0_i32_1 = arith.constant 0 : i32
    %c0_i32_2 = arith.constant 0 : i32
    return %c0_i32, %c0_i32_0, %c0_i32_1 : i32, i32, i32
  }
  func.func @transform_6(%arg0: i32, %arg1: memref<2xi32, #tpu.memory_space<smem>>) -> (i32, i32, i32) {
    %c0_i32 = arith.constant 0 : i32
    %c0_i32_0 = arith.constant 0 : i32
    %c0_i32_1 = arith.constant 0 : i32
    %c0_i32_2 = arith.constant 0 : i32
    return %c0_i32, %c0_i32_0, %c0_i32_1 : i32, i32, i32
  }
  func.func @transform_7(%arg0: i32, %arg1: memref<2xi32, #tpu.memory_space<smem>>) -> (i32, i32, i32) {
    %c0_i32 = arith.constant 0 : i32
    %c0_i32_0 = arith.constant 0 : i32
    %c0_i32_1 = arith.constant 0 : i32
    %c0_i32_2 = arith.constant 0 : i32
    return %c0_i32, %c0_i32_0, %c0_i32_1 : i32, i32, i32
  }
  func.func @transform_8(%arg0: i32, %arg1: memref<2xi32, #tpu.memory_space<smem>>) -> (i32, i32, i32) {
    %c0_i32 = arith.constant 0 : i32
    %c0_i32_0 = arith.constant 0 : i32
    %c0_i32_1 = arith.constant 0 : i32
    %c0_i32_2 = arith.constant 0 : i32
    return %c0_i32, %c0_i32_0, %c0_i32_1 : i32, i32, i32
  }
  func.func @transform_9(%arg0: i32, %arg1: memref<2xi32, #tpu.memory_space<smem>>) -> (i32, i32) {
    %c0_i32 = arith.constant 0 : i32
    %c0_i32_0 = arith.constant 0 : i32
    %c0_i32_1 = arith.constant 0 : i32
    return %c0_i32, %c0_i32_0 : i32, i32
  }
  func.func @transform_10(%arg0: i32, %arg1: memref<2xi32, #tpu.memory_space<smem>>) -> (i32, i32, i32) {
    %c0_i32 = arith.constant 0 : i32
    %c0_i32_0 = arith.constant 0 : i32
    %c0_i32_1 = arith.constant 0 : i32
    return %arg0, %c0_i32, %c0_i32_0 : i32, i32, i32
  }
  func.func @transform_11(%arg0: i32, %arg1: memref<2xi32, #tpu.memory_space<smem>>) -> (i32, i32, i32) {
    %c0_i32 = arith.constant 0 : i32
    %c0_i32_0 = arith.constant 0 : i32
    %c0_i32_1 = arith.constant 0 : i32
    return %arg0, %c0_i32, %c0_i32_0 : i32, i32, i32
  }
}

</mosaic_0001>

<bundles_post_ra>
// kernel: _lambda_.1
= control target key start
LH: loop header
LB: loop body
LE: loop exit
PB: predicated region body
PF: predicated region fallthrough
CT: control target
= control target key end

     0   :  { %s8450_s0 = inlined_call_operand.vmem [shape: s32[2], index: 0, kind: input, shape index: {}]   ;;  %s8451_s1 = inlined_call_operand.vmem [shape: f32[1,16,32], index: 1, kind: input, shape index: {}]   ;;  %s8452_s2 = inlined_call_operand.vmem [shape: f32[1,12,16,16], index: 2, kind: input, shape index: {}]   ;;  %s8453_s3 = inlined_call_operand.vmem [shape: f32[12,1,32], index: 3, kind: input, shape index: {}]   ;;  %s8454_s4 = inlined_call_operand.vmem [shape: bf16[4,32,96], index: 4, kind: input, shape index: {}]   ;;  %s8455_s5 = inlined_call_operand.vmem [shape: bf16[6,4,8,32], index: 5, kind: input, shape index: {}]   ;;  %s8456_s6 = inlined_call_operand.vmem [shape: bf16[4,32,64], index: 6, kind: input, shape index: {}]   ;;  %s8457_s7 = inlined_call_operand.vmem [shape: bf16[4,64,32], index: 7, kind: input, shape index: {}]   ;;  %s8458_s8 = inlined_call_operand.vmem [shape: bf16[2,32,32], index: 8, kind: input, shape index: {}]   ;;  %s8459_s9 = inlined_call_operand.vmem [shape: bf16[2,32,64], index: 9, kind: input, shape index: {}]   ;;  %s8460_s10 = inlined_call_operand.vmem [shape: bf16[32,128], index: 10, kind: input, shape index: {}]   ;;  %s8461_s11 = inlined_call_operand.hbm [shape: f32[1,2,128], index: 11, kind: output, shape index: {0}]   ;;  %s8462_s12 = inlined_call_operand.hbm [shape: f32[1,16,32], index: 12, kind: output, shape index: {1}]  }
   0x1   :  { %s18_s23 = sshll.u32 %s8450_s0, 4  ;;  %s19_s23 = int_to_ptr.vmem [resolvable:$true] %s18_s23 }
   0x2   :  { %s7052_s24 = scalar_lea.vmem %s19_s23, 16  ;;  %p7057_p1 = scmp.lt.s32.totalorder %s19_s23, %s19_s23 }
   0x3   :  { %p7053_p0 = scmp.ne.s32.totalorder %s19_s23, %s7052_s24  ;;  %p7058_p2 = scmp.lt.s32.totalorder %s7052_s24, %s7052_s24 }
   0x5   :  { %p7059_p3 = por %p7058_p2, %p7057_p1 }
   0x7   :  { %p7060_p4 = pnand %p7059_p3, %p7053_p0 }
   0x9   :  { %7063 = shalt.err (!%p7060_p4)  }
   0xa   :  { %s7114_s25 = smov [#allocation3]  }
   0xb   :  { %21 = dma.vmem_to_smem %s19_s23, 16, %s7114_s25, [#allocation2] }
   0xc   :  { %7108 = dma.done.wait [#allocation2], 16 }
   0xd   :  { %7109 = vsyncadd [#allocation2], 4294967280 }
   0xe   :  { %23 = sfence }
   0xf   :  { %24 = vsyncpa [#allocation5], 0  ;;  %v7203_v0 = vld [vmem:[%s8451_s1] sm:$0xff]  ;;  %vm51_vm0 = vcmask 261120   ;;  %v7208_v1 = vld [vmem:[%s8451_s1 + $0x8] sm:$0xff]  ;;  %v7115_v8 = vmov 0.0  }
  0x10   :  { %v49_v2 = vmul.f32 %v7203_v0, %v7203_v0  ;;  %v50_v3 = vmul.f32 %v7208_v1, %v7208_v1  ;;  %v6756_v6 = vld [vmem:[%s8454_s4] sm:$0xff]   ;;  %v6757_v7 = vld [vmem:[%s8454_s4 + $0x8] sm:$0xff]   ;;  %6154 = vmatprep.subr.bf16.mxu0 %v7115_v8  ;;  %vm7116_vm1 = vmmov 0   ;;  %6162 = vmatprep.subr.bf16.mxu1 %v7115_v8 }
  0x11   :  { %6158 = vmatprep.mubr.msk.bf16.mxu0 %vm7116_vm1, %v7115_v8  ;;  %6155 = vmatpush3.bf16.msra.mxu0 %v6756_v6 }
  0x12   :  { %v52_v4 = vsel %vm51_vm0, %v49_v2, 0.0  ;;  %v55_v5 = vsel %vm51_vm0, %v50_v3, 0.0  ;;  %6156 = vmatprep.subr.bf16.mxu0 %v7115_v8  ;;  %6164 = vmatprep.mubr.msk.bf16.mxu1 %vm7116_vm1, %v7115_v8 }
  0x13   :  { %53 = vadd.xlane.f32.xlu0 %v52_v4 }
  0x17   :  { %56 = vadd.xlane.f32.xlu0 %v55_v5 }
  0x18   :  { %25 = vsyncpa [#allocation7], 0  ;;  %6157 = vmatpush3.bf16.msra.mxu0 %v6757_v7  ;;  %v5695_v18 = vld [vmem:[%s8453_s3] ss:$0 sm:$0xff]  ;;  %v5780_v19 = vld [vmem:[%s8453_s3 + $0x4] ss:$0 sm:$0xff] }
  0x19   :  { %6168 = vmatprep.subr.bf16.mxu0 %v7115_v8  ;;  %s7117_s19 = smov 120   ;;  %s7118_s20 = smov 96   ;;  %vm143_vm2 = vcmask 64512   ;;  %v7269_v37 = vld [vmem:[%s8452_s2] sm:$0xff]  ;;  %v7274_v39 = vld [vmem:[%s8452_s2 + $0x8] sm:$0xff]  ;;  %vm191_vm3 = vcmask 130048  }
  0x1a   :  { %s7119_s21 = smov 88   ;;  %v7283_v47 = vld [vmem:[%s8452_s2 + $0x10] sm:$0xff]  ;;  %v7288_v49 = vld [vmem:[%s8452_s2 + $0x18] sm:$0xff]  ;;  %s7120_s29 = smov 64   ;;  %vm394_vm4 = vcmask 1043456   ;;  %vm962_vm5 = vcmask 523264  }
  0x1b   :  { %s7121_s30 = smov 80   ;;  %s7122_s13 = smov 112   ;;  %vm5600_vm6 = vcmask 1040384  }
  0x1c   :  { %s7123_s14 = smov 56   ;;  %s7124_s26 = smov 48  }
  0x1d   :  { %s7125_s27 = smov 104   ;;  %s7126_s0 = smov 72  }
  0x1e   :  { %s7127_s23 = smov 40  }
  0xa0   :  { %v54_v9 = vpop.xlane.xlu0 %53 }
  0xa1   :  { %v59_v10 = vmul.f32 0.03125, %v54_v9 }
  0xa3   :  { %v61_v11 = vadd.f32 1e-06, %v59_v10 }
  0xa4   :  { %v57_v12 = vpop.xlane.xlu0 %56 }
  0xa5   :  { %6798 = vrsqrt.f32 %v61_v11  ;;  %v60_v13 = vmul.f32 0.03125, %v57_v12 }
  0xa7   :  { %v62_v14 = vadd.f32 1e-06, %v60_v13 }
  0xa9   :  { %6800 = vrsqrt.f32 %v62_v14 }
  0xaf   :  { %v6799_v15 = vpop.eup %6798 }
  0xb0   :  { %v65_v16 = vmul.f32 %v6799_v15, %v7203_v0 }
  0xb2   :  { %v74_v21 = vmul.f32 %v5695_v18, %v65_v16  ;;  %v7238_v23 = vmul.f32 %v5780_v19, %v65_v16 }
  0xb3   :  { %v6801_v17 = vpop.eup %6800 }
  0xb4   :  { %v66_v20 = vmul.f32 %v6801_v17, %v7208_v1 }
  0xb6   :  { %v75_v22 = vmul.f32 %v5695_v18, %v66_v20  ;;  %v7240_v24 = vmul.f32 %v5780_v19, %v66_v20 }
  0xb8   :  { %v80_v25 = vpack.c.bf16 %v75_v22, %v74_v21  ;;  %v1998_v26 = vpack.c.bf16 %v7240_v24, %v7238_v23 }
  0xba   :  { %6159 = vmatmul.mubr.msk.bf16.vlgmr.msra.gmra.mrb[0].mxu0 %vm51_vm0, %v80_v25 }
  0xbb   :  { %6170 = vmatprep.mubr.msk.bf16.mxu0 %vm7116_vm1, %v7115_v8 }
 0x18d   :  { %v130_v27 = vpop.f32.mrb[0].mxu0 }
 0x18e   :  { %v6160_v28 = vpop.f32.mrb[1].mxu0 }
 0x18f   :  { %v133_v29 = vpop.f32.mrb[2].mxu0 }
 0x190   :  { %v7247_v30 = vpack.c.bf16 %v133_v29, %v130_v27  ;;  %v6161_v31 = vpop.f32.mrb[3].mxu0 }
 0x192   :  { %267 = vrot.lane.b32.xlu0 %v7247_v30, %s7117_s19  ;;  %141 = vrot.lane.b32.xlu1 %v7247_v30, %s7118_s20 }
 0x196   :  { %269 = vrot.lane.b32.xlu1 %v7247_v30, %s7119_s21 }
 0x204   :  { %v142_v32 = vpop.permute.xlu1 %141  ;;  %v268_v36 = vpop.permute.xlu0 %267 }
 0x205   :  { %v148_v33 = vsel %vm143_vm2, %v142_v32, 0 }
 0x206   :  { %6163 = vmatpush3.bf16.xpose.msra.mxu1 %v148_v33 }
 0x207   :  { %6174 = vmatprep.subr.bf16.mxu1 %v7115_v8 }
 0x208   :  { %v270_v34 = vpop.permute.xlu1 %269 }
 0x209   :  { %v275_v35 = vsel %vm143_vm2, %v270_v34, 0 }
 0x20d   :  { %6165 = vmatmul.mubr.msk.bf16.vlgmr.msra.gmra.mrb[0].mxu1 %vm143_vm2, %v7247_v30 }
 0x20e   :  { %6175 = vmatpush3.bf16.xpose.msra.mxu1 %v275_v35  ;;  %6176 = vmatprep.mubr.msk.bf16.mxu1 %vm7116_vm1, %v7115_v8 }
 0x20f   :  { %6186 = vmatprep.subr.bf16.mxu1 %v7115_v8 }
 0x215   :  { %6177 = vmatmul.mubr.msk.bf16.vlgmr.msra.gmra.mrb[4].mxu1 %vm143_vm2, %v268_v36  ;;  %v263_v36 = vld [vmem:[%s8455_s5] sm:$0xf] }
 0x216   :  { %6188 = vmatprep.mubr.msk.bf16.mxu1 %vm7116_vm1, %v7115_v8 }
 0x2e0   :  { %v184_v38 = vpop.f32.mrb[0].mxu1 }
 0x2e1   :  { %v185_v40 = vadd.f32 %v184_v38, %v7269_v37  ;;  %v6166_v41 = vpop.f32.mrb[1].mxu1  ;;  %v443_v38 = vsel %vm394_vm4, %v263_v36, 0 }
 0x2e2   :  { %v187_v42 = vpop.f32.mrb[2].mxu1 }
 0x2e3   :  { %v188_v43 = vadd.f32 %v187_v42, %v7274_v39  ;;  %v6167_v44 = vpop.f32.mrb[3].mxu1  ;;  %v192_v45 = vsel %vm191_vm3, %v185_v40, -inf }
 0x2e4   :  { %193 = vmax.xlane.f32.xlu1 %v192_v45 }
 0x2e5   :  { %v195_v46 = vsel %vm191_vm3, %v188_v43, -inf }
 0x2e6   :  { %196 = vmax.xlane.f32.xlu0 %v195_v46 }
 0x2e8   :  { %v311_v48 = vpop.f32.mrb[4].mxu1 }
 0x2e9   :  { %v312_v50 = vadd.f32 %v7283_v47, %v311_v48  ;;  %v6178_v51 = vpop.f32.mrb[5].mxu1 }
 0x2ea   :  { %v314_v52 = vpop.f32.mrb[6].mxu1 }
 0x2eb   :  { %v315_v53 = vadd.f32 %v7288_v49, %v314_v52  ;;  %v6179_v54 = vpop.f32.mrb[7].mxu1  ;;  %v318_v55 = vsel %vm191_vm3, %v312_v50, -inf }
 0x2ec   :  { %319 = vmax.xlane.f32.xlu1 %v318_v55 }
 0x2ed   :  { %v321_v56 = vsel %vm191_vm3, %v315_v53, -inf }
 0x2f0   :  { %322 = vmax.xlane.f32.xlu1 %v321_v56 }
 0x371   :  { %v194_v57 = vpop.xlane.xlu1 %193 }
 0x372   :  { %v198_v58 = vsub.f32 %v185_v40, %v194_v57  ;;  %v5705_v40 = vld [vmem:[%s8455_s5 + $0x4] sm:$0xf] }
 0x373   :  { %v197_v59 = vpop.xlane.xlu0 %196  ;;  %v396_v41 = vsel %vm394_vm4, %v5705_v40, 0 }
 0x374   :  { %v200_v60 = vmul.f32 1.442695, %v198_v58  ;;  %v199_v61 = vsub.f32 %v188_v43, %v197_v59  ;;  %6187 = vmatpush3.bf16.msra.mxu1 %v396_v41 }
 0x375   :  { %6198 = vmatprep.subr.bf16.mxu1 %v7115_v8 }
 0x376   :  { %6802 = vpow2.f32 %v200_v60  ;;  %v202_v62 = vmul.f32 1.442695, %v199_v61 }
 0x378   :  { %6804 = vpow2.f32 %v202_v62 }
 0x379   :  { %v320_v63 = vpop.xlane.xlu1 %319 }
 0x37a   :  { %v324_v2 = vsub.f32 %v312_v50, %v320_v63 }
 0x37c   :  { %v326_v3 = vmul.f32 1.442695, %v324_v2 }
 0x37d   :  { %v323_v4 = vpop.xlane.xlu1 %322 }
 0x37e   :  { %6806 = vpow2.f32 %v326_v3  ;;  %v325_v5 = vsub.f32 %v315_v53, %v323_v4 }
 0x380   :  { %v6803_v6 = vpop.eup %6802  ;;  %v328_v7 = vmul.f32 1.442695, %v325_v5  ;;  %v7342_v5 = vld [vmem:[%s8452_s2 + $0x20] sm:$0xff] }
 0x381   :  { %v204_v9 = vsel %vm191_vm3, %v6803_v6, 0.0 }
 0x382   :  { %v6805_v10 = vpop.eup %6804  ;;  %6808 = vpow2.f32 %v328_v7  ;;  %205 = vadd.xlane.f32.xlu1 %v204_v9  ;;  %v7347_v7 = vld [vmem:[%s8452_s2 + $0x28] sm:$0xff] }
 0x383   :  { %v207_v11 = vsel %vm191_vm3, %v6805_v10, 0.0 }
 0x386   :  { %208 = vadd.xlane.f32.xlu1 %v207_v11 }
 0x388   :  { %v6807_v12 = vpop.eup %6806 }
 0x389   :  { %v330_v13 = vsel %vm191_vm3, %v6807_v12, 0.0 }
 0x38a   :  { %331 = vadd.xlane.f32.xlu1 %v330_v13 }
 0x38c   :  { %v6809_v14 = vpop.eup %6808 }
 0x38d   :  { %v333_v15 = vsel %vm191_vm3, %v6809_v14, 0.0 }
 0x38e   :  { %334 = vadd.xlane.f32.xlu0 %v333_v15 }
 0x39b   :  { %215 = vrot.lane.b32.xlu1 %v7247_v30, %s7120_s29 }
 0x39f   :  { %491 = vrot.lane.b32.xlu1 %v7247_v30, %s7121_s30 }
 0x3a3   :  { %489 = vrot.lane.b32.xlu1 %v7247_v30, %s7122_s13 }
 0x3a4   :  { %341 = vrot.lane.b32.xlu0 %v7247_v30, %s7123_s14 }
 0x40f   :  { %v206_v16 = vpop.xlane.xlu1 %205 }
 0x410   :  { %6810 = vrcp.f32 %v206_v16 }
 0x413   :  { %v209_v17 = vpop.xlane.xlu1 %208 }
 0x414   :  { %6812 = vrcp.f32 %v209_v17 }
 0x417   :  { %v332_v18 = vpop.xlane.xlu1 %331 }
 0x418   :  { %6814 = vrcp.f32 %v332_v18 }
 0x41a   :  { %v6811_v21 = vpop.eup %6810 }
 0x41b   :  { %v335_v19 = vpop.xlane.xlu0 %334  ;;  %v216_v20 = vpop.permute.xlu1 %215  ;;  %v212_v25 = vmul.f32 %v6811_v21, %v6803_v6 }
 0x41c   :  { %6816 = vrcp.f32 %v335_v19  ;;  %6169 = vmatpush3.bf16.msra.mxu0 %v216_v20 }
 0x41d   :  { %6180 = vmatprep.subr.bf16.mxu0 %v7115_v8 }
 0x41e   :  { %v6813_v22 = vpop.eup %6812 }
 0x41f   :  { %v213_v27 = vmul.f32 %v6813_v22, %v6805_v10  ;;  %v342_v29 = vpop.permute.xlu0 %341  ;;  %v492_v51 = vpop.permute.xlu1 %491 }
 0x420   :  { %v497_v55 = vsel %vm143_vm2, %v492_v51, 0 }
 0x421   :  { %v214_v28 = vpack.c.bf16 %v213_v27, %v212_v25 }
 0x422   :  { %v6815_v31 = vpop.eup %6814 }
 0x423   :  { %6171 = vmatmul.mubr.msk.bf16.vlgmr.msra.gmra.mrb[4].mxu0 %vm191_vm3, %v214_v28  ;;  %v338_v33 = vmul.f32 %v6815_v31, %v6807_v12  ;;  %v490_v56 = vpop.permute.xlu1 %489 }
 0x424   :  { %6181 = vmatpush3.bf16.msra.mxu0 %v342_v29  ;;  %6182 = vmatprep.mubr.msk.bf16.mxu0 %vm7116_vm1, %v7115_v8 }
 0x425   :  { %6192 = vmatprep.subr.bf16.mxu0 %v7115_v8 }
 0x426   :  { %v6817_v32 = vpop.eup %6816 }
 0x427   :  { %v339_v34 = vmul.f32 %v6817_v32, %v6809_v14 }
 0x429   :  { %v340_v35 = vpack.c.bf16 %v339_v34, %v338_v33 }
 0x42b   :  { %6183 = vmatmul.mubr.msk.bf16.vlgmr.msra.gmra.mrb[8].mxu0 %vm191_vm3, %v340_v35 }
 0x42c   :  { %6194 = vmatprep.mubr.msk.bf16.mxu0 %vm7116_vm1, %v7115_v8  ;;  %6193 = vmatpush3.bf16.msra.mxu0 %v443_v38 }
 0x42d   :  { %6204 = vmatprep.subr.bf16.mxu0 %v7115_v8 }
 0x4f6   :  { %v255_v42 = vpop.f32.mrb[4].mxu0 }
 0x4f7   :  { %v6172_v43 = vpop.f32.mrb[5].mxu0 }
 0x4f8   :  { %v258_v44 = vpop.f32.mrb[6].mxu0  ;;  %v5712_v43 = vld [vmem:[%s8455_s5 + $0x8] sm:$0xf] }
 0x4f9   :  { %v262_v45 = vpack.c.bf16 %v258_v44, %v255_v42  ;;  %v6173_v46 = vpop.f32.mrb[7].mxu0  ;;  %v617_v44 = vsel %vm394_vm4, %v5712_v43, 0 }
 0x4fb   :  { %6195 = vmatmul.mubr.msk.bf16.vlgmr.msra.gmra.mrb[12].mxu0 %vm143_vm2, %v262_v45 }
 0x4fc   :  { %6206 = vmatprep.mubr.msk.bf16.mxu0 %vm7116_vm1, %v7115_v8 }
 0x4fe   :  { %v381_v48 = vpop.f32.mrb[8].mxu0 }
 0x4ff   :  { %v6184_v50 = vpop.f32.mrb[9].mxu0 }
 0x500   :  { %v384_v52 = vpop.f32.mrb[10].mxu0 }
 0x501   :  { %v388_v53 = vpack.c.bf16 %v384_v52, %v381_v48  ;;  %v6185_v54 = vpop.f32.mrb[11].mxu0  ;;  %v7379_v52 = vld [vmem:[%s8452_s2 + $0x30] sm:$0xff] }
 0x502   :  { %v7386_v54 = vld [vmem:[%s8452_s2 + $0x38] sm:$0xff] }
 0x503   :  { %6189 = vmatmul.mubr.msk.bf16.vlgmr.msra.gmra.mrb[8].mxu1 %vm143_vm2, %v388_v53 }
 0x504   :  { %6199 = vmatpush3.bf16.xpose.msra.mxu1 %v497_v55  ;;  %6200 = vmatprep.mubr.msk.bf16.mxu1 %vm7116_vm1, %v7115_v8 }
 0x505   :  { %6210 = vmatprep.subr.bf16.mxu1 %v7115_v8 }
 0x50b   :  { %6201 = vmatmul.mubr.msk.bf16.vlgmr.msra.gmra.mrb[12].mxu1 %vm143_vm2, %v490_v56 }
 0x50c   :  { %6212 = vmatprep.mubr.msk.bf16.mxu1 %vm7116_vm1, %v7115_v8  ;;  %6211 = vmatpush3.bf16.msra.mxu1 %v617_v44 }
 0x50d   :  { %6222 = vmatprep.subr.bf16.mxu1 %v7115_v8 }
 0x5ce   :  { %v479_v57 = vpop.f32.mrb[12].mxu0 }
 0x5cf   :  { %v6196_v58 = vpop.f32.mrb[13].mxu0 }
 0x5d0   :  { %v482_v59 = vpop.f32.mrb[14].mxu0 }
 0x5d1   :  { %v6197_v60 = vpop.f32.mrb[15].mxu0 }
 0x5d6   :  { %v432_v61 = vpop.f32.mrb[8].mxu1 }
 0x5d7   :  { %v7335_v62 = vadd.f32 %v479_v57, %v432_v61  ;;  %v6190_v63 = vpop.f32.mrb[9].mxu1 }
 0x5d8   :  { %v435_v2 = vpop.f32.mrb[10].mxu1 }
 0x5d9   :  { %v7337_v3 = vadd.f32 %v482_v59, %v435_v2  ;;  %v6191_v4 = vpop.f32.mrb[11].mxu1 }
 0x5de   :  { %v533_v6 = vpop.f32.mrb[12].mxu1 }
 0x5df   :  { %v534_v9 = vadd.f32 %v7342_v5, %v533_v6  ;;  %v6202_v10 = vpop.f32.mrb[13].mxu1 }
 0x5e0   :  { %v536_v11 = vpop.f32.mrb[14].mxu1 }
 0x5e1   :  { %v537_v12 = vadd.f32 %v7347_v7, %v536_v11  ;;  %v6203_v13 = vpop.f32.mrb[15].mxu1  ;;  %v540_v14 = vsel %vm191_vm3, %v534_v9, -inf }
 0x5e2   :  { %541 = vmax.xlane.f32.xlu0 %v540_v14 }
 0x5e3   :  { %v543_v15 = vsel %vm191_vm3, %v537_v12, -inf }
 0x5e4   :  { %544 = vmax.xlane.f32.xlu1 %v543_v15 }
 0x5f5   :  { %563 = vrot.lane.b32.xlu1 %v7247_v30, %s7124_s26 }
 0x5f9   :  { %665 = vrot.lane.b32.xlu1 %v7247_v30, %s7125_s27 }
 0x66f   :  { %v542_v16 = vpop.xlane.xlu0 %541 }
 0x670   :  { %v546_v17 = vsub.f32 %v534_v9, %v542_v16 }
 0x671   :  { %v545_v18 = vpop.xlane.xlu1 %544 }
 0x672   :  { %v548_v19 = vmul.f32 1.442695, %v546_v17  ;;  %v547_v20 = vsub.f32 %v537_v12, %v545_v18 }
 0x674   :  { %6818 = vpow2.f32 %v548_v19  ;;  %v550_v21 = vmul.f32 1.442695, %v547_v20 }
 0x675   :  { %v564_v22 = vpop.permute.xlu1 %563 }
 0x676   :  { %6820 = vpow2.f32 %v550_v21  ;;  %6205 = vmatpush3.bf16.msra.mxu0 %v564_v22 }
 0x677   :  { %6216 = vmatprep.subr.bf16.mxu0 %v7115_v8 }
 0x679   :  { %v666_v42 = vpop.permute.xlu1 %665 }
 0x67e   :  { %v6819_v25 = vpop.eup %6818 }
 0x67f   :  { %v552_v27 = vsel %vm191_vm3, %v6819_v25, 0.0 }
 0x680   :  { %v6821_v28 = vpop.eup %6820  ;;  %553 = vadd.xlane.f32.xlu0 %v552_v27 }
 0x681   :  { %v555_v29 = vsel %vm191_vm3, %v6821_v28, 0.0 }
 0x684   :  { %556 = vadd.xlane.f32.xlu0 %v555_v29 }
 0x69a   :  { %667 = vrot.lane.b32.xlu0 %v7247_v30, %s7126_s0 }
 0x70d   :  { %v554_v31 = vpop.xlane.xlu0 %553 }
 0x70e   :  { %6822 = vrcp.f32 %v554_v31 }
 0x711   :  { %v557_v32 = vpop.xlane.xlu0 %556 }
 0x712   :  { %6824 = vrcp.f32 %v557_v32 }
 0x715   :  { %v668_v38 = vpop.permute.xlu0 %667 }
 0x716   :  { %v673_v41 = vsel %vm143_vm2, %v668_v38, 0 }
 0x718   :  { %v6823_v33 = vpop.eup %6822 }
 0x719   :  { %v560_v35 = vmul.f32 %v6823_v33, %v6819_v25 }
 0x71c   :  { %v6825_v34 = vpop.eup %6824 }
 0x71d   :  { %v561_v36 = vmul.f32 %v6825_v34, %v6821_v28 }
 0x71f   :  { %v562_v40 = vpack.c.bf16 %v561_v36, %v560_v35 }
 0x721   :  { %6207 = vmatmul.mubr.msk.bf16.vlgmr.msra.gmra.mrb[16].mxu0 %vm191_vm3, %v562_v40 }
 0x722   :  { %6217 = vmatpush3.bf16.xpose.msra.mxu0 %v673_v41  ;;  %6218 = vmatprep.mubr.msk.bf16.mxu0 %vm7116_vm1, %v7115_v8 }
 0x723   :  { %6228 = vmatprep.subr.bf16.mxu0 %v7115_v8 }
 0x729   :  { %6219 = vmatmul.mubr.msk.bf16.vlgmr.msra.gmra.mrb[20].mxu0 %vm143_vm2, %v666_v42 }
 0x72a   :  { %6230 = vmatprep.mubr.msk.bf16.mxu0 %vm7116_vm1, %v7115_v8 }
 0x7f4   :  { %v603_v45 = vpop.f32.mrb[16].mxu0 }
 0x7f5   :  { %v6208_v46 = vpop.f32.mrb[17].mxu0 }
 0x7f6   :  { %v606_v48 = vpop.f32.mrb[18].mxu0 }
 0x7f7   :  { %v610_v50 = vpack.c.bf16 %v606_v48, %v603_v45  ;;  %v6209_v51 = vpop.f32.mrb[19].mxu0 }
 0x7f9   :  { %6213 = vmatmul.mubr.msk.bf16.vlgmr.msra.gmra.mrb[16].mxu1 %vm143_vm2, %v610_v50 }
 0x7fa   :  { %6224 = vmatprep.mubr.msk.bf16.mxu1 %vm7116_vm1, %v7115_v8 }
 0x7fc   :  { %v709_v53 = vpop.f32.mrb[20].mxu0 }
 0x7fd   :  { %v710_v55 = vadd.f32 %v7379_v52, %v709_v53  ;;  %v6220_v56 = vpop.f32.mrb[21].mxu0 }
 0x7fe   :  { %v712_v57 = vpop.f32.mrb[22].mxu0  ;;  %v6761_v56 = vld [vmem:[%s8457_s7 + $0x8] sm:$0xff]  }
 0x7ff   :  { %v713_v58 = vadd.f32 %v7386_v54, %v712_v57  ;;  %v6221_v59 = vpop.f32.mrb[23].mxu0  ;;  %v716_v60 = vsel %vm191_vm3, %v710_v55, -inf }
 0x800   :  { %717 = vmax.xlane.f32.xlu1 %v716_v60 }
 0x801   :  { %v719_v61 = vsel %vm191_vm3, %v713_v58, -inf }
 0x802   :  { %720 = vmax.xlane.f32.xlu0 %v719_v61 }
 0x88d   :  { %v718_v63 = vpop.xlane.xlu1 %717 }
 0x88e   :  { %v722_v2 = vsub.f32 %v710_v55, %v718_v63  ;;  %v6758_v55 = vld [vmem:[%s8456_s6] sm:$0xff]  }
 0x88f   :  { %v721_v4 = vpop.xlane.xlu0 %720 }
 0x890   :  { %v724_v6 = vmul.f32 1.442695, %v722_v2  ;;  %v723_v9 = vsub.f32 %v713_v58, %v721_v4 }
 0x892   :  { %6826 = vpow2.f32 %v724_v6  ;;  %v726_v10 = vmul.f32 1.442695, %v723_v9  ;;  %v5721_v9 = vld [vmem:[%s8453_s3 + $0x1] ss:$0 sm:$0xff] }
 0x894   :  { %6828 = vpow2.f32 %v726_v10 }
 0x89c   :  { %v6827_v11 = vpop.eup %6826 }
 0x89d   :  { %v728_v12 = vsel %vm191_vm3, %v6827_v11, 0.0 }
 0x89e   :  { %v6829_v13 = vpop.eup %6828  ;;  %729 = vadd.xlane.f32.xlu0 %v728_v12 }
 0x89f   :  { %v731_v14 = vsel %vm191_vm3, %v6829_v13, 0.0 }
 0x8a0   :  { %732 = vadd.xlane.f32.xlu1 %v731_v14  ;;  %v6762_v14 = vld [vmem:[%s8457_s7 + $0x10] sm:$0xff]  }
 0x8b4   :  { %739 = vrot.lane.b32.xlu0 %v7247_v30, %s7127_s23 }
 0x8cc   :  { %v653_v15 = vpop.f32.mrb[16].mxu1 }
 0x8cd   :  { %v660_v16 = vadd.f32 %v653_v15, %v7335_v62  ;;  %v6214_v17 = vpop.f32.mrb[17].mxu1  ;;  %v5718_v62 = vld [vmem:[%s8455_s5 + $0xc] sm:$0xf]  ;;  %v6763_v15 = vld [vmem:[%s8457_s7 + $0x18] sm:$0xff]  }
 0x8ce   :  { %v656_v18 = vpop.f32.mrb[18].mxu1 }
 0x8cf   :  { %v661_v19 = vadd.f32 %v656_v18, %v7337_v3  ;;  %v6215_v20 = vpop.f32.mrb[19].mxu1  ;;  %v793_v3 = vsel %vm394_vm4, %v5718_v62, 0 }
 0x8d0   :  { %6229 = vmatpush3.bf16.msra.mxu0 %v793_v3 }
 0x8d1   :  { %6242 = vmatprep.subr.bf16.mxu0 %v7115_v8 }
 0x92b   :  { %v730_v21 = vpop.xlane.xlu0 %729 }
 0x92c   :  { %6830 = vrcp.f32 %v730_v21 }
 0x92d   :  { %v733_v22 = vpop.xlane.xlu1 %732 }
 0x92e   :  { %6832 = vrcp.f32 %v733_v22 }
 0x92f   :  { %v740_v25 = vpop.permute.xlu0 %739 }
 0x930   :  { %6223 = vmatpush3.bf16.msra.mxu1 %v740_v25 }
 0x931   :  { %6234 = vmatprep.subr.bf16.mxu1 %v7115_v8 }
 0x936   :  { %v6831_v27 = vpop.eup %6830 }
 0x937   :  { %v736_v29 = vmul.f32 %v6831_v27, %v6827_v11 }
 0x938   :  { %v6833_v28 = vpop.eup %6832 }
 0x939   :  { %v737_v30 = vmul.f32 %v6833_v28, %v6829_v13 }
 0x93b   :  { %v738_v31 = vpack.c.bf16 %v737_v30, %v736_v29 }
 0x93d   :  { %6225 = vmatmul.mubr.msk.bf16.vlgmr.msra.gmra.mrb[20].mxu1 %vm191_vm3, %v738_v31 }
 0x93e   :  { %6238 = vmatprep.mubr.msk.bf16.mxu1 %vm7116_vm1, %v7115_v8  ;;  %6235 = vmatpush3.bf16.msra.mxu1 %v6758_v55 }
 0x93f   :  { %6236 = vmatprep.subr.bf16.mxu1 %v7115_v8 }
 0xa10   :  { %v779_v32 = vpop.f32.mrb[20].mxu1 }
 0xa11   :  { %v6226_v33 = vpop.f32.mrb[21].mxu1 }
 0xa12   :  { %v782_v34 = vpop.f32.mrb[22].mxu1 }
 0xa13   :  { %v786_v35 = vpack.c.bf16 %v782_v34, %v779_v32  ;;  %v6227_v36 = vpop.f32.mrb[23].mxu1  ;;  %v6764_v34 = vld [vmem:[%s8454_s4 + $0x10] sm:$0xff]  }
 0xa15   :  { %6231 = vmatmul.mubr.msk.bf16.vlgmr.msra.gmra.mrb[24].mxu0 %vm143_vm2, %v786_v35  ;;  %v6765_v35 = vld [vmem:[%s8454_s4 + $0x18] sm:$0xff]  }
 0xa16   :  { %6250 = vmatprep.mubr.msk.bf16.mxu0 %vm7116_vm1, %v7115_v8 }
 0xae8   :  { %v829_v38 = vpop.f32.mrb[24].mxu0 }
 0xae9   :  { %v836_v40 = vadd.f32 %v829_v38, %v660_v16  ;;  %v6232_v41 = vpop.f32.mrb[25].mxu0 }
 0xaea   :  { %v832_v42 = vpop.f32.mrb[26].mxu0 }
 0xaeb   :  { %v838_v43 = vadd.f32 %v836_v40, %v7203_v0  ;;  %v837_v44 = vadd.f32 %v832_v42, %v661_v19  ;;  %v6233_v45 = vpop.f32.mrb[27].mxu0  ;;  %v6759_v0 = vld [vmem:[%s8456_s6 + $0x8] sm:$0xff]  }
 0xaec   :  { %6237 = vmatpush3.bf16.msra.mxu1 %v6759_v0 }
 0xaed   :  { %v839_v46 = vadd.f32 %v837_v44, %v7208_v1  ;;  %v840_v48 = vmul.f32 %v838_v43, %v838_v43  ;;  %6254 = vmatprep.subr.bf16.mxu1 %v7115_v8  ;;  %v6760_v1 = vld [vmem:[%s8457_s7] sm:$0xff]  }
 0xaee   :  { %6243 = vmatpush3.bf16.msra.mxu0 %v6760_v1 }
 0xaef   :  { %v842_v50 = vsel %vm51_vm0, %v840_v48, 0.0  ;;  %v841_v51 = vmul.f32 %v839_v46, %v839_v46  ;;  %6244 = vmatprep.subr.bf16.mxu0 %v7115_v8  ;;  %v5731_v48 = vld [vmem:[%s8453_s3 + $0x2] ss:$0 sm:$0xff] }
 0xaf0   :  { %843 = vadd.xlane.f32.xlu1 %v842_v50 }
 0xaf1   :  { %v845_v53 = vsel %vm51_vm0, %v841_v51, 0.0 }
 0xaf2   :  { %6245 = vmatpush3.bf16.msra.mxu0 %v6761_v56 }
 0xaf3   :  { %6246 = vmatprep.subr.bf16.mxu0 %v7115_v8 }
 0xaf4   :  { %846 = vadd.xlane.f32.xlu1 %v845_v53 }
 0xaf6   :  { %6247 = vmatpush3.bf16.msra.mxu0 %v6762_v14 }
 0xaf7   :  { %6248 = vmatprep.subr.bf16.mxu0 %v7115_v8 }
 0xafa   :  { %6249 = vmatpush3.bf16.msra.mxu0 %v6763_v15 }
 0xafb   :  { %6268 = vmatprep.subr.bf16.mxu0 %v7115_v8 }
 0xb7d   :  { %v844_v57 = vpop.xlane.xlu1 %843 }
 0xb7e   :  { %v848_v58 = vmul.f32 0.03125, %v844_v57 }
 0xb80   :  { %v850_v59 = vadd.f32 1e-06, %v848_v58 }
 0xb81   :  { %v847_v60 = vpop.xlane.xlu1 %846 }
 0xb82   :  { %6834 = vrsqrt.f32 %v850_v59  ;;  %v849_v61 = vmul.f32 0.03125, %v847_v60 }
 0xb84   :  { %v851_v63 = vadd.f32 1e-06, %v849_v61 }
 0xb86   :  { %6836 = vrsqrt.f32 %v851_v63 }
 0xb8c   :  { %v6835_v2 = vpop.eup %6834 }
 0xb8d   :  { %v854_v4 = vmul.f32 %v6835_v2, %v838_v43 }
 0xb8f   :  { %v864_v11 = vmul.f32 %v5721_v9, %v854_v4 }
 0xb90   :  { %v6837_v6 = vpop.eup %6836 }
 0xb91   :  { %v855_v10 = vmul.f32 %v6837_v6, %v839_v46 }
 0xb93   :  { %v865_v12 = vmul.f32 %v5721_v9, %v855_v10 }
 0xb95   :  { %v870_v13 = vpack.c.bf16 %v865_v12, %v864_v11 }
 0xb97   :  { %6239 = vmatmul.mubr.msk.bf16.vlgmr.msra.gmra.mrb[24].mxu1 %vm51_vm0, %v870_v13 }
 0xb98   :  { %6258 = vmatprep.mubr.msk.bf16.mxu1 %vm7116_vm1, %v7115_v8  ;;  %6255 = vmatpush3.bf16.msra.mxu1 %v6764_v34 }
 0xb99   :  { %6256 = vmatprep.subr.bf16.mxu1 %v7115_v8 }
 0xb9c   :  { %6257 = vmatpush3.bf16.msra.mxu1 %v6765_v35 }
 0xb9d   :  { %6262 = vmatprep.subr.bf16.mxu1 %v7115_v8 }
 0xc6a   :  { %v920_v16 = vpop.f32.mrb[24].mxu1 }
 0xc6b   :  { %v6240_v17 = vpop.f32.mrb[25].mxu1  ;;  %v927_v19 = vmax.f32 %v920_v16, 0.0 }
 0xc6c   :  { %v923_v18 = vpop.f32.mrb[26].mxu1 }
 0xc6d   :  { %v928_v20 = vmax.f32 %v923_v18, 0.0  ;;  %v6241_v21 = vpop.f32.mrb[27].mxu1 }
 0xc6f   :  { %v937_v22 = vpack.c.bf16 %v928_v20, %v927_v19 }
 0xc71   :  { %6251 = vmatmul.mubr.msk.bf16.vlgmr.msra.gmra.mrb[28].mxu0 %vm962_vm5, %v937_v22 }
 0xc72   :  { %6270 = vmatprep.mubr.msk.bf16.mxu0 %vm7116_vm1, %v7115_v8 }
 0xd44   :  { %v1000_v25 = vpop.f32.mrb[28].mxu0 }
 0xd45   :  { %v7447_v27 = vadd.f32 %v1000_v25, %v838_v43  ;;  %v6252_v28 = vpop.f32.mrb[29].mxu0 }
 0xd46   :  { %v1003_v29 = vpop.f32.mrb[30].mxu0 }
 0xd47   :  { %v7449_v30 = vadd.f32 %v1003_v29, %v839_v46  ;;  %v6253_v31 = vpop.f32.mrb[31].mxu0  ;;  %v1009_v62 = vmul.f32 %v7447_v27, %v7447_v27 }
 0xd49   :  { %v1011_v3 = vsel %vm51_vm0, %v1009_v62, 0.0  ;;  %v1010_v32 = vmul.f32 %v7449_v30, %v7449_v30 }
 0xd4a   :  { %1012 = vadd.xlane.f32.xlu1 %v1011_v3 }
 0xd4b   :  { %v1014_v33 = vsel %vm51_vm0, %v1010_v32, 0.0 }
 0xd4e   :  { %1015 = vadd.xlane.f32.xlu1 %v1014_v33 }
 0xdd7   :  { %v1013_v36 = vpop.xlane.xlu1 %1012 }
 0xdd8   :  { %v1017_v38 = vmul.f32 0.03125, %v1013_v36 }
 0xdda   :  { %v1019_v40 = vadd.f32 1e-06, %v1017_v38 }
 0xddb   :  { %v1016_v41 = vpop.xlane.xlu1 %1015 }
 0xddc   :  { %6838 = vrsqrt.f32 %v1019_v40  ;;  %v1018_v42 = vmul.f32 0.03125, %v1016_v41 }
 0xdde   :  { %v1020_v43 = vadd.f32 1e-06, %v1018_v42 }
 0xde0   :  { %6840 = vrsqrt.f32 %v1020_v43 }
 0xde6   :  { %v6839_v44 = vpop.eup %6838 }
 0xde7   :  { %v1023_v45 = vmul.f32 %v6839_v44, %v7447_v27 }
 0xde9   :  { %v1033_v51 = vmul.f32 %v5731_v48, %v1023_v45 }
 0xdea   :  { %v6841_v46 = vpop.eup %6840 }
 0xdeb   :  { %v1024_v50 = vmul.f32 %v6841_v46, %v7449_v30 }
 0xded   :  { %v1034_v53 = vmul.f32 %v5731_v48, %v1024_v50 }
 0xdef   :  { %v1040_v55 = vpack.c.bf16 %v1034_v53, %v1033_v51 }
 0xdf1   :  { %6259 = vmatmul.mubr.msk.bf16.vlgmr.msra.gmra.mrb[28].mxu1 %vm51_vm0, %v1040_v55 }
 0xdf2   :  { %6264 = vmatprep.mubr.msk.bf16.mxu1 %vm7116_vm1, %v7115_v8 }
 0xec4   :  { %v1090_v0 = vpop.f32.mrb[28].mxu1 }
 0xec5   :  { %v6260_v1 = vpop.f32.mrb[29].mxu1 }
 0xec6   :  { %v1093_v56 = vpop.f32.mrb[30].mxu1 }
 0xec7   :  { %v7473_v57 = vpack.c.bf16 %v1093_v56, %v1090_v0  ;;  %v6261_v58 = vpop.f32.mrb[31].mxu1 }
 0xec9   :  { %1223 = vrot.lane.b32.xlu0 %v7473_v57, %s7119_s21  ;;  %1099 = vrot.lane.b32.xlu1 %v7473_v57, %s7118_s20 }
 0xecd   :  { %1221 = vrot.lane.b32.xlu0 %v7473_v57, %s7117_s19 }
 0xf3b   :  { %v1100_v59 = vpop.permute.xlu1 %1099  ;;  %v1224_v61 = vpop.permute.xlu0 %1223 }
 0xf3c   :  { %v1105_v60 = vsel %vm143_vm2, %v1100_v59, 0  ;;  %v1229_v63 = vsel %vm143_vm2, %v1224_v61, 0 }
 0xf3d   :  { %6263 = vmatpush3.bf16.xpose.msra.mxu1 %v1105_v60 }
 0xf3e   :  { %6274 = vmatprep.subr.bf16.mxu1 %v7115_v8 }
 0xf3f   :  { %v1222_v2 = vpop.permute.xlu0 %1221 }
 0xf44   :  { %6265 = vmatmul.mubr.msk.bf16.vlgmr.msra.gmra.mrb[32].mxu1 %vm143_vm2, %v7473_v57 }
 0xf45   :  { %6275 = vmatpush3.bf16.xpose.msra.mxu1 %v1229_v63  ;;  %6276 = vmatprep.mubr.msk.bf16.mxu1 %vm7116_vm1, %v7115_v8 }
 0xf46   :  { %6286 = vmatprep.subr.bf16.mxu1 %v7115_v8 }
 0xf4c   :  { %6277 = vmatmul.mubr.msk.bf16.vlgmr.msra.gmra.mrb[36].mxu1 %vm143_vm2, %v1222_v2  ;;  %v5741_v2 = vld [vmem:[%s8455_s5 + $0x10] sm:$0xf] }
 0xf4d   :  { %6288 = vmatprep.mubr.msk.bf16.mxu1 %vm7116_vm1, %v7115_v8 }
0x1017   :  { %v1141_v4 = vpop.f32.mrb[32].mxu1 }
0x1018   :  { %v1142_v6 = vadd.f32 %v1141_v4, %v7269_v37  ;;  %v6266_v9 = vpop.f32.mrb[33].mxu1  ;;  %v1396_v4 = vsel %vm394_vm4, %v5741_v2, 0 }
0x1019   :  { %v1144_v10 = vpop.f32.mrb[34].mxu1 }
0x101a   :  { %v1145_v11 = vadd.f32 %v1144_v10, %v7274_v39  ;;  %v6267_v12 = vpop.f32.mrb[35].mxu1  ;;  %v1148_v13 = vsel %vm191_vm3, %v1142_v6, -inf }
0x101b   :  { %1149 = vmax.xlane.f32.xlu0 %v1148_v13 }
0x101c   :  { %v1151_v14 = vsel %vm191_vm3, %v1145_v11, -inf }
0x101d   :  { %1152 = vmax.xlane.f32.xlu1 %v1151_v14 }
0x101f   :  { %v1265_v15 = vpop.f32.mrb[36].mxu1 }
0x1020   :  { %v1266_v16 = vadd.f32 %v7283_v47, %v1265_v15  ;;  %v6278_v17 = vpop.f32.mrb[37].mxu1 }
0x1021   :  { %v1268_v18 = vpop.f32.mrb[38].mxu1 }
0x1022   :  { %v1269_v19 = vadd.f32 %v7288_v49, %v1268_v18  ;;  %v6279_v20 = vpop.f32.mrb[39].mxu1  ;;  %v1272_v37 = vsel %vm191_vm3, %v1266_v16, -inf }
0x1023   :  { %1273 = vmax.xlane.f32.xlu0 %v1272_v37 }
0x1024   :  { %v1275_v39 = vsel %vm191_vm3, %v1269_v19, -inf }
0x1027   :  { %1276 = vmax.xlane.f32.xlu0 %v1275_v39 }
0x10a8   :  { %v1150_v21 = vpop.xlane.xlu0 %1149 }
0x10a9   :  { %v1154_v22 = vsub.f32 %v1142_v6, %v1150_v21  ;;  %v5744_v6 = vld [vmem:[%s8455_s5 + $0x14] sm:$0xf] }
0x10aa   :  { %v1153_v25 = vpop.xlane.xlu1 %1152  ;;  %v1349_v9 = vsel %vm394_vm4, %v5744_v6, 0 }
0x10ab   :  { %v1156_v28 = vmul.f32 1.442695, %v1154_v22  ;;  %v1155_v29 = vsub.f32 %v1145_v11, %v1153_v25  ;;  %6287 = vmatpush3.bf16.msra.mxu1 %v1349_v9 }
0x10ac   :  { %6298 = vmatprep.subr.bf16.mxu1 %v7115_v8 }
0x10ad   :  { %6842 = vpow2.f32 %v1156_v28  ;;  %v1158_v31 = vmul.f32 1.442695, %v1155_v29 }
0x10af   :  { %6844 = vpow2.f32 %v1158_v31 }
0x10b0   :  { %v1274_v47 = vpop.xlane.xlu0 %1273 }
0x10b1   :  { %v1278_v62 = vsub.f32 %v1266_v16, %v1274_v47 }
0x10b3   :  { %v1280_v3 = vmul.f32 1.442695, %v1278_v62 }
0x10b4   :  { %v1277_v32 = vpop.xlane.xlu0 %1276 }
0x10b5   :  { %6846 = vpow2.f32 %v1280_v3  ;;  %v1279_v49 = vsub.f32 %v1269_v19, %v1277_v32 }
0x10b7   :  { %v6843_v33 = vpop.eup %6842  ;;  %v1282_v34 = vmul.f32 1.442695, %v1279_v49 }
0x10b8   :  { %v1160_v35 = vsel %vm191_vm3, %v6843_v33, 0.0 }
0x10b9   :  { %v6845_v36 = vpop.eup %6844  ;;  %6848 = vpow2.f32 %v1282_v34  ;;  %1161 = vadd.xlane.f32.xlu0 %v1160_v35 }
0x10ba   :  { %v1163_v38 = vsel %vm191_vm3, %v6845_v36, 0.0 }
0x10bb   :  { %1164 = vadd.xlane.f32.xlu1 %v1163_v38 }
0x10bf   :  { %v6847_v40 = vpop.eup %6846 }
0x10c0   :  { %v1284_v41 = vsel %vm191_vm3, %v6847_v40, 0.0 }
0x10c1   :  { %1285 = vadd.xlane.f32.xlu0 %v1284_v41 }
0x10c3   :  { %v6849_v42 = vpop.eup %6848 }
0x10c4   :  { %v1287_v43 = vsel %vm191_vm3, %v6849_v42, 0.0 }
0x10c5   :  { %1288 = vadd.xlane.f32.xlu1 %v1287_v43 }
0x10d6   :  { %1295 = vrot.lane.b32.xlu1 %v7473_v57, %s7123_s14 }
0x10d7   :  { %1171 = vrot.lane.b32.xlu0 %v7473_v57, %s7120_s29 }
0x10da   :  { %1441 = vrot.lane.b32.xlu1 %v7473_v57, %s7121_s30 }
0x10db   :  { %1439 = vrot.lane.b32.xlu0 %v7473_v57, %s7122_s13 }
0x1146   :  { %v1162_v44 = vpop.xlane.xlu0 %1161 }
0x1147   :  { %6850 = vrcp.f32 %v1162_v44 }
0x1148   :  { %v1165_v45 = vpop.xlane.xlu1 %1164 }
0x1149   :  { %6852 = vrcp.f32 %v1165_v45 }
0x114e   :  { %v1286_v46 = vpop.xlane.xlu0 %1285 }
0x114f   :  { %6854 = vrcp.f32 %v1286_v46 }
0x1151   :  { %v6851_v48 = vpop.eup %6850 }
0x1152   :  { %v1289_v50 = vpop.xlane.xlu1 %1288  ;;  %v1172_v51 = vpop.permute.xlu0 %1171  ;;  %v1168_v55 = vmul.f32 %v6851_v48, %v6843_v33 }
0x1153   :  { %v6853_v53 = vpop.eup %6852  ;;  %6856 = vrcp.f32 %v1289_v50  ;;  %6269 = vmatpush3.bf16.msra.mxu0 %v1172_v51 }
0x1154   :  { %v1169_v0 = vmul.f32 %v6853_v53, %v6845_v36  ;;  %6280 = vmatprep.subr.bf16.mxu0 %v7115_v8 }
0x1156   :  { %v1296_v1 = vpop.permute.xlu1 %1295  ;;  %v1170_v56 = vpack.c.bf16 %v1169_v0, %v1168_v55  ;;  %v1440_v39 = vpop.permute.xlu0 %1439 }
0x1158   :  { %6271 = vmatmul.mubr.msk.bf16.vlgmr.msra.gmra.mrb[32].mxu0 %vm191_vm3, %v1170_v56 }
0x1159   :  { %6281 = vmatpush3.bf16.msra.mxu0 %v1296_v1  ;;  %6282 = vmatprep.mubr.msk.bf16.mxu0 %vm7116_vm1, %v7115_v8  ;;  %v6855_v58 = vpop.eup %6854 }
0x115a   :  { %6292 = vmatprep.subr.bf16.mxu0 %v7115_v8  ;;  %v1292_v60 = vmul.f32 %v6855_v58, %v6847_v40  ;;  %v1442_v17 = vpop.permute.xlu1 %1441 }
0x115b   :  { %v1447_v37 = vsel %vm143_vm2, %v1442_v17, 0 }
0x115d   :  { %v6857_v59 = vpop.eup %6856 }
0x115e   :  { %v1293_v61 = vmul.f32 %v6857_v59, %v6849_v42 }
0x1160   :  { %v1294_v63 = vpack.c.bf16 %v1293_v61, %v1292_v60 }
0x1162   :  { %6283 = vmatmul.mubr.msk.bf16.vlgmr.msra.gmra.mrb[36].mxu0 %vm191_vm3, %v1294_v63 }
0x1163   :  { %6294 = vmatprep.mubr.msk.bf16.mxu0 %vm7116_vm1, %v7115_v8  ;;  %6293 = vmatpush3.bf16.msra.mxu0 %v1396_v4  ;;  %v5749_v4 = vld [vmem:[%s8455_s5 + $0x18] sm:$0xf] }
0x1164   :  { %6304 = vmatprep.subr.bf16.mxu0 %v7115_v8  ;;  %v1567_v6 = vsel %vm394_vm4, %v5749_v4, 0  ;;  %v6770_v4 = vld [vmem:[%s8457_s7 + $0x20] sm:$0xff]  }
0x122b   :  { %v1211_v10 = vpop.f32.mrb[32].mxu0 }
0x122c   :  { %v6272_v11 = vpop.f32.mrb[33].mxu0 }
0x122d   :  { %v1214_v12 = vpop.f32.mrb[34].mxu0 }
0x122e   :  { %v1218_v13 = vpack.c.bf16 %v1214_v12, %v1211_v10  ;;  %v6273_v14 = vpop.f32.mrb[35].mxu0 }
0x1230   :  { %6295 = vmatmul.mubr.msk.bf16.vlgmr.msra.gmra.mrb[40].mxu0 %vm143_vm2, %v1218_v13 }
0x1231   :  { %6306 = vmatprep.mubr.msk.bf16.mxu0 %vm7116_vm1, %v7115_v8 }
0x1235   :  { %v1335_v15 = vpop.f32.mrb[36].mxu0 }
0x1236   :  { %v6284_v16 = vpop.f32.mrb[37].mxu0 }
0x1237   :  { %v1338_v18 = vpop.f32.mrb[38].mxu0 }
0x1238   :  { %v1342_v19 = vpack.c.bf16 %v1338_v18, %v1335_v15  ;;  %v6285_v20 = vpop.f32.mrb[39].mxu0 }
0x123a   :  { %6289 = vmatmul.mubr.msk.bf16.vlgmr.msra.gmra.mrb[40].mxu1 %vm143_vm2, %v1342_v19 }
0x123b   :  { %6299 = vmatpush3.bf16.xpose.msra.mxu1 %v1447_v37  ;;  %6300 = vmatprep.mubr.msk.bf16.mxu1 %vm7116_vm1, %v7115_v8 }
0x123c   :  { %6310 = vmatprep.subr.bf16.mxu1 %v7115_v8 }
0x1242   :  { %6301 = vmatmul.mubr.msk.bf16.vlgmr.msra.gmra.mrb[44].mxu1 %vm143_vm2, %v1440_v39 }
0x1243   :  { %6312 = vmatprep.mubr.msk.bf16.mxu1 %vm7116_vm1, %v7115_v8  ;;  %6311 = vmatpush3.bf16.msra.mxu1 %v1567_v6  ;;  %v6771_v6 = vld [vmem:[%s8457_s7 + $0x28] sm:$0xff]  }
0x1244   :  { %6322 = vmatprep.subr.bf16.mxu1 %v7115_v8 }
0x1303   :  { %v1432_v21 = vpop.f32.mrb[40].mxu0 }
0x1304   :  { %v6296_v22 = vpop.f32.mrb[41].mxu0 }
0x1305   :  { %v1435_v25 = vpop.f32.mrb[42].mxu0 }
0x1306   :  { %v6297_v28 = vpop.f32.mrb[43].mxu0 }
0x130d   :  { %v1385_v29 = vpop.f32.mrb[40].mxu1 }
0x130e   :  { %v7541_v31 = vadd.f32 %v1432_v21, %v1385_v29  ;;  %v6290_v47 = vpop.f32.mrb[41].mxu1 }
0x130f   :  { %v1388_v62 = vpop.f32.mrb[42].mxu1 }
0x1310   :  { %v7543_v3 = vadd.f32 %v1435_v25, %v1388_v62  ;;  %v6291_v32 = vpop.f32.mrb[43].mxu1 }
0x1315   :  { %v1483_v49 = vpop.f32.mrb[44].mxu1 }
0x1316   :  { %v1484_v33 = vadd.f32 %v7342_v5, %v1483_v49  ;;  %v6302_v34 = vpop.f32.mrb[45].mxu1 }
0x1317   :  { %v1486_v35 = vpop.f32.mrb[46].mxu1 }
0x1318   :  { %v1487_v36 = vadd.f32 %v7347_v7, %v1486_v35  ;;  %v6303_v38 = vpop.f32.mrb[47].mxu1  ;;  %v1490_v40 = vsel %vm191_vm3, %v1484_v33, -inf }
0x1319   :  { %1491 = vmax.xlane.f32.xlu1 %v1490_v40 }
0x131a   :  { %v1493_v41 = vsel %vm191_vm3, %v1487_v36, -inf }
0x131b   :  { %1494 = vmax.xlane.f32.xlu0 %v1493_v41 }
0x13a6   :  { %v1492_v42 = vpop.xlane.xlu1 %1491 }
0x13a7   :  { %v1496_v43 = vsub.f32 %v1484_v33, %v1492_v42 }
0x13a8   :  { %v1495_v44 = vpop.xlane.xlu0 %1494 }
0x13a9   :  { %v1498_v45 = vmul.f32 1.442695, %v1496_v43  ;;  %v1497_v46 = vsub.f32 %v1487_v36, %v1495_v44 }
0x13ab   :  { %6858 = vpow2.f32 %v1498_v45  ;;  %v1500_v48 = vmul.f32 1.442695, %v1497_v46 }
0x13ad   :  { %6860 = vpow2.f32 %v1500_v48 }
0x13b5   :  { %v6859_v5 = vpop.eup %6858 }
0x13b6   :  { %v1502_v50 = vsel %vm191_vm3, %v6859_v5, 0.0 }
0x13b7   :  { %v6861_v51 = vpop.eup %6860  ;;  %1503 = vadd.xlane.f32.xlu0 %v1502_v50 }
0x13b8   :  { %v1505_v7 = vsel %vm191_vm3, %v6861_v51, 0.0 }
0x13b9   :  { %1506 = vadd.xlane.f32.xlu1 %v1505_v7 }
0x13ca   :  { %1614 = vrot.lane.b32.xlu1 %v7473_v57, %s7126_s0 }
0x13cd   :  { %1513 = vrot.lane.b32.xlu0 %v7473_v57, %s7124_s26 }
0x13ce   :  { %1612 = vrot.lane.b32.xlu1 %v7473_v57, %s7125_s27 }
0x1444   :  { %v1504_v53 = vpop.xlane.xlu0 %1503 }
0x1445   :  { %6862 = vrcp.f32 %v1504_v53 }
0x1446   :  { %v1507_v55 = vpop.xlane.xlu1 %1506 }
0x1447   :  { %6864 = vrcp.f32 %v1507_v55 }
0x1448   :  { %v1514_v0 = vpop.permute.xlu0 %1513 }
0x1449   :  { %6305 = vmatpush3.bf16.msra.mxu0 %v1514_v0 }
0x144a   :  { %6316 = vmatprep.subr.bf16.mxu0 %v7115_v8  ;;  %v1615_v60 = vpop.permute.xlu1 %1614 }
0x144b   :  { %v1620_v63 = vsel %vm143_vm2, %v1615_v60, 0 }
0x144e   :  { %v1613_v2 = vpop.permute.xlu1 %1612 }
0x144f   :  { %v6863_v1 = vpop.eup %6862 }
0x1450   :  { %v1510_v58 = vmul.f32 %v6863_v1, %v6859_v5 }
0x1451   :  { %v6865_v56 = vpop.eup %6864 }
0x1452   :  { %v1511_v59 = vmul.f32 %v6865_v56, %v6861_v51 }
0x1454   :  { %v1512_v61 = vpack.c.bf16 %v1511_v59, %v1510_v58 }
0x1456   :  { %6307 = vmatmul.mubr.msk.bf16.vlgmr.msra.gmra.mrb[44].mxu0 %vm191_vm3, %v1512_v61 }
0x1457   :  { %6317 = vmatpush3.bf16.xpose.msra.mxu0 %v1620_v63  ;;  %6318 = vmatprep.mubr.msk.bf16.mxu0 %vm7116_vm1, %v7115_v8 }
0x1458   :  { %6328 = vmatprep.subr.bf16.mxu0 %v7115_v8 }
0x145e   :  { %6319 = vmatmul.mubr.msk.bf16.vlgmr.msra.gmra.mrb[48].mxu0 %vm143_vm2, %v1613_v2 }
0x145f   :  { %6330 = vmatprep.mubr.msk.bf16.mxu0 %vm7116_vm1, %v7115_v8 }
0x1529   :  { %v1553_v9 = vpop.f32.mrb[44].mxu0 }
0x152a   :  { %v6308_v10 = vpop.f32.mrb[45].mxu0 }
0x152b   :  { %v1556_v11 = vpop.f32.mrb[46].mxu0 }
0x152c   :  { %v1560_v12 = vpack.c.bf16 %v1556_v11, %v1553_v9  ;;  %v6309_v13 = vpop.f32.mrb[47].mxu0 }
0x152e   :  { %6313 = vmatmul.mubr.msk.bf16.vlgmr.msra.gmra.mrb[48].mxu1 %vm143_vm2, %v1560_v12 }
0x152f   :  { %6324 = vmatprep.mubr.msk.bf16.mxu1 %vm7116_vm1, %v7115_v8 }
0x1531   :  { %v1656_v14 = vpop.f32.mrb[48].mxu0 }
0x1532   :  { %v1657_v15 = vadd.f32 %v7379_v52, %v1656_v14  ;;  %v6320_v16 = vpop.f32.mrb[49].mxu0 }
0x1533   :  { %v1659_v17 = vpop.f32.mrb[50].mxu0 }
0x1534   :  { %v1660_v18 = vadd.f32 %v7386_v54, %v1659_v17  ;;  %v6321_v19 = vpop.f32.mrb[51].mxu0  ;;  %v1663_v20 = vsel %vm191_vm3, %v1657_v15, -inf }
0x1535   :  { %1664 = vmax.xlane.f32.xlu0 %v1663_v20 }
0x1536   :  { %v1666_v37 = vsel %vm191_vm3, %v1660_v18, -inf }
0x1537   :  { %1667 = vmax.xlane.f32.xlu1 %v1666_v37 }
0x1548   :  { %1686 = vrot.lane.b32.xlu1 %v7473_v57, %s7127_s23 }
0x15c2   :  { %v1665_v39 = vpop.xlane.xlu0 %1664 }
0x15c3   :  { %v1669_v21 = vsub.f32 %v1657_v15, %v1665_v39  ;;  %v6768_v39 = vld [vmem:[%s8454_s4 + $0x20] sm:$0xff]  }
0x15c4   :  { %v1668_v22 = vpop.xlane.xlu1 %1667 }
0x15c5   :  { %v1671_v25 = vmul.f32 1.442695, %v1669_v21  ;;  %v1670_v28 = vsub.f32 %v1660_v18, %v1668_v22  ;;  %v5756_v18 = vld [vmem:[%s8453_s3 + $0x3] ss:$0 sm:$0xff]  ;;  %v6769_v22 = vld [vmem:[%s8454_s4 + $0x28] sm:$0xff]  }
0x15c7   :  { %6866 = vpow2.f32 %v1671_v25  ;;  %v1673_v52 = vmul.f32 1.442695, %v1670_v28  ;;  %v6772_v25 = vld [vmem:[%s8457_s7 + $0x30] sm:$0xff]   ;;  %v6773_v28 = vld [vmem:[%s8457_s7 + $0x38] sm:$0xff]  }
0x15c8   :  { %v1687_v29 = vpop.permute.xlu1 %1686 }
0x15c9   :  { %6868 = vpow2.f32 %v1673_v52  ;;  %6323 = vmatpush3.bf16.msra.mxu1 %v1687_v29 }
0x15ca   :  { %6334 = vmatprep.subr.bf16.mxu1 %v7115_v8 }
0x15d1   :  { %v6867_v54 = vpop.eup %6866 }
0x15d2   :  { %v1675_v47 = vsel %vm191_vm3, %v6867_v54, 0.0 }
0x15d3   :  { %v6869_v62 = vpop.eup %6868  ;;  %1676 = vadd.xlane.f32.xlu0 %v1675_v47 }
0x15d4   :  { %v1678_v32 = vsel %vm191_vm3, %v6869_v62, 0.0 }
0x15d7   :  { %1679 = vadd.xlane.f32.xlu0 %v1678_v32 }
0x1601   :  { %v1603_v57 = vpop.f32.mrb[48].mxu1 }
0x1602   :  { %v1610_v49 = vadd.f32 %v1603_v57, %v7541_v31  ;;  %v6314_v33 = vpop.f32.mrb[49].mxu1  ;;  %v5753_v31 = vld [vmem:[%s8455_s5 + $0x1c] sm:$0xf] }
0x1603   :  { %v1606_v34 = vpop.f32.mrb[50].mxu1 }
0x1604   :  { %v1611_v35 = vadd.f32 %v1606_v34, %v7543_v3  ;;  %v6315_v36 = vpop.f32.mrb[51].mxu1  ;;  %v1740_v3 = vsel %vm394_vm4, %v5753_v31, 0 }
0x1605   :  { %6329 = vmatpush3.bf16.msra.mxu0 %v1740_v3  ;;  %v5789_v3 = vld [vmem:[%s8452_s2 + $0x48] sm:$0xff] }
0x1606   :  { %6342 = vmatprep.subr.bf16.mxu0 %v7115_v8 }
0x1660   :  { %v1677_v38 = vpop.xlane.xlu0 %1676 }
0x1661   :  { %6870 = vrcp.f32 %v1677_v38 }
0x1664   :  { %v1680_v40 = vpop.xlane.xlu0 %1679 }
0x1665   :  { %6872 = vrcp.f32 %v1680_v40 }
0x166b   :  { %v6871_v41 = vpop.eup %6870 }
0x166c   :  { %v1683_v43 = vmul.f32 %v6871_v41, %v6867_v54 }
0x166f   :  { %v6873_v42 = vpop.eup %6872 }
0x1670   :  { %v1684_v44 = vmul.f32 %v6873_v42, %v6869_v62 }
0x1672   :  { %v1685_v45 = vpack.c.bf16 %v1684_v44, %v1683_v43 }
0x1674   :  { %6325 = vmatmul.mubr.msk.bf16.vlgmr.msra.gmra.mrb[52].mxu1 %vm191_vm3, %v1685_v45  ;;  %v5788_v45 = vld [vmem:[%s8452_s2 + $0x40] sm:$0xff] }
0x1675   :  { %6338 = vmatprep.mubr.msk.bf16.mxu1 %vm7116_vm1, %v7115_v8 }
0x1747   :  { %v1726_v46 = vpop.f32.mrb[52].mxu1 }
0x1748   :  { %v6326_v48 = vpop.f32.mrb[53].mxu1 }
0x1749   :  { %v1729_v5 = vpop.f32.mrb[54].mxu1 }
0x174a   :  { %v1733_v50 = vpack.c.bf16 %v1729_v5, %v1726_v46  ;;  %v6327_v51 = vpop.f32.mrb[55].mxu1 }
0x174c   :  { %6331 = vmatmul.mubr.msk.bf16.vlgmr.msra.gmra.mrb[52].mxu0 %vm143_vm2, %v1733_v50 }
0x174d   :  { %6350 = vmatprep.mubr.msk.bf16.mxu0 %vm7116_vm1, %v7115_v8  ;;  %6343 = vmatpush3.bf16.msra.mxu0 %v6770_v4 }
0x174e   :  { %6344 = vmatprep.subr.bf16.mxu0 %v7115_v8 }
0x1751   :  { %6345 = vmatpush3.bf16.msra.mxu0 %v6771_v6 }
0x1752   :  { %6346 = vmatprep.subr.bf16.mxu0 %v7115_v8 }
0x1755   :  { %6347 = vmatpush3.bf16.msra.mxu0 %v6772_v25 }
0x1756   :  { %6348 = vmatprep.subr.bf16.mxu0 %v7115_v8 }
0x1759   :  { %6349 = vmatpush3.bf16.msra.mxu0 %v6773_v28 }
0x175a   :  { %6368 = vmatprep.subr.bf16.mxu0 %v7115_v8 }
0x181f   :  { %v1776_v7 = vpop.f32.mrb[52].mxu0 }
0x1820   :  { %v1783_v53 = vadd.f32 %v1776_v7, %v1610_v49  ;;  %v6332_v55 = vpop.f32.mrb[53].mxu0 }
0x1821   :  { %v1779_v0 = vpop.f32.mrb[54].mxu0  ;;  %v5793_v55 = vld [vmem:[%s8452_s2 + $0x50] sm:$0xff] }
0x1822   :  { %v7597_v1 = vadd.f32 %v1783_v53, %v7447_v27  ;;  %v1784_v56 = vadd.f32 %v1779_v0, %v1611_v35  ;;  %v6333_v58 = vpop.f32.mrb[55].mxu0  ;;  %v6766_v27 = vld [vmem:[%s8456_s6 + $0x10] sm:$0xff]  }
0x1823   :  { %6335 = vmatpush3.bf16.msra.mxu1 %v6766_v27 }
0x1824   :  { %v7600_v59 = vadd.f32 %v1784_v56, %v7449_v30  ;;  %v1787_v60 = vmul.f32 %v7597_v1, %v7597_v1  ;;  %v6767_v30 = vld [vmem:[%s8456_s6 + $0x18] sm:$0xff]   ;;  %6336 = vmatprep.subr.bf16.mxu1 %v7115_v8 }
0x1825   :  { %v5794_v56 = vld [vmem:[%s8452_s2 + $0x58] sm:$0xff] }
0x1826   :  { %v1789_v61 = vsel %vm51_vm0, %v1787_v60, 0.0  ;;  %v1788_v63 = vmul.f32 %v7600_v59, %v7600_v59 }
0x1827   :  { %1790 = vadd.xlane.f32.xlu0 %v1789_v61  ;;  %6337 = vmatpush3.bf16.msra.mxu1 %v6767_v30 }
0x1828   :  { %v1792_v2 = vsel %vm51_vm0, %v1788_v63, 0.0  ;;  %6354 = vmatprep.subr.bf16.mxu1 %v7115_v8 }
0x182b   :  { %1793 = vadd.xlane.f32.xlu0 %v1792_v2 }
0x18b4   :  { %v1791_v9 = vpop.xlane.xlu0 %1790 }
0x18b5   :  { %v1795_v10 = vmul.f32 0.03125, %v1791_v9 }
0x18b7   :  { %v1797_v11 = vadd.f32 1e-06, %v1795_v10 }
0x18b8   :  { %v1794_v12 = vpop.xlane.xlu0 %1793 }
0x18b9   :  { %6874 = vrsqrt.f32 %v1797_v11  ;;  %v1796_v13 = vmul.f32 0.03125, %v1794_v12 }
0x18bb   :  { %v1798_v14 = vadd.f32 1e-06, %v1796_v13 }
0x18bd   :  { %6876 = vrsqrt.f32 %v1798_v14 }
0x18c3   :  { %v6875_v15 = vpop.eup %6874 }
0x18c4   :  { %v1801_v16 = vmul.f32 %v6875_v15, %v7597_v1 }
0x18c6   :  { %v1811_v20 = vmul.f32 %v5756_v18, %v1801_v16 }
0x18c7   :  { %v6877_v17 = vpop.eup %6876 }
0x18c8   :  { %v1802_v19 = vmul.f32 %v6877_v17, %v7600_v59 }
0x18ca   :  { %v1812_v37 = vmul.f32 %v5756_v18, %v1802_v19 }
0x18cc   :  { %v1818_v21 = vpack.c.bf16 %v1812_v37, %v1811_v20 }
0x18ce   :  { %6339 = vmatmul.mubr.msk.bf16.vlgmr.msra.gmra.mrb[56].mxu1 %vm51_vm0, %v1818_v21 }
0x18cf   :  { %6355 = vmatpush3.bf16.msra.mxu1 %v6768_v39  ;;  %6358 = vmatprep.mubr.msk.bf16.mxu1 %vm7116_vm1, %v7115_v8 }
0x18d0   :  { %6356 = vmatprep.subr.bf16.mxu1 %v7115_v8 }
0x18d3   :  { %6357 = vmatpush3.bf16.msra.mxu1 %v6769_v22 }
0x18d4   :  { %6362 = vmatprep.subr.bf16.mxu1 %v7115_v8 }
0x18d6   :  { %6359 = vmatmul.mubr.msk.bf16.vlgmr.msra.gmra.mrb[60].mxu1 %vm51_vm0, %v1998_v26 }
0x18d7   :  { %6364 = vmatprep.mubr.msk.bf16.mxu1 %vm7116_vm1, %v7115_v8 }
0x19a1   :  { %v1868_v23 = vpop.f32.mrb[56].mxu1 }
0x19a2   :  { %v6340_v24 = vpop.f32.mrb[57].mxu1  ;;  %v1875_v52 = vmax.f32 %v1868_v23, 0.0 }
0x19a3   :  { %v1871_v26 = vpop.f32.mrb[58].mxu1 }
0x19a4   :  { %v1876_v29 = vmax.f32 %v1871_v26, 0.0  ;;  %v6341_v54 = vpop.f32.mrb[59].mxu1 }
0x19a6   :  { %v1886_v47 = vpack.c.bf16 %v1876_v29, %v1875_v52 }
0x19a8   :  { %6351 = vmatmul.mubr.msk.bf16.vlgmr.msra.gmra.mrb[56].mxu0 %vm962_vm5, %v1886_v47 }
0x19a9   :  { %v2048_v62 = vpop.f32.mrb[60].mxu1  ;;  %6370 = vmatprep.mubr.msk.bf16.mxu0 %vm7116_vm1, %v7115_v8 }
0x19aa   :  { %v6360_v32 = vpop.f32.mrb[61].mxu1 }
0x19ab   :  { %v2051_v57 = vpop.f32.mrb[62].mxu1 }
0x19ac   :  { %v7657_v49 = vpack.c.bf16 %v2051_v57, %v2048_v62  ;;  %v6361_v33 = vpop.f32.mrb[63].mxu1 }
0x19ae   :  { %2187 = vrot.lane.b32.xlu1 %v7657_v49, %s7119_s21  ;;  %2060 = vrot.lane.b32.xlu0 %v7657_v49, %s7118_s20 }
0x19b2   :  { %2185 = vrot.lane.b32.xlu1 %v7657_v49, %s7117_s19 }
0x1a20   :  { %v2061_v34 = vpop.permute.xlu0 %2060  ;;  %v2188_v36 = vpop.permute.xlu1 %2187 }
0x1a21   :  { %v2066_v35 = vsel %vm143_vm2, %v2061_v34, 0  ;;  %v2193_v38 = vsel %vm143_vm2, %v2188_v36, 0 }
0x1a22   :  { %6363 = vmatpush3.bf16.xpose.msra.mxu1 %v2066_v35 }
0x1a23   :  { %6374 = vmatprep.subr.bf16.mxu1 %v7115_v8 }
0x1a24   :  { %v2186_v40 = vpop.permute.xlu1 %2185 }
0x1a29   :  { %6365 = vmatmul.mubr.msk.bf16.vlgmr.msra.gmra.mrb[64].mxu1 %vm143_vm2, %v7657_v49 }
0x1a2a   :  { %6375 = vmatpush3.bf16.xpose.msra.mxu1 %v2193_v38  ;;  %6376 = vmatprep.mubr.msk.bf16.mxu1 %vm7116_vm1, %v7115_v8 }
0x1a2b   :  { %6386 = vmatprep.subr.bf16.mxu1 %v7115_v8 }
0x1a31   :  { %6377 = vmatmul.mubr.msk.bf16.vlgmr.msra.gmra.mrb[68].mxu1 %vm143_vm2, %v2186_v40 }
0x1a32   :  { %6388 = vmatprep.mubr.msk.bf16.mxu1 %vm7116_vm1, %v7115_v8 }
0x1a7b   :  { %v7676_v41 = vpop.f32.mrb[56].mxu0 }
0x1a7c   :  { %v6352_v42 = vpop.f32.mrb[57].mxu0 }
0x1a7d   :  { %v7678_v43 = vpop.f32.mrb[58].mxu0  ;;  %v5792_v42 = vld [vmem:[%s8455_s5 + $0x20] sm:$0xf] }
0x1a7e   :  { %v6353_v44 = vpop.f32.mrb[59].mxu0 }
0x1a7f   :  { %v2360_v44 = vsel %vm394_vm4, %v5792_v42, 0  ;;  %v5804_v42 = vld [vmem:[%s8455_s5 + $0x28] sm:$0xf] }
0x1afc   :  { %v2102_v31 = vpop.f32.mrb[64].mxu1 }
0x1afd   :  { %v2103_v46 = vadd.f32 %v5788_v45, %v2102_v31  ;;  %v6366_v48 = vpop.f32.mrb[65].mxu1  ;;  %v5797_v45 = vld [vmem:[%s8455_s5 + $0x24] sm:$0xf] }
0x1afe   :  { %v2105_v5 = vpop.f32.mrb[66].mxu1  ;;  %v2313_v31 = vsel %vm394_vm4, %v5797_v45, 0 }
0x1aff   :  { %v2106_v50 = vadd.f32 %v5789_v3, %v2105_v5  ;;  %v6367_v51 = vpop.f32.mrb[67].mxu1  ;;  %v2109_v7 = vsel %vm191_vm3, %v2103_v46, -inf  ;;  %6387 = vmatpush3.bf16.msra.mxu1 %v2313_v31 }
0x1b00   :  { %2110 = vmax.xlane.f32.xlu1 %v2109_v7  ;;  %6398 = vmatprep.subr.bf16.mxu1 %v7115_v8 }
0x1b01   :  { %v2112_v53 = vsel %vm191_vm3, %v2106_v50, -inf }
0x1b02   :  { %2113 = vmax.xlane.f32.xlu0 %v2112_v53 }
0x1b04   :  { %v2229_v0 = vpop.f32.mrb[68].mxu1 }
0x1b05   :  { %v2230_v58 = vadd.f32 %v5793_v55, %v2229_v0  ;;  %v6378_v60 = vpop.f32.mrb[69].mxu1 }
0x1b06   :  { %v2232_v61 = vpop.f32.mrb[70].mxu1 }
0x1b07   :  { %v2233_v63 = vadd.f32 %v5794_v56, %v2232_v61  ;;  %v6379_v2 = vpop.f32.mrb[71].mxu1  ;;  %v2236_v27 = vsel %vm191_vm3, %v2230_v58, -inf }
0x1b08   :  { %2237 = vmax.xlane.f32.xlu1 %v2236_v27 }
0x1b09   :  { %v2239_v30 = vsel %vm191_vm3, %v2233_v63, -inf }
0x1b0a   :  { %2240 = vmax.xlane.f32.xlu0 %v2239_v30 }
0x1b8d   :  { %v2111_v4 = vpop.xlane.xlu1 %2110 }
0x1b8e   :  { %v2115_v6 = vsub.f32 %v2103_v46, %v2111_v4 }
0x1b8f   :  { %v2114_v9 = vpop.xlane.xlu0 %2113 }
0x1b90   :  { %v2117_v10 = vmul.f32 1.442695, %v2115_v6  ;;  %v2116_v11 = vsub.f32 %v2106_v50, %v2114_v9 }
0x1b92   :  { %6878 = vpow2.f32 %v2117_v10  ;;  %v2119_v12 = vmul.f32 1.442695, %v2116_v11 }
0x1b94   :  { %6880 = vpow2.f32 %v2119_v12  ;;  %v5800_v12 = vld [vmem:[%s8452_s2 + $0x60] sm:$0xff] }
0x1b95   :  { %v2238_v13 = vpop.xlane.xlu1 %2237 }
0x1b96   :  { %v2242_v14 = vsub.f32 %v2230_v58, %v2238_v13 }
0x1b97   :  { %v2241_v15 = vpop.xlane.xlu0 %2240 }
0x1b98   :  { %v2244_v16 = vmul.f32 1.442695, %v2242_v14  ;;  %v2243_v17 = vsub.f32 %v2233_v63, %v2241_v15  ;;  %v5801_v14 = vld [vmem:[%s8452_s2 + $0x68] sm:$0xff] }
0x1b9a   :  { %6882 = vpow2.f32 %v2244_v16  ;;  %v2246_v18 = vmul.f32 1.442695, %v2243_v17 }
0x1b9c   :  { %v6879_v19 = vpop.eup %6878  ;;  %6884 = vpow2.f32 %v2246_v18 }
0x1b9d   :  { %v2121_v20 = vsel %vm191_vm3, %v6879_v19, 0.0 }
0x1b9e   :  { %v6881_v37 = vpop.eup %6880  ;;  %2122 = vadd.xlane.f32.xlu1 %v2121_v20 }
0x1b9f   :  { %v2124_v39 = vsel %vm191_vm3, %v6881_v37, 0.0 }
0x1ba0   :  { %2125 = vadd.xlane.f32.xlu0 %v2124_v39 }
0x1ba4   :  { %v6883_v21 = vpop.eup %6882 }
0x1ba5   :  { %v2248_v22 = vsel %vm191_vm3, %v6883_v21, 0.0 }
0x1ba6   :  { %v6885_v25 = vpop.eup %6884  ;;  %2249 = vadd.xlane.f32.xlu1 %v2248_v22 }
0x1ba7   :  { %v2251_v28 = vsel %vm191_vm3, %v6885_v25, 0.0 }
0x1ba8   :  { %2252 = vadd.xlane.f32.xlu0 %v2251_v28 }
0x1bb7   :  { %2132 = vrot.lane.b32.xlu1 %v7657_v49, %s7120_s29 }
0x1bbb   :  { %2408 = vrot.lane.b32.xlu1 %v7657_v49, %s7121_s30 }
0x1bbe   :  { %2259 = vrot.lane.b32.xlu0 %v7657_v49, %s7123_s14 }
0x1bbf   :  { %2406 = vrot.lane.b32.xlu1 %v7657_v49, %s7122_s13 }
0x1c2b   :  { %v2123_v23 = vpop.xlane.xlu1 %2122 }
0x1c2c   :  { %6886 = vrcp.f32 %v2123_v23 }
0x1c2d   :  { %v2126_v24 = vpop.xlane.xlu0 %2125 }
0x1c2e   :  { %6888 = vrcp.f32 %v2126_v24 }
0x1c33   :  { %v2250_v26 = vpop.xlane.xlu1 %2249 }
0x1c34   :  { %6890 = vrcp.f32 %v2250_v26 }
0x1c35   :  { %v2253_v52 = vpop.xlane.xlu0 %2252 }
0x1c36   :  { %v6887_v29 = vpop.eup %6886  ;;  %6892 = vrcp.f32 %v2253_v52 }
0x1c37   :  { %v2133_v54 = vpop.permute.xlu1 %2132  ;;  %v2129_v62 = vmul.f32 %v6887_v29, %v6879_v19 }
0x1c38   :  { %v6889_v47 = vpop.eup %6888  ;;  %6369 = vmatpush3.bf16.msra.mxu0 %v2133_v54 }
0x1c39   :  { %v2130_v32 = vmul.f32 %v6889_v47, %v6881_v37  ;;  %6380 = vmatprep.subr.bf16.mxu0 %v7115_v8  ;;  %v2260_v33 = vpop.permute.xlu0 %2259 }
0x1c3b   :  { %v2131_v57 = vpack.c.bf16 %v2130_v32, %v2129_v62  ;;  %v2409_v53 = vpop.permute.xlu1 %2408 }
0x1c3c   :  { %v2414_v58 = vsel %vm143_vm2, %v2409_v53, 0 }
0x1c3d   :  { %6371 = vmatmul.mubr.msk.bf16.vlgmr.msra.gmra.mrb[60].mxu0 %vm191_vm3, %v2131_v57 }
0x1c3e   :  { %v6891_v34 = vpop.eup %6890  ;;  %6381 = vmatpush3.bf16.msra.mxu0 %v2260_v33  ;;  %6382 = vmatprep.mubr.msk.bf16.mxu0 %vm7116_vm1, %v7115_v8 }
0x1c3f   :  { %6392 = vmatprep.subr.bf16.mxu0 %v7115_v8  ;;  %v2256_v36 = vmul.f32 %v6891_v34, %v6883_v21  ;;  %v2407_v60 = vpop.permute.xlu1 %2406 }
0x1c40   :  { %v6893_v35 = vpop.eup %6892 }
0x1c41   :  { %v2257_v38 = vmul.f32 %v6893_v35, %v6885_v25 }
0x1c43   :  { %v2258_v40 = vpack.c.bf16 %v2257_v38, %v2256_v36 }
0x1c45   :  { %6383 = vmatmul.mubr.msk.bf16.vlgmr.msra.gmra.mrb[64].mxu0 %vm191_vm3, %v2258_v40 }
0x1c46   :  { %6394 = vmatprep.mubr.msk.bf16.mxu0 %vm7116_vm1, %v7115_v8  ;;  %6393 = vmatpush3.bf16.msra.mxu0 %v2360_v44  ;;  %v2534_v44 = vsel %vm394_vm4, %v5804_v42, 0 }
0x1c47   :  { %6404 = vmatprep.subr.bf16.mxu0 %v7115_v8 }
0x1d10   :  { %v2172_v3 = vpop.f32.mrb[60].mxu0 }
0x1d11   :  { %v6372_v46 = vpop.f32.mrb[61].mxu0 }
0x1d12   :  { %v2175_v48 = vpop.f32.mrb[62].mxu0 }
0x1d13   :  { %v2179_v5 = vpack.c.bf16 %v2175_v48, %v2172_v3  ;;  %v6373_v50 = vpop.f32.mrb[63].mxu0 }
0x1d15   :  { %6395 = vmatmul.mubr.msk.bf16.vlgmr.msra.gmra.mrb[68].mxu0 %vm143_vm2, %v2179_v5  ;;  %v5806_v5 = vld [vmem:[%s8452_s2 + $0x70] sm:$0xff] }
0x1d16   :  { %6406 = vmatprep.mubr.msk.bf16.mxu0 %vm7116_vm1, %v7115_v8 }
0x1d18   :  { %v2299_v51 = vpop.f32.mrb[64].mxu0 }
0x1d19   :  { %v6384_v7 = vpop.f32.mrb[65].mxu0 }
0x1d1a   :  { %v2302_v55 = vpop.f32.mrb[66].mxu0 }
0x1d1b   :  { %v2306_v0 = vpack.c.bf16 %v2302_v55, %v2299_v51  ;;  %v6385_v56 = vpop.f32.mrb[67].mxu0  ;;  %v5807_v51 = vld [vmem:[%s8452_s2 + $0x78] sm:$0xff] }
0x1d1d   :  { %6389 = vmatmul.mubr.msk.bf16.vlgmr.msra.gmra.mrb[72].mxu1 %vm143_vm2, %v2306_v0 }
0x1d1e   :  { %6399 = vmatpush3.bf16.xpose.msra.mxu1 %v2414_v58  ;;  %6400 = vmatprep.mubr.msk.bf16.mxu1 %vm7116_vm1, %v7115_v8 }
0x1d1f   :  { %6410 = vmatprep.subr.bf16.mxu1 %v7115_v8 }
0x1d25   :  { %6401 = vmatmul.mubr.msk.bf16.vlgmr.msra.gmra.mrb[76].mxu1 %vm143_vm2, %v2407_v60 }
0x1d26   :  { %6412 = vmatprep.mubr.msk.bf16.mxu1 %vm7116_vm1, %v7115_v8  ;;  %6411 = vmatpush3.bf16.msra.mxu1 %v2534_v44 }
0x1d27   :  { %6422 = vmatprep.subr.bf16.mxu1 %v7115_v8 }
0x1de8   :  { %v2396_v61 = vpop.f32.mrb[68].mxu0 }
0x1de9   :  { %v6396_v63 = vpop.f32.mrb[69].mxu0 }
0x1dea   :  { %v2399_v2 = vpop.f32.mrb[70].mxu0 }
0x1deb   :  { %v6397_v27 = vpop.f32.mrb[71].mxu0 }
0x1df0   :  { %v2349_v30 = vpop.f32.mrb[72].mxu1 }
0x1df1   :  { %v7737_v4 = vadd.f32 %v2396_v61, %v2349_v30  ;;  %v6390_v6 = vpop.f32.mrb[73].mxu1 }
0x1df2   :  { %v2352_v9 = vpop.f32.mrb[74].mxu1 }
0x1df3   :  { %v7739_v10 = vadd.f32 %v2399_v2, %v2352_v9  ;;  %v6391_v11 = vpop.f32.mrb[75].mxu1  ;;  %v1955_v9 = vadd.f32 %v7676_v41, %v7597_v1 }
0x1df8   :  { %v2450_v13 = vpop.f32.mrb[76].mxu1 }
0x1df9   :  { %v2451_v15 = vadd.f32 %v5800_v12, %v2450_v13  ;;  %v6402_v16 = vpop.f32.mrb[77].mxu1 }
0x1dfa   :  { %v2453_v17 = vpop.f32.mrb[78].mxu1  ;;  %v1957_v16 = vmul.f32 %v1955_v9, %v1955_v9 }
0x1dfb   :  { %v2454_v18 = vadd.f32 %v5801_v14, %v2453_v17  ;;  %v6403_v19 = vpop.f32.mrb[79].mxu1  ;;  %v2457_v20 = vsel %vm191_vm3, %v2451_v15, -inf  ;;  %v1956_v14 = vadd.f32 %v7678_v43, %v7600_v59 }
0x1dfc   :  { %2458 = vmax.xlane.f32.xlu0 %v2457_v20  ;;  %v1959_v17 = vsel %vm51_vm0, %v1957_v16, 0.0 }
0x1dfd   :  { %v2460_v37 = vsel %vm191_vm3, %v2454_v18, -inf }
0x1dfe   :  { %2461 = vmax.xlane.f32.xlu1 %v2460_v37 }
0x1e0f   :  { %2480 = vrot.lane.b32.xlu1 %v7657_v49, %s7124_s26 }
0x1e13   :  { %2582 = vrot.lane.b32.xlu1 %v7657_v49, %s7125_s27 }
0x1e89   :  { %v2459_v39 = vpop.xlane.xlu0 %2458 }
0x1e8a   :  { %v2463_v21 = vsub.f32 %v2451_v15, %v2459_v39 }
0x1e8b   :  { %v2462_v22 = vpop.xlane.xlu1 %2461 }
0x1e8c   :  { %v2465_v25 = vmul.f32 1.442695, %v2463_v21  ;;  %v2464_v28 = vsub.f32 %v2454_v18, %v2462_v22  ;;  %v1958_v18 = vmul.f32 %v1956_v14, %v1956_v14 }
0x1e8e   :  { %6894 = vpow2.f32 %v2465_v25  ;;  %v2467_v23 = vmul.f32 1.442695, %v2464_v28  ;;  %v1962_v19 = vsel %vm51_vm0, %v1958_v18, 0.0 }
0x1e8f   :  { %v2481_v24 = vpop.permute.xlu1 %2480 }
0x1e90   :  { %6896 = vpow2.f32 %v2467_v23  ;;  %6405 = vmatpush3.bf16.msra.mxu0 %v2481_v24 }
0x1e91   :  { %6416 = vmatprep.subr.bf16.mxu0 %v7115_v8 }
0x1e93   :  { %v2583_v40 = vpop.permute.xlu1 %2582 }
0x1e98   :  { %v6895_v26 = vpop.eup %6894 }
0x1e99   :  { %v2469_v52 = vsel %vm191_vm3, %v6895_v26, 0.0 }
0x1e9a   :  { %v6897_v29 = vpop.eup %6896  ;;  %2470 = vadd.xlane.f32.xlu0 %v2469_v52 }
0x1e9b   :  { %v2472_v54 = vsel %vm191_vm3, %v6897_v29, 0.0 }
0x1e9e   :  { %2473 = vadd.xlane.f32.xlu0 %v2472_v54 }
0x1eb4   :  { %2584 = vrot.lane.b32.xlu0 %v7657_v49, %s7126_s0 }
0x1f27   :  { %v2471_v47 = vpop.xlane.xlu0 %2470 }
0x1f28   :  { %6898 = vrcp.f32 %v2471_v47 }
0x1f2b   :  { %v2474_v62 = vpop.xlane.xlu0 %2473 }
0x1f2c   :  { %6900 = vrcp.f32 %v2474_v62 }
0x1f2f   :  { %v2585_v35 = vpop.permute.xlu0 %2584 }
0x1f30   :  { %v2590_v38 = vsel %vm143_vm2, %v2585_v35, 0 }
0x1f32   :  { %v6899_v32 = vpop.eup %6898 }
0x1f33   :  { %v2477_v33 = vmul.f32 %v6899_v32, %v6895_v26 }
0x1f36   :  { %v6901_v57 = vpop.eup %6900 }
0x1f37   :  { %v2478_v34 = vmul.f32 %v6901_v57, %v6897_v29 }
0x1f39   :  { %v2479_v36 = vpack.c.bf16 %v2478_v34, %v2477_v33 }
0x1f3b   :  { %6407 = vmatmul.mubr.msk.bf16.vlgmr.msra.gmra.mrb[72].mxu0 %vm191_vm3, %v2479_v36  ;;  %v6774_v36 = vld [vmem:[%s8459_s9] sm:$0xff]  }
0x1f3c   :  { %6417 = vmatpush3.bf16.xpose.msra.mxu0 %v2590_v38  ;;  %6418 = vmatprep.mubr.msk.bf16.mxu0 %vm7116_vm1, %v7115_v8 }
0x1f3d   :  { %6428 = vmatprep.subr.bf16.mxu0 %v7115_v8 }
0x1f43   :  { %6419 = vmatmul.mubr.msk.bf16.vlgmr.msra.gmra.mrb[76].mxu0 %vm143_vm2, %v2583_v40 }
0x1f44   :  { %6430 = vmatprep.mubr.msk.bf16.mxu0 %vm7116_vm1, %v7115_v8 }
0x200e   :  { %v2520_v45 = vpop.f32.mrb[72].mxu0 }
0x200f   :  { %v6408_v31 = vpop.f32.mrb[73].mxu0 }
0x2010   :  { %v2523_v3 = vpop.f32.mrb[74].mxu0  ;;  %v5778_v31 = vld [vmem:[%s8453_s3 + $0xa] ss:$0 sm:$0xff] }
0x2011   :  { %v2527_v46 = vpack.c.bf16 %v2523_v3, %v2520_v45  ;;  %v6409_v48 = vpop.f32.mrb[75].mxu0  ;;  %v6775_v45 = vld [vmem:[%s8459_s9 + $0x8] sm:$0xff]  }
0x2013   :  { %6413 = vmatmul.mubr.msk.bf16.vlgmr.msra.gmra.mrb[80].mxu1 %vm143_vm2, %v2527_v46 }
0x2014   :  { %6424 = vmatprep.mubr.msk.bf16.mxu1 %vm7116_vm1, %v7115_v8 }
0x2016   :  { %v2626_v50 = vpop.f32.mrb[76].mxu0 }
0x2017   :  { %v2627_v7 = vadd.f32 %v5806_v5, %v2626_v50  ;;  %v6420_v53 = vpop.f32.mrb[77].mxu0 }
0x2018   :  { %v2629_v55 = vpop.f32.mrb[78].mxu0  ;;  %v7034_v53 = vld [vmem:[%s8451_s1] sm:$0xff] }
0x2019   :  { %v2630_v0 = vadd.f32 %v5807_v51, %v2629_v55  ;;  %v6421_v56 = vpop.f32.mrb[79].mxu0  ;;  %v2633_v58 = vsel %vm191_vm3, %v2627_v7, -inf }
0x201a   :  { %2634 = vmax.xlane.f32.xlu1 %v2633_v58  ;;  %v7035_v58 = vld [vmem:[%s8451_s1 + $0x8] sm:$0xff] }
0x201b   :  { %v2636_v60 = vsel %vm191_vm3, %v2630_v0, -inf }
0x201c   :  { %2637 = vmax.xlane.f32.xlu0 %v2636_v60 }
0x20a7   :  { %v2635_v61 = vpop.xlane.xlu1 %2634 }
0x20a8   :  { %v2639_v63 = vsub.f32 %v2627_v7, %v2635_v61 }
0x20a9   :  { %v2638_v2 = vpop.xlane.xlu0 %2637 }
0x20aa   :  { %v2641_v27 = vmul.f32 1.442695, %v2639_v63  ;;  %v2640_v30 = vsub.f32 %v2630_v0, %v2638_v2 }
0x20ac   :  { %6902 = vpow2.f32 %v2641_v27  ;;  %v2643_v6 = vmul.f32 1.442695, %v2640_v30 }
0x20ae   :  { %6904 = vpow2.f32 %v2643_v6 }
0x20b6   :  { %v6903_v11 = vpop.eup %6902 }
0x20b7   :  { %v2645_v12 = vsel %vm191_vm3, %v6903_v11, 0.0 }
0x20b8   :  { %v6905_v13 = vpop.eup %6904  ;;  %2646 = vadd.xlane.f32.xlu0 %v2645_v12 }
0x20b9   :  { %v2648_v15 = vsel %vm191_vm3, %v6905_v13, 0.0 }
0x20ba   :  { %2649 = vadd.xlane.f32.xlu1 %v2648_v15 }
0x20be   :  { %1960 = vadd.xlane.f32.xlu1 %v1959_v17 }
0x20c2   :  { %1963 = vadd.xlane.f32.xlu1 %v1962_v19 }
0x20ce   :  { %2656 = vrot.lane.b32.xlu0 %v7657_v49, %s7127_s23 }
0x20e6   :  { %v2570_v1 = vpop.f32.mrb[80].mxu1 }
0x20e7   :  { %v2577_v41 = vadd.f32 %v2570_v1, %v7737_v4  ;;  %v6414_v20 = vpop.f32.mrb[81].mxu1  ;;  %v5810_v4 = vld [vmem:[%s8455_s5 + $0x2c] sm:$0xf] }
0x20e8   :  { %v2573_v37 = vpop.f32.mrb[82].mxu1 }
0x20e9   :  { %v2578_v59 = vadd.f32 %v2573_v37, %v7739_v10  ;;  %v6415_v43 = vpop.f32.mrb[83].mxu1  ;;  %v2710_v10 = vsel %vm394_vm4, %v5810_v4, 0 }
0x20ea   :  { %6429 = vmatpush3.bf16.msra.mxu0 %v2710_v10 }
0x20eb   :  { %6442 = vmatprep.subr.bf16.mxu0 %v7115_v8 }
0x2145   :  { %v2647_v39 = vpop.xlane.xlu0 %2646 }
0x2146   :  { %6906 = vrcp.f32 %v2647_v39 }
0x2147   :  { %v2650_v21 = vpop.xlane.xlu1 %2649 }
0x2148   :  { %6908 = vrcp.f32 %v2650_v21 }
0x2149   :  { %v2657_v22 = vpop.permute.xlu0 %2656 }
0x214a   :  { %6423 = vmatpush3.bf16.msra.mxu1 %v2657_v22 }
0x214b   :  { %6434 = vmatprep.subr.bf16.mxu1 %v7115_v8  ;;  %v1961_v26 = vpop.xlane.xlu1 %1960 }
0x214c   :  { %v1965_v54 = vmul.f32 0.03125, %v1961_v26 }
0x214e   :  { %v1967_v62 = vadd.f32 1e-06, %v1965_v54 }
0x214f   :  { %v1964_v52 = vpop.xlane.xlu1 %1963 }
0x2150   :  { %v6907_v25 = vpop.eup %6906  ;;  %v1966_v29 = vmul.f32 0.03125, %v1964_v52 }
0x2151   :  { %v2653_v23 = vmul.f32 %v6907_v25, %v6903_v11 }
0x2152   :  { %v6909_v28 = vpop.eup %6908  ;;  %v1968_v47 = vadd.f32 1e-06, %v1966_v29  ;;  %v5820_v29 = vld [vmem:[%s8452_s2 + $0x80] sm:$0xff] }
0x2153   :  { %v2654_v49 = vmul.f32 %v6909_v28, %v6905_v13  ;;  %v6776_v13 = vld [vmem:[%s8458_s8] sm:$0xff]  }
0x2154   :  { %6910 = vrsqrt.f32 %v1968_v47  ;;  %v5821_v47 = vld [vmem:[%s8452_s2 + $0x88] sm:$0xff] }
0x2155   :  { %v2655_v24 = vpack.c.bf16 %v2654_v49, %v2653_v23  ;;  %6912 = vrsqrt.f32 %v1967_v62 }
0x2157   :  { %6425 = vmatmul.mubr.msk.bf16.vlgmr.msra.gmra.mrb[84].mxu1 %vm191_vm3, %v2655_v24 }
0x2158   :  { %6438 = vmatprep.mubr.msk.bf16.mxu1 %vm7116_vm1, %v7115_v8  ;;  %6435 = vmatpush3.bf16.msra.mxu1 %v6776_v13 }
0x2159   :  { %6436 = vmatprep.subr.bf16.mxu1 %v7115_v8 }
0x215e   :  { %v6911_v32 = vpop.eup %6910 }
0x215f   :  { %v6913_v34 = vpop.eup %6912  ;;  %v1972_v38 = vmul.f32 %v6911_v32, %v1956_v14  ;;  %v6777_v14 = vld [vmem:[%s8458_s8 + $0x8] sm:$0xff]  }
0x2160   :  { %v1971_v44 = vmul.f32 %v6913_v34, %v1955_v9  ;;  %6437 = vmatpush3.bf16.msra.mxu1 %v6777_v14 }
0x2161   :  { %v1982_v3 = vmul.f32 %v5778_v31, %v1972_v38  ;;  %6450 = vmatprep.subr.bf16.mxu1 %v7115_v8  ;;  %v5825_v38 = vld [vmem:[%s8452_s2 + $0x90] sm:$0xff] }
0x2162   :  { %v1981_v46 = vmul.f32 %v5778_v31, %v1971_v44 }
0x2164   :  { %v7816_v48 = vpack.c.bf16 %v1982_v3, %v1981_v46 }
0x222a   :  { %v2696_v57 = vpop.f32.mrb[84].mxu1 }
0x222b   :  { %v6426_v33 = vpop.f32.mrb[85].mxu1 }
0x222c   :  { %v2699_v35 = vpop.f32.mrb[86].mxu1 }
0x222d   :  { %v2703_v40 = vpack.c.bf16 %v2699_v35, %v2696_v57  ;;  %v6427_v42 = vpop.f32.mrb[87].mxu1 }
0x222e   :  { %v5826_v42 = vld [vmem:[%s8452_s2 + $0x98] sm:$0xff] }
0x222f   :  { %6431 = vmatmul.mubr.msk.bf16.vlgmr.msra.gmra.mrb[80].mxu0 %vm143_vm2, %v2703_v40 }
0x2230   :  { %6443 = vmatpush3.bf16.msra.mxu0 %v6774_v36  ;;  %6446 = vmatprep.mubr.msk.bf16.mxu0 %vm7116_vm1, %v7115_v8 }
0x2231   :  { %6444 = vmatprep.subr.bf16.mxu0 %v7115_v8 }
0x2234   :  { %6445 = vmatpush3.bf16.msra.mxu0 %v6775_v45 }
0x2235   :  { %6456 = vmatprep.subr.bf16.mxu0 %v7115_v8 }
0x2237   :  { %6447 = vmatmul.mubr.msk.bf16.vlgmr.msra.gmra.mrb[84].mxu0 %vm51_vm0, %v7816_v48 }
0x2238   :  { %6458 = vmatprep.mubr.msk.bf16.mxu0 %vm7116_vm1, %v7115_v8 }
0x2302   :  { %v2746_v5 = vpop.f32.mrb[80].mxu0 }
0x2303   :  { %v2753_v50 = vadd.f32 %v2746_v5, %v2577_v41  ;;  %v6432_v51 = vpop.f32.mrb[81].mxu0 }
0x2304   :  { %v2749_v7 = vpop.f32.mrb[82].mxu0 }
0x2305   :  { %v7826_v55 = vadd.f32 %v7034_v53, %v2753_v50  ;;  %v2754_v0 = vadd.f32 %v2749_v7, %v2578_v59  ;;  %v6433_v56 = vpop.f32.mrb[83].mxu0  ;;  %v5813_v59 = vld [vmem:[%s8453_s3 + $0x5] ss:$0 sm:$0xff] }
0x2307   :  { %v7831_v60 = vadd.f32 %v7035_v58, %v2754_v0  ;;  %v2757_v61 = vmul.f32 %v7826_v55, %v7826_v55 }
0x2309   :  { %v2759_v63 = vsel %vm51_vm0, %v2757_v61, 0.0  ;;  %v2758_v2 = vmul.f32 %v7831_v60, %v7831_v60 }
0x230a   :  { %2760 = vadd.xlane.f32.xlu1 %v2759_v63  ;;  %v2898_v27 = vpop.f32.mrb[84].mxu0 }
0x230b   :  { %v6448_v30 = vpop.f32.mrb[85].mxu0  ;;  %v2762_v12 = vsel %vm51_vm0, %v2758_v2, 0.0 }
0x230c   :  { %v2901_v6 = vpop.f32.mrb[86].mxu0 }
0x230d   :  { %v7838_v9 = vpack.c.bf16 %v2901_v6, %v2898_v27  ;;  %v6449_v11 = vpop.f32.mrb[87].mxu0 }
0x230e   :  { %2763 = vadd.xlane.f32.xlu1 %v2762_v12 }
0x230f   :  { %v2914_v25 = vsel %vm143_vm2, %v7838_v9, 0 }
0x231f   :  { %3037 = vrot.lane.b32.xlu1 %v7838_v9, %s7117_s19 }
0x2397   :  { %v2761_v15 = vpop.xlane.xlu1 %2760 }
0x2398   :  { %v2765_v16 = vmul.f32 0.03125, %v2761_v15 }
0x239a   :  { %v2767_v17 = vadd.f32 1e-06, %v2765_v16 }
0x239b   :  { %v2764_v18 = vpop.xlane.xlu1 %2763 }
0x239c   :  { %6914 = vrsqrt.f32 %v2767_v17  ;;  %v2766_v19 = vmul.f32 0.03125, %v2764_v18 }
0x239e   :  { %v2768_v1 = vadd.f32 1e-06, %v2766_v19 }
0x239f   :  { %v3038_v49 = vpop.permute.xlu1 %3037 }
0x23a0   :  { %6916 = vrsqrt.f32 %v2768_v1  ;;  %v3043_v26 = vsel %vm143_vm2, %v3038_v49, 0 }
0x23a6   :  { %v6915_v41 = vpop.eup %6914 }
0x23a7   :  { %v2771_v20 = vmul.f32 %v6915_v41, %v7826_v55 }
0x23a9   :  { %v2781_v39 = vmul.f32 %v5813_v59, %v2771_v20 }
0x23aa   :  { %v6917_v37 = vpop.eup %6916 }
0x23ab   :  { %v2772_v43 = vmul.f32 %v6917_v37, %v7831_v60 }
0x23ad   :  { %v2782_v21 = vmul.f32 %v5813_v59, %v2772_v43 }
0x23af   :  { %v2787_v22 = vpack.c.bf16 %v2782_v21, %v2781_v39 }
0x23b1   :  { %6439 = vmatmul.mubr.msk.bf16.vlgmr.msra.gmra.mrb[88].mxu1 %vm51_vm0, %v2787_v22 }
0x23b2   :  { %6451 = vmatpush3.bf16.xpose.msra.mxu1 %v2914_v25  ;;  %6452 = vmatprep.mubr.msk.bf16.mxu1 %vm7116_vm1, %v7115_v8 }
0x23b3   :  { %6462 = vmatprep.subr.bf16.mxu1 %v7115_v8 }
0x2484   :  { %v2837_v28 = vpop.f32.mrb[88].mxu1 }
0x2485   :  { %v6440_v23 = vpop.f32.mrb[89].mxu1 }
0x2486   :  { %v2840_v24 = vpop.f32.mrb[90].mxu1 }
0x2487   :  { %v7862_v4 = vpack.c.bf16 %v2840_v24, %v2837_v28  ;;  %v6441_v10 = vpop.f32.mrb[91].mxu1 }
0x2489   :  { %3035 = vrot.lane.b32.xlu0 %v7862_v4, %s7117_s19  ;;  %6453 = vmatmul.mubr.msk.bf16.vlgmr.msra.gmra.mrb[92].mxu1 %vm143_vm2, %v7862_v4 }
0x248a   :  { %6463 = vmatpush3.bf16.xpose.msra.mxu1 %v3043_v26  ;;  %6464 = vmatprep.mubr.msk.bf16.mxu1 %vm7116_vm1, %v7115_v8  ;;  %v5824_v26 = vld [vmem:[%s8455_s5 + $0x40] sm:$0xf] }
0x248b   :  { %6474 = vmatprep.subr.bf16.mxu1 %v7115_v8 }
0x24fb   :  { %v3036_v52 = vpop.permute.xlu0 %3035 }
0x24fc   :  { %6465 = vmatmul.mubr.msk.bf16.vlgmr.msra.gmra.mrb[96].mxu1 %vm143_vm2, %v3036_v52  ;;  %v3210_v52 = vsel %vm394_vm4, %v5824_v26, 0 }
0x24fd   :  { %6476 = vmatprep.mubr.msk.bf16.mxu1 %vm7116_vm1, %v7115_v8 }
0x255c   :  { %v2950_v54 = vpop.f32.mrb[92].mxu1 }
0x255d   :  { %v2951_v62 = vadd.f32 %v5820_v29, %v2950_v54  ;;  %v6454_v32 = vpop.f32.mrb[93].mxu1  ;;  %v5829_v29 = vld [vmem:[%s8455_s5 + $0x44] sm:$0xf] }
0x255e   :  { %v2953_v57 = vpop.f32.mrb[94].mxu1  ;;  %v3163_v54 = vsel %vm394_vm4, %v5829_v29, 0 }
0x255f   :  { %v2954_v33 = vadd.f32 %v5821_v47, %v2953_v57  ;;  %v6455_v34 = vpop.f32.mrb[95].mxu1  ;;  %v2957_v35 = vsel %vm191_vm3, %v2951_v62, -inf  ;;  %6475 = vmatpush3.bf16.msra.mxu1 %v3163_v54 }
0x2560   :  { %2958 = vmax.xlane.f32.xlu0 %v2957_v35  ;;  %6486 = vmatprep.subr.bf16.mxu1 %v7115_v8 }
0x2561   :  { %v2960_v36 = vsel %vm191_vm3, %v2954_v33, -inf }
0x2562   :  { %2961 = vmax.xlane.f32.xlu1 %v2960_v36 }
0x25cf   :  { %v3079_v40 = vpop.f32.mrb[96].mxu1 }
0x25d0   :  { %v3080_v44 = vadd.f32 %v5825_v38, %v3079_v40  ;;  %v6466_v45 = vpop.f32.mrb[97].mxu1 }
0x25d1   :  { %v3082_v31 = vpop.f32.mrb[98].mxu1 }
0x25d2   :  { %v3083_v3 = vadd.f32 %v5826_v42, %v3082_v31  ;;  %v6467_v46 = vpop.f32.mrb[99].mxu1  ;;  %v3086_v5 = vsel %vm191_vm3, %v3080_v44, -inf }
0x25d3   :  { %3087 = vmax.xlane.f32.xlu0 %v3086_v5 }
0x25d4   :  { %v3089_v50 = vsel %vm191_vm3, %v3083_v3, -inf }
0x25d7   :  { %3090 = vmax.xlane.f32.xlu0 %v3089_v50 }
0x25ed   :  { %v2959_v51 = vpop.xlane.xlu0 %2958 }
0x25ee   :  { %v2963_v7 = vsub.f32 %v2951_v62, %v2959_v51 }
0x25ef   :  { %v2962_v53 = vpop.xlane.xlu1 %2961 }
0x25f0   :  { %v2965_v0 = vmul.f32 1.442695, %v2963_v7  ;;  %v2964_v56 = vsub.f32 %v2954_v33, %v2962_v53 }
0x25f2   :  { %6918 = vpow2.f32 %v2965_v0  ;;  %v2967_v58 = vmul.f32 1.442695, %v2964_v56 }
0x25f4   :  { %6920 = vpow2.f32 %v2967_v58  ;;  %v5832_v58 = vld [vmem:[%s8452_s2 + $0xa0] sm:$0xff] }
0x25fc   :  { %v6919_v61 = vpop.eup %6918 }
0x25fd   :  { %v2969_v63 = vsel %vm191_vm3, %v6919_v61, 0.0 }
0x25fe   :  { %v6921_v2 = vpop.eup %6920  ;;  %2970 = vadd.xlane.f32.xlu0 %v2969_v63  ;;  %v5833_v63 = vld [vmem:[%s8452_s2 + $0xa8] sm:$0xff] }
0x25ff   :  { %v2972_v27 = vsel %vm191_vm3, %v6921_v2, 0.0 }
0x2602   :  { %2973 = vadd.xlane.f32.xlu0 %v2972_v27 }
0x2660   :  { %v3088_v30 = vpop.xlane.xlu0 %3087 }
0x2661   :  { %v3092_v6 = vsub.f32 %v3080_v44, %v3088_v30 }
0x2663   :  { %v3094_v11 = vmul.f32 1.442695, %v3092_v6 }
0x2664   :  { %v3091_v12 = vpop.xlane.xlu0 %3090 }
0x2665   :  { %6922 = vpow2.f32 %v3094_v11  ;;  %v3093_v13 = vsub.f32 %v3083_v3, %v3091_v12 }
0x2667   :  { %v3096_v14 = vmul.f32 1.442695, %v3093_v13 }
0x2669   :  { %6924 = vpow2.f32 %v3096_v14 }
0x266f   :  { %v6923_v15 = vpop.eup %6922 }
0x2670   :  { %v3098_v16 = vsel %vm191_vm3, %v6923_v15, 0.0 }
0x2671   :  { %3099 = vadd.xlane.f32.xlu1 %v3098_v16 }
0x2673   :  { %v6925_v17 = vpop.eup %6924 }
0x2674   :  { %v3101_v18 = vsel %vm191_vm3, %v6925_v17, 0.0 }
0x2675   :  { %3102 = vadd.xlane.f32.xlu0 %v3101_v18 }
0x2682   :  { %2981 = vrot.lane.b32.xlu1 %v7838_v9, %s7118_s20 }
0x2686   :  { %3258 = vrot.lane.b32.xlu1 %v7838_v9, %s7122_s13 }
0x268a   :  { %3256 = vrot.lane.b32.xlu1 %v7862_v4, %s7122_s13 }
0x268b   :  { %3109 = vrot.lane.b32.xlu0 %v7838_v9, %s7119_s21  ;;  %v2971_v19 = vpop.xlane.xlu0 %2970 }
0x268f   :  { %v2974_v1 = vpop.xlane.xlu0 %2973 }
0x2690   :  { %6926 = vrcp.f32 %v2974_v1 }
0x2691   :  { %6928 = vrcp.f32 %v2971_v19 }
0x269a   :  { %v6927_v41 = vpop.eup %6926 }
0x269b   :  { %v6929_v37 = vpop.eup %6928  ;;  %v2978_v59 = vmul.f32 %v6927_v41, %v6921_v2 }
0x269c   :  { %v2977_v43 = vmul.f32 %v6929_v37, %v6919_v61 }
0x269e   :  { %v2979_v22 = vpack.c.bf16 %v2978_v59, %v2977_v43 }
0x26fe   :  { %v3100_v20 = vpop.xlane.xlu1 %3099 }
0x26ff   :  { %6930 = vrcp.f32 %v3100_v20 }
0x2702   :  { %v2982_v39 = vpop.permute.xlu1 %2981  ;;  %v3103_v21 = vpop.xlane.xlu0 %3102 }
0x2703   :  { %6932 = vrcp.f32 %v3103_v21  ;;  %6457 = vmatpush3.bf16.msra.mxu0 %v2982_v39 }
0x2704   :  { %6468 = vmatprep.subr.bf16.mxu0 %v7115_v8 }
0x2706   :  { %6459 = vmatmul.mubr.msk.bf16.vlgmr.msra.gmra.mrb[88].mxu0 %vm191_vm3, %v2979_v22  ;;  %v3110_v25 = vpop.permute.xlu0 %3109  ;;  %v3259_v36 = vpop.permute.xlu1 %3258 }
0x2707   :  { %6469 = vmatpush3.bf16.msra.mxu0 %v3110_v25  ;;  %6470 = vmatprep.mubr.msk.bf16.mxu0 %vm7116_vm1, %v7115_v8  ;;  %v3264_v44 = vsel %vm143_vm2, %v3259_v36, 0 }
0x2708   :  { %6480 = vmatprep.subr.bf16.mxu0 %v7115_v8 }
0x2709   :  { %v6931_v28 = vpop.eup %6930 }
0x270a   :  { %v3106_v49 = vmul.f32 %v6931_v28, %v6923_v15  ;;  %v3257_v45 = vpop.permute.xlu1 %3256 }
0x270d   :  { %v6933_v23 = vpop.eup %6932 }
0x270e   :  { %v3107_v24 = vmul.f32 %v6933_v23, %v6925_v17 }
0x2710   :  { %v3108_v10 = vpack.c.bf16 %v3107_v24, %v3106_v49 }
0x2712   :  { %6471 = vmatmul.mubr.msk.bf16.vlgmr.msra.gmra.mrb[92].mxu0 %vm191_vm3, %v3108_v10  ;;  %v5836_v10 = vld [vmem:[%s8455_s5 + $0x48] sm:$0xf] }
0x2713   :  { %6482 = vmatprep.mubr.msk.bf16.mxu0 %vm7116_vm1, %v7115_v8  ;;  %6481 = vmatpush3.bf16.msra.mxu0 %v3210_v52  ;;  %v3384_v26 = vsel %vm394_vm4, %v5836_v10, 0  ;;  %v6778_v10 = vld [vmem:[%s8456_s6 + $0x20] sm:$0xff]  }
0x2714   :  { %6492 = vmatprep.subr.bf16.mxu0 %v7115_v8 }
0x27d9   :  { %v3021_v47 = vpop.f32.mrb[88].mxu0 }
0x27da   :  { %v6460_v62 = vpop.f32.mrb[89].mxu0 }
0x27db   :  { %v3024_v32 = vpop.f32.mrb[90].mxu0 }
0x27dc   :  { %v3028_v57 = vpack.c.bf16 %v3024_v32, %v3021_v47  ;;  %v6461_v33 = vpop.f32.mrb[91].mxu0  ;;  %v5838_v32 = vld [vmem:[%s8452_s2 + $0xb0] sm:$0xff] }
0x27dd   :  { %v5839_v33 = vld [vmem:[%s8452_s2 + $0xb8] sm:$0xff] }
0x27de   :  { %6483 = vmatmul.mubr.msk.bf16.vlgmr.msra.gmra.mrb[96].mxu0 %vm143_vm2, %v3028_v57 }
0x27df   :  { %6494 = vmatprep.mubr.msk.bf16.mxu0 %vm7116_vm1, %v7115_v8 }
0x27e5   :  { %v3149_v34 = vpop.f32.mrb[92].mxu0 }
0x27e6   :  { %v6472_v35 = vpop.f32.mrb[93].mxu0 }
0x27e7   :  { %v3152_v38 = vpop.f32.mrb[94].mxu0 }
0x27e8   :  { %v3156_v40 = vpack.c.bf16 %v3152_v38, %v3149_v34  ;;  %v6473_v42 = vpop.f32.mrb[95].mxu0 }
0x27ea   :  { %6477 = vmatmul.mubr.msk.bf16.vlgmr.msra.gmra.mrb[100].mxu1 %vm143_vm2, %v3156_v40 }
0x27eb   :  { %6487 = vmatpush3.bf16.xpose.msra.mxu1 %v3264_v44  ;;  %6488 = vmatprep.mubr.msk.bf16.mxu1 %vm7116_vm1, %v7115_v8 }
0x27ec   :  { %6498 = vmatprep.subr.bf16.mxu1 %v7115_v8 }
0x27f2   :  { %6489 = vmatmul.mubr.msk.bf16.vlgmr.msra.gmra.mrb[104].mxu1 %vm143_vm2, %v3257_v45 }
0x27f3   :  { %6500 = vmatprep.mubr.msk.bf16.mxu1 %vm7116_vm1, %v7115_v8  ;;  %6499 = vmatpush3.bf16.msra.mxu1 %v3384_v26  ;;  %v6781_v26 = vld [vmem:[%s8457_s7 + $0x48] sm:$0xff]  }
0x27f4   :  { %6510 = vmatprep.subr.bf16.mxu1 %v7115_v8 }
0x28b1   :  { %v3246_v31 = vpop.f32.mrb[96].mxu0 }
0x28b2   :  { %v6484_v3 = vpop.f32.mrb[97].mxu0 }
0x28b3   :  { %v3249_v46 = vpop.f32.mrb[98].mxu0 }
0x28b4   :  { %v6485_v5 = vpop.f32.mrb[99].mxu0 }
0x28bd   :  { %v3199_v50 = vpop.f32.mrb[100].mxu1 }
0x28be   :  { %v7932_v51 = vadd.f32 %v3246_v31, %v3199_v50  ;;  %v6478_v7 = vpop.f32.mrb[101].mxu1 }
0x28bf   :  { %v3202_v53 = vpop.f32.mrb[102].mxu1 }
0x28c0   :  { %v7934_v0 = vadd.f32 %v3249_v46, %v3202_v53  ;;  %v6479_v56 = vpop.f32.mrb[103].mxu1 }
0x28c5   :  { %v3300_v61 = vpop.f32.mrb[104].mxu1 }
0x28c6   :  { %v3301_v2 = vadd.f32 %v5832_v58, %v3300_v61  ;;  %v6490_v27 = vpop.f32.mrb[105].mxu1 }
0x28c7   :  { %v3303_v30 = vpop.f32.mrb[106].mxu1 }
0x28c8   :  { %v3304_v6 = vadd.f32 %v5833_v63, %v3303_v30  ;;  %v6491_v11 = vpop.f32.mrb[107].mxu1  ;;  %v3307_v12 = vsel %vm191_vm3, %v3301_v2, -inf }
0x28c9   :  { %3308 = vmax.xlane.f32.xlu0 %v3307_v12 }
0x28ca   :  { %v3310_v13 = vsel %vm191_vm3, %v3304_v6, -inf }
0x28cb   :  { %3311 = vmax.xlane.f32.xlu1 %v3310_v13 }
0x28dc   :  { %3330 = vrot.lane.b32.xlu1 %v7838_v9, %s7121_s30 }
0x28e0   :  { %3432 = vrot.lane.b32.xlu1 %v7862_v4, %s7125_s27 }
0x2956   :  { %v3309_v14 = vpop.xlane.xlu0 %3308 }
0x2957   :  { %v3313_v15 = vsub.f32 %v3301_v2, %v3309_v14 }
0x2958   :  { %v3312_v16 = vpop.xlane.xlu1 %3311 }
0x2959   :  { %v3315_v17 = vmul.f32 1.442695, %v3313_v15  ;;  %v3314_v18 = vsub.f32 %v3304_v6, %v3312_v16 }
0x295b   :  { %6934 = vpow2.f32 %v3315_v17  ;;  %v3317_v19 = vmul.f32 1.442695, %v3314_v18 }
0x295c   :  { %v3331_v1 = vpop.permute.xlu1 %3330 }
0x295d   :  { %6936 = vpow2.f32 %v3317_v19  ;;  %6493 = vmatpush3.bf16.msra.mxu0 %v3331_v1 }
0x295e   :  { %6504 = vmatprep.subr.bf16.mxu0 %v7115_v8 }
0x2960   :  { %v3433_v24 = vpop.permute.xlu1 %3432 }
0x2965   :  { %v6935_v41 = vpop.eup %6934 }
0x2966   :  { %v3319_v20 = vsel %vm191_vm3, %v6935_v41, 0.0 }
0x2967   :  { %v6937_v37 = vpop.eup %6936  ;;  %3320 = vadd.xlane.f32.xlu0 %v3319_v20 }
0x2968   :  { %v3322_v59 = vsel %vm191_vm3, %v6937_v37, 0.0 }
0x296b   :  { %3323 = vadd.xlane.f32.xlu0 %v3322_v59 }
0x2981   :  { %3434 = vrot.lane.b32.xlu0 %v7838_v9, %s7125_s27 }
0x29f4   :  { %v3321_v4 = vpop.xlane.xlu0 %3320 }
0x29f5   :  { %6938 = vrcp.f32 %v3321_v4 }
0x29f8   :  { %v3324_v43 = vpop.xlane.xlu0 %3323 }
0x29f9   :  { %6940 = vrcp.f32 %v3324_v43 }
0x29fc   :  { %v3435_v28 = vpop.permute.xlu0 %3434 }
0x29fd   :  { %v3440_v49 = vsel %vm143_vm2, %v3435_v28, 0 }
0x29ff   :  { %v6939_v39 = vpop.eup %6938 }
0x2a00   :  { %v3327_v22 = vmul.f32 %v6939_v39, %v6935_v41 }
0x2a03   :  { %v6941_v21 = vpop.eup %6940 }
0x2a04   :  { %v3328_v25 = vmul.f32 %v6941_v21, %v6937_v37 }
0x2a06   :  { %v3329_v23 = vpack.c.bf16 %v3328_v25, %v3327_v22 }
0x2a08   :  { %6495 = vmatmul.mubr.msk.bf16.vlgmr.msra.gmra.mrb[100].mxu0 %vm191_vm3, %v3329_v23 }
0x2a09   :  { %6505 = vmatpush3.bf16.xpose.msra.mxu0 %v3440_v49  ;;  %6506 = vmatprep.mubr.msk.bf16.mxu0 %vm7116_vm1, %v7115_v8 }
0x2a0a   :  { %6516 = vmatprep.subr.bf16.mxu0 %v7115_v8 }
0x2a10   :  { %6507 = vmatmul.mubr.msk.bf16.vlgmr.msra.gmra.mrb[104].mxu0 %vm143_vm2, %v3433_v24 }
0x2a11   :  { %6518 = vmatprep.mubr.msk.bf16.mxu0 %vm7116_vm1, %v7115_v8 }
0x2adb   :  { %v3370_v52 = vpop.f32.mrb[100].mxu0 }
0x2adc   :  { %v6496_v29 = vpop.f32.mrb[101].mxu0 }
0x2add   :  { %v3373_v54 = vpop.f32.mrb[102].mxu0 }
0x2ade   :  { %v3377_v47 = vpack.c.bf16 %v3373_v54, %v3370_v52  ;;  %v6497_v62 = vpop.f32.mrb[103].mxu0 }
0x2ae0   :  { %6501 = vmatmul.mubr.msk.bf16.vlgmr.msra.gmra.mrb[108].mxu1 %vm143_vm2, %v3377_v47 }
0x2ae1   :  { %6512 = vmatprep.mubr.msk.bf16.mxu1 %vm7116_vm1, %v7115_v8 }
0x2ae3   :  { %v3476_v57 = vpop.f32.mrb[104].mxu0 }
0x2ae4   :  { %v3477_v34 = vadd.f32 %v5838_v32, %v3476_v57  ;;  %v6508_v35 = vpop.f32.mrb[105].mxu0 }
0x2ae5   :  { %v3479_v36 = vpop.f32.mrb[106].mxu0  ;;  %v5845_v35 = vld [vmem:[%s8453_s3 + $0x6] ss:$0 sm:$0xff] }
0x2ae6   :  { %v3480_v38 = vadd.f32 %v5839_v33, %v3479_v36  ;;  %v6509_v40 = vpop.f32.mrb[107].mxu0  ;;  %v3483_v42 = vsel %vm191_vm3, %v3477_v34, -inf }
0x2ae7   :  { %3484 = vmax.xlane.f32.xlu1 %v3483_v42 }
0x2ae8   :  { %v3486_v44 = vsel %vm191_vm3, %v3480_v38, -inf }
0x2ae9   :  { %3487 = vmax.xlane.f32.xlu0 %v3486_v44  ;;  %v6782_v44 = vld [vmem:[%s8457_s7 + $0x50] sm:$0xff]  }
0x2b74   :  { %v3485_v45 = vpop.xlane.xlu1 %3484 }
0x2b75   :  { %v3489_v31 = vsub.f32 %v3477_v34, %v3485_v45  ;;  %v6783_v45 = vld [vmem:[%s8457_s7 + $0x58] sm:$0xff]  }
0x2b76   :  { %v3488_v3 = vpop.xlane.xlu0 %3487 }
0x2b77   :  { %v3491_v46 = vmul.f32 1.442695, %v3489_v31  ;;  %v3490_v5 = vsub.f32 %v3480_v38, %v3488_v3 }
0x2b79   :  { %6942 = vpow2.f32 %v3491_v46  ;;  %v3493_v50 = vmul.f32 1.442695, %v3490_v5 }
0x2b7b   :  { %6944 = vpow2.f32 %v3493_v50 }
0x2b83   :  { %v6943_v7 = vpop.eup %6942 }
0x2b84   :  { %v3495_v53 = vsel %vm191_vm3, %v6943_v7, 0.0 }
0x2b85   :  { %v6945_v56 = vpop.eup %6944  ;;  %3496 = vadd.xlane.f32.xlu0 %v3495_v53 }
0x2b86   :  { %v3498_v58 = vsel %vm191_vm3, %v6945_v56, 0.0 }
0x2b87   :  { %3499 = vadd.xlane.f32.xlu1 %v3498_v58 }
0x2b9b   :  { %3506 = vrot.lane.b32.xlu0 %v7838_v9, %s7126_s0 }
0x2bb3   :  { %v3420_v61 = vpop.f32.mrb[108].mxu1 }
0x2bb4   :  { %v3427_v63 = vadd.f32 %v3420_v61, %v7932_v51  ;;  %v6502_v2 = vpop.f32.mrb[109].mxu1  ;;  %v5842_v51 = vld [vmem:[%s8455_s5 + $0x4c] sm:$0xf] }
0x2bb5   :  { %v3423_v27 = vpop.f32.mrb[110].mxu1 }
0x2bb6   :  { %v3428_v30 = vadd.f32 %v3423_v27, %v7934_v0  ;;  %v6503_v6 = vpop.f32.mrb[111].mxu1  ;;  %v3560_v0 = vsel %vm394_vm4, %v5842_v51, 0 }
0x2bb7   :  { %6517 = vmatpush3.bf16.msra.mxu0 %v3560_v0 }
0x2bb8   :  { %6530 = vmatprep.subr.bf16.mxu0 %v7115_v8 }
0x2c12   :  { %v3497_v11 = vpop.xlane.xlu0 %3496 }
0x2c13   :  { %6946 = vrcp.f32 %v3497_v11 }
0x2c14   :  { %v3500_v12 = vpop.xlane.xlu1 %3499 }
0x2c15   :  { %6948 = vrcp.f32 %v3500_v12 }
0x2c16   :  { %v3507_v13 = vpop.permute.xlu0 %3506 }
0x2c17   :  { %6511 = vmatpush3.bf16.msra.mxu1 %v3507_v13  ;;  %v6784_v13 = vld [vmem:[%s8454_s4 + $0x30] sm:$0xff]  }
0x2c18   :  { %6522 = vmatprep.subr.bf16.mxu1 %v7115_v8 }
0x2c1d   :  { %v6947_v14 = vpop.eup %6946 }
0x2c1e   :  { %v3503_v16 = vmul.f32 %v6947_v14, %v6943_v7  ;;  %v6785_v14 = vld [vmem:[%s8454_s4 + $0x38] sm:$0xff]  }
0x2c1f   :  { %v6949_v15 = vpop.eup %6948 }
0x2c20   :  { %v3504_v9 = vmul.f32 %v6949_v15, %v6945_v56 }
0x2c22   :  { %v3505_v17 = vpack.c.bf16 %v3504_v9, %v3503_v16 }
0x2c24   :  { %6513 = vmatmul.mubr.msk.bf16.vlgmr.msra.gmra.mrb[112].mxu1 %vm191_vm3, %v3505_v17 }
0x2c25   :  { %6526 = vmatprep.mubr.msk.bf16.mxu1 %vm7116_vm1, %v7115_v8  ;;  %6523 = vmatpush3.bf16.msra.mxu1 %v6778_v10 }
0x2c26   :  { %6524 = vmatprep.subr.bf16.mxu1 %v7115_v8 }
0x2cf7   :  { %v3546_v18 = vpop.f32.mrb[112].mxu1 }
0x2cf8   :  { %v6514_v19 = vpop.f32.mrb[113].mxu1 }
0x2cf9   :  { %v3549_v1 = vpop.f32.mrb[114].mxu1 }
0x2cfa   :  { %v3553_v41 = vpack.c.bf16 %v3549_v1, %v3546_v18  ;;  %v6515_v20 = vpop.f32.mrb[115].mxu1 }
0x2cfc   :  { %6519 = vmatmul.mubr.msk.bf16.vlgmr.msra.gmra.mrb[108].mxu0 %vm143_vm2, %v3553_v41  ;;  %v5867_v41 = vld [vmem:[%s8453_s3 + $0x7] ss:$0 sm:$0xff] }
0x2cfd   :  { %6538 = vmatprep.mubr.msk.bf16.mxu0 %vm7116_vm1, %v7115_v8 }
0x2dcf   :  { %v3596_v37 = vpop.f32.mrb[108].mxu0 }
0x2dd0   :  { %v3603_v59 = vadd.f32 %v3596_v37, %v3427_v63  ;;  %v6520_v4 = vpop.f32.mrb[109].mxu0 }
0x2dd1   :  { %v3599_v43 = vpop.f32.mrb[110].mxu0 }
0x2dd2   :  { %v3605_v39 = vadd.f32 %v3603_v59, %v7826_v55  ;;  %v3604_v21 = vadd.f32 %v3599_v43, %v3428_v30  ;;  %v6521_v22 = vpop.f32.mrb[111].mxu0  ;;  %v6779_v55 = vld [vmem:[%s8456_s6 + $0x28] sm:$0xff]  }
0x2dd3   :  { %6525 = vmatpush3.bf16.msra.mxu1 %v6779_v55 }
0x2dd4   :  { %v3606_v25 = vadd.f32 %v3604_v21, %v7831_v60  ;;  %v3607_v28 = vmul.f32 %v3605_v39, %v3605_v39  ;;  %6542 = vmatprep.subr.bf16.mxu1 %v7115_v8  ;;  %v6780_v60 = vld [vmem:[%s8457_s7 + $0x40] sm:$0xff]  }
0x2dd5   :  { %6531 = vmatpush3.bf16.msra.mxu0 %v6780_v60  ;;  %v7036_v60 = vld [vmem:[%s8452_s2 + $0x40] sm:$0xff] }
0x2dd6   :  { %v3609_v23 = vsel %vm51_vm0, %v3607_v28, 0.0  ;;  %v3608_v49 = vmul.f32 %v3606_v25, %v3606_v25  ;;  %6532 = vmatprep.subr.bf16.mxu0 %v7115_v8 }
0x2dd7   :  { %3610 = vadd.xlane.f32.xlu1 %v3609_v23 }
0x2dd8   :  { %v3612_v24 = vsel %vm51_vm0, %v3608_v49, 0.0 }
0x2dd9   :  { %6533 = vmatpush3.bf16.msra.mxu0 %v6781_v26 }
0x2dda   :  { %6534 = vmatprep.subr.bf16.mxu0 %v7115_v8 }
0x2ddb   :  { %3613 = vadd.xlane.f32.xlu1 %v3612_v24 }
0x2ddd   :  { %6535 = vmatpush3.bf16.msra.mxu0 %v6782_v44 }
0x2dde   :  { %6536 = vmatprep.subr.bf16.mxu0 %v7115_v8 }
0x2de1   :  { %6537 = vmatpush3.bf16.msra.mxu0 %v6783_v45 }
0x2de2   :  { %6556 = vmatprep.subr.bf16.mxu0 %v7115_v8 }
0x2e64   :  { %v3611_v52 = vpop.xlane.xlu1 %3610 }
0x2e65   :  { %v3615_v29 = vmul.f32 0.03125, %v3611_v52 }
0x2e67   :  { %v3617_v54 = vadd.f32 1e-06, %v3615_v29 }
0x2e68   :  { %v3614_v47 = vpop.xlane.xlu1 %3613 }
0x2e69   :  { %6950 = vrsqrt.f32 %v3617_v54  ;;  %v3616_v62 = vmul.f32 0.03125, %v3614_v47  ;;  %v7037_v54 = vld [vmem:[%s8452_s2 + $0x48] sm:$0xff] }
0x2e6b   :  { %v3618_v32 = vadd.f32 1e-06, %v3616_v62 }
0x2e6d   :  { %6952 = vrsqrt.f32 %v3618_v32 }
0x2e73   :  { %v6951_v57 = vpop.eup %6950 }
0x2e74   :  { %v3621_v33 = vmul.f32 %v6951_v57, %v3605_v39 }
0x2e76   :  { %v3631_v38 = vmul.f32 %v5845_v35, %v3621_v33 }
0x2e77   :  { %v6953_v34 = vpop.eup %6952 }
0x2e78   :  { %v3622_v36 = vmul.f32 %v6953_v34, %v3606_v25  ;;  %v7038_v34 = vld [vmem:[%s8452_s2 + $0x50] sm:$0xff] }
0x2e7a   :  { %v3632_v40 = vmul.f32 %v5845_v35, %v3622_v36 }
0x2e7c   :  { %v3638_v42 = vpack.c.bf16 %v3632_v40, %v3631_v38  ;;  %v7039_v40 = vld [vmem:[%s8452_s2 + $0x58] sm:$0xff] }
0x2e7e   :  { %6527 = vmatmul.mubr.msk.bf16.vlgmr.msra.gmra.mrb[116].mxu1 %vm51_vm0, %v3638_v42 }
0x2e7f   :  { %6546 = vmatprep.mubr.msk.bf16.mxu1 %vm7116_vm1, %v7115_v8  ;;  %6543 = vmatpush3.bf16.msra.mxu1 %v6784_v13 }
0x2e80   :  { %6544 = vmatprep.subr.bf16.mxu1 %v7115_v8 }
0x2e83   :  { %6545 = vmatpush3.bf16.msra.mxu1 %v6785_v14 }
0x2e84   :  { %6550 = vmatprep.subr.bf16.mxu1 %v7115_v8 }
0x2f51   :  { %v3688_v31 = vpop.f32.mrb[116].mxu1 }
0x2f52   :  { %v6528_v3 = vpop.f32.mrb[117].mxu1  ;;  %v3695_v5 = vmax.f32 %v3688_v31, 0.0 }
0x2f53   :  { %v3691_v46 = vpop.f32.mrb[118].mxu1 }
0x2f54   :  { %v3696_v50 = vmax.f32 %v3691_v46, 0.0  ;;  %v6529_v7 = vpop.f32.mrb[119].mxu1 }
0x2f56   :  { %v3706_v53 = vpack.c.bf16 %v3696_v50, %v3695_v5 }
0x2f58   :  { %6539 = vmatmul.mubr.msk.bf16.vlgmr.msra.gmra.mrb[112].mxu0 %vm962_vm5, %v3706_v53 }
0x2f59   :  { %6558 = vmatprep.mubr.msk.bf16.mxu0 %vm7116_vm1, %v7115_v8 }
0x302b   :  { %v3768_v56 = vpop.f32.mrb[112].mxu0 }
0x302c   :  { %v8032_v58 = vadd.f32 %v3768_v56, %v3605_v39  ;;  %v6540_v61 = vpop.f32.mrb[113].mxu0 }
0x302d   :  { %v3771_v63 = vpop.f32.mrb[114].mxu0 }
0x302e   :  { %v8034_v2 = vadd.f32 %v3771_v63, %v3606_v25  ;;  %v6541_v27 = vpop.f32.mrb[115].mxu0  ;;  %v3777_v30 = vmul.f32 %v8032_v58, %v8032_v58 }
0x3030   :  { %v3779_v6 = vsel %vm51_vm0, %v3777_v30, 0.0  ;;  %v3778_v11 = vmul.f32 %v8034_v2, %v8034_v2 }
0x3031   :  { %3780 = vadd.xlane.f32.xlu1 %v3779_v6 }
0x3032   :  { %v3782_v12 = vsel %vm51_vm0, %v3778_v11, 0.0 }
0x3035   :  { %3783 = vadd.xlane.f32.xlu1 %v3782_v12 }
0x30be   :  { %v3781_v15 = vpop.xlane.xlu1 %3780 }
0x30bf   :  { %v3785_v16 = vmul.f32 0.03125, %v3781_v15 }
0x30c1   :  { %v3787_v9 = vadd.f32 1e-06, %v3785_v16 }
0x30c2   :  { %v3784_v17 = vpop.xlane.xlu1 %3783 }
0x30c3   :  { %6954 = vrsqrt.f32 %v3787_v9  ;;  %v3786_v51 = vmul.f32 0.03125, %v3784_v17 }
0x30c5   :  { %v3788_v0 = vadd.f32 1e-06, %v3786_v51 }
0x30c7   :  { %6956 = vrsqrt.f32 %v3788_v0 }
0x30cd   :  { %v6955_v18 = vpop.eup %6954 }
0x30ce   :  { %v3791_v19 = vmul.f32 %v6955_v18, %v8032_v58 }
0x30d0   :  { %v3801_v37 = vmul.f32 %v5867_v41, %v3791_v19 }
0x30d1   :  { %v6957_v1 = vpop.eup %6956 }
0x30d2   :  { %v3792_v20 = vmul.f32 %v6957_v1, %v8034_v2 }
0x30d4   :  { %v3802_v59 = vmul.f32 %v5867_v41, %v3792_v20 }
0x30d6   :  { %v3808_v4 = vpack.c.bf16 %v3802_v59, %v3801_v37 }
0x30d8   :  { %6547 = vmatmul.mubr.msk.bf16.vlgmr.msra.gmra.mrb[120].mxu1 %vm51_vm0, %v3808_v4 }
0x30d9   :  { %6552 = vmatprep.mubr.msk.bf16.mxu1 %vm7116_vm1, %v7115_v8 }
0x31ab   :  { %v3858_v43 = vpop.f32.mrb[120].mxu1 }
0x31ac   :  { %v6548_v39 = vpop.f32.mrb[121].mxu1 }
0x31ad   :  { %v3861_v21 = vpop.f32.mrb[122].mxu1 }
0x31ae   :  { %v8058_v22 = vpack.c.bf16 %v3861_v21, %v3858_v43  ;;  %v6549_v25 = vpop.f32.mrb[123].mxu1 }
0x31b0   :  { %3991 = vrot.lane.b32.xlu0 %v8058_v22, %s7119_s21  ;;  %3867 = vrot.lane.b32.xlu1 %v8058_v22, %s7118_s20 }
0x31b4   :  { %3989 = vrot.lane.b32.xlu0 %v8058_v22, %s7117_s19 }
0x3222   :  { %v3868_v28 = vpop.permute.xlu1 %3867  ;;  %v3992_v49 = vpop.permute.xlu0 %3991 }
0x3223   :  { %v3873_v23 = vsel %vm143_vm2, %v3868_v28, 0  ;;  %v3997_v24 = vsel %vm143_vm2, %v3992_v49, 0  ;;  %v5877_v49 = vld [vmem:[%s8455_s5 + $0x30] sm:$0xf] }
0x3224   :  { %6551 = vmatpush3.bf16.xpose.msra.mxu1 %v3873_v23 }
0x3225   :  { %6562 = vmatprep.subr.bf16.mxu1 %v7115_v8 }
0x3226   :  { %v3990_v10 = vpop.permute.xlu0 %3989 }
0x322b   :  { %6553 = vmatmul.mubr.msk.bf16.vlgmr.msra.gmra.mrb[124].mxu1 %vm143_vm2, %v8058_v22 }
0x322c   :  { %6563 = vmatpush3.bf16.xpose.msra.mxu1 %v3997_v24  ;;  %6564 = vmatprep.mubr.msk.bf16.mxu1 %vm7116_vm1, %v7115_v8  ;;  %v4164_v24 = vsel %vm394_vm4, %v5877_v49, 0 }
0x322d   :  { %6574 = vmatprep.subr.bf16.mxu1 %v7115_v8 }
0x3233   :  { %6565 = vmatmul.mubr.msk.bf16.vlgmr.msra.gmra.mrb[128].mxu1 %vm143_vm2, %v3990_v10  ;;  %v5880_v10 = vld [vmem:[%s8455_s5 + $0x34] sm:$0xf] }
0x3234   :  { %6576 = vmatprep.mubr.msk.bf16.mxu1 %vm7116_vm1, %v7115_v8 }
0x32fe   :  { %v3909_v55 = vpop.f32.mrb[124].mxu1 }
0x32ff   :  { %v3910_v26 = vadd.f32 %v7036_v60, %v3909_v55  ;;  %v6554_v52 = vpop.f32.mrb[125].mxu1  ;;  %v4117_v55 = vsel %vm394_vm4, %v5880_v10, 0 }
0x3300   :  { %v3912_v29 = vpop.f32.mrb[126].mxu1  ;;  %6575 = vmatpush3.bf16.msra.mxu1 %v4117_v55 }
0x3301   :  { %v3913_v47 = vadd.f32 %v7037_v54, %v3912_v29  ;;  %v6555_v62 = vpop.f32.mrb[127].mxu1  ;;  %v3916_v32 = vsel %vm191_vm3, %v3910_v26, -inf  ;;  %6586 = vmatprep.subr.bf16.mxu1 %v7115_v8 }
0x3302   :  { %3917 = vmax.xlane.f32.xlu0 %v3916_v32 }
0x3303   :  { %v3919_v57 = vsel %vm191_vm3, %v3913_v47, -inf }
0x3304   :  { %3920 = vmax.xlane.f32.xlu1 %v3919_v57 }
0x3306   :  { %v4033_v33 = vpop.f32.mrb[128].mxu1 }
0x3307   :  { %v4034_v35 = vadd.f32 %v7038_v34, %v4033_v33  ;;  %v6566_v36 = vpop.f32.mrb[129].mxu1 }
0x3308   :  { %v4036_v38 = vpop.f32.mrb[130].mxu1 }
0x3309   :  { %v4037_v42 = vadd.f32 %v7039_v40, %v4036_v38  ;;  %v6567_v44 = vpop.f32.mrb[131].mxu1  ;;  %v4040_v45 = vsel %vm191_vm3, %v4034_v35, -inf }
0x330a   :  { %4041 = vmax.xlane.f32.xlu0 %v4040_v45 }
0x330b   :  { %v4043_v31 = vsel %vm191_vm3, %v4037_v42, -inf }
0x330e   :  { %4044 = vmax.xlane.f32.xlu0 %v4043_v31 }
0x338f   :  { %v3918_v3 = vpop.xlane.xlu0 %3917 }
0x3390   :  { %v3922_v46 = vsub.f32 %v3910_v26, %v3918_v3 }
0x3391   :  { %v3921_v5 = vpop.xlane.xlu1 %3920 }
0x3392   :  { %v3924_v50 = vmul.f32 1.442695, %v3922_v46  ;;  %v3923_v7 = vsub.f32 %v3913_v47, %v3921_v5 }
0x3394   :  { %6958 = vpow2.f32 %v3924_v50  ;;  %v3926_v53 = vmul.f32 1.442695, %v3923_v7 }
0x3396   :  { %6960 = vpow2.f32 %v3926_v53  ;;  %v7040_v53 = vld [vmem:[%s8452_s2 + $0x60] sm:$0xff] }
0x3397   :  { %v4042_v56 = vpop.xlane.xlu0 %4041 }
0x3398   :  { %v4046_v61 = vsub.f32 %v4034_v35, %v4042_v56 }
0x339a   :  { %v4048_v63 = vmul.f32 1.442695, %v4046_v61 }
0x339b   :  { %v4045_v27 = vpop.xlane.xlu0 %4044 }
0x339c   :  { %6962 = vpow2.f32 %v4048_v63  ;;  %v4047_v30 = vsub.f32 %v4037_v42, %v4045_v27  ;;  %v7041_v27 = vld [vmem:[%s8452_s2 + $0x68] sm:$0xff] }
0x339e   :  { %v6959_v6 = vpop.eup %6958  ;;  %v4050_v11 = vmul.f32 1.442695, %v4047_v30 }
0x339f   :  { %v3928_v12 = vsel %vm191_vm3, %v6959_v6, 0.0 }
0x33a0   :  { %v6961_v13 = vpop.eup %6960  ;;  %6964 = vpow2.f32 %v4050_v11  ;;  %3929 = vadd.xlane.f32.xlu0 %v3928_v12 }
0x33a1   :  { %v3931_v14 = vsel %vm191_vm3, %v6961_v13, 0.0 }
0x33a2   :  { %3932 = vadd.xlane.f32.xlu1 %v3931_v14 }
0x33a6   :  { %v6963_v15 = vpop.eup %6962 }
0x33a7   :  { %v4052_v16 = vsel %vm191_vm3, %v6963_v15, 0.0 }
0x33a8   :  { %4053 = vadd.xlane.f32.xlu0 %v4052_v16 }
0x33aa   :  { %v6965_v9 = vpop.eup %6964 }
0x33ab   :  { %v4055_v17 = vsel %vm191_vm3, %v6965_v9, 0.0 }
0x33ac   :  { %4056 = vadd.xlane.f32.xlu1 %v4055_v17 }
0x33bd   :  { %4063 = vrot.lane.b32.xlu1 %v8058_v22, %s7123_s14 }
0x33be   :  { %3939 = vrot.lane.b32.xlu0 %v8058_v22, %s7120_s29 }
0x33c1   :  { %4209 = vrot.lane.b32.xlu1 %v8058_v22, %s7121_s30 }
0x33c2   :  { %4207 = vrot.lane.b32.xlu0 %v8058_v22, %s7122_s13 }
0x342d   :  { %v3930_v51 = vpop.xlane.xlu0 %3929 }
0x342e   :  { %6966 = vrcp.f32 %v3930_v51 }
0x342f   :  { %v3933_v0 = vpop.xlane.xlu1 %3932 }
0x3430   :  { %6968 = vrcp.f32 %v3933_v0 }
0x3435   :  { %v4054_v18 = vpop.xlane.xlu0 %4053 }
0x3436   :  { %6970 = vrcp.f32 %v4054_v18 }
0x3438   :  { %v6967_v19 = vpop.eup %6966 }
0x3439   :  { %v4057_v1 = vpop.xlane.xlu1 %4056  ;;  %v3940_v41 = vpop.permute.xlu0 %3939  ;;  %v3936_v37 = vmul.f32 %v6967_v19, %v6959_v6 }
0x343a   :  { %v6969_v20 = vpop.eup %6968  ;;  %6972 = vrcp.f32 %v4057_v1  ;;  %6557 = vmatpush3.bf16.msra.mxu0 %v3940_v41 }
0x343b   :  { %v3937_v59 = vmul.f32 %v6969_v20, %v6961_v13  ;;  %6568 = vmatprep.subr.bf16.mxu0 %v7115_v8 }
0x343d   :  { %v4064_v4 = vpop.permute.xlu1 %4063  ;;  %v3938_v43 = vpack.c.bf16 %v3937_v59, %v3936_v37  ;;  %v4208_v36 = vpop.permute.xlu0 %4207 }
0x343f   :  { %6559 = vmatmul.mubr.msk.bf16.vlgmr.msra.gmra.mrb[116].mxu0 %vm191_vm3, %v3938_v43 }
0x3440   :  { %6569 = vmatpush3.bf16.msra.mxu0 %v4064_v4  ;;  %6570 = vmatprep.mubr.msk.bf16.mxu0 %vm7116_vm1, %v7115_v8  ;;  %v6971_v39 = vpop.eup %6970 }
0x3441   :  { %6580 = vmatprep.subr.bf16.mxu0 %v7115_v8  ;;  %v4060_v25 = vmul.f32 %v6971_v39, %v6963_v15  ;;  %v4210_v32 = vpop.permute.xlu1 %4209 }
0x3442   :  { %v4215_v35 = vsel %vm143_vm2, %v4210_v32, 0  ;;  %v7043_v32 = vld [vmem:[%s8452_s2 + $0x78] sm:$0xff] }
0x3444   :  { %v6973_v21 = vpop.eup %6972 }
0x3445   :  { %v4061_v28 = vmul.f32 %v6973_v21, %v6965_v9 }
0x3447   :  { %v4062_v23 = vpack.c.bf16 %v4061_v28, %v4060_v25 }
0x3449   :  { %6571 = vmatmul.mubr.msk.bf16.vlgmr.msra.gmra.mrb[120].mxu0 %vm191_vm3, %v4062_v23  ;;  %v5885_v23 = vld [vmem:[%s8455_s5 + $0x38] sm:$0xf] }
0x344a   :  { %6582 = vmatprep.mubr.msk.bf16.mxu0 %vm7116_vm1, %v7115_v8  ;;  %6581 = vmatpush3.bf16.msra.mxu0 %v4164_v24  ;;  %v4335_v49 = vsel %vm394_vm4, %v5885_v23, 0 }
0x344b   :  { %6592 = vmatprep.subr.bf16.mxu0 %v7115_v8 }
0x3512   :  { %v3979_v60 = vpop.f32.mrb[116].mxu0 }
0x3513   :  { %v6560_v26 = vpop.f32.mrb[117].mxu0 }
0x3514   :  { %v3982_v52 = vpop.f32.mrb[118].mxu0 }
0x3515   :  { %v3986_v29 = vpack.c.bf16 %v3982_v52, %v3979_v60  ;;  %v6561_v54 = vpop.f32.mrb[119].mxu0 }
0x3517   :  { %6583 = vmatmul.mubr.msk.bf16.vlgmr.msra.gmra.mrb[124].mxu0 %vm143_vm2, %v3986_v29  ;;  %v7042_v29 = vld [vmem:[%s8452_s2 + $0x70] sm:$0xff] }
0x3518   :  { %6594 = vmatprep.mubr.msk.bf16.mxu0 %vm7116_vm1, %v7115_v8 }
0x351c   :  { %v4103_v47 = vpop.f32.mrb[120].mxu0 }
0x351d   :  { %v6572_v62 = vpop.f32.mrb[121].mxu0 }
0x351e   :  { %v4106_v57 = vpop.f32.mrb[122].mxu0 }
0x351f   :  { %v4110_v33 = vpack.c.bf16 %v4106_v57, %v4103_v47  ;;  %v6573_v34 = vpop.f32.mrb[123].mxu0 }
0x3521   :  { %6577 = vmatmul.mubr.msk.bf16.vlgmr.msra.gmra.mrb[132].mxu1 %vm143_vm2, %v4110_v33 }
0x3522   :  { %6587 = vmatpush3.bf16.xpose.msra.mxu1 %v4215_v35  ;;  %6588 = vmatprep.mubr.msk.bf16.mxu1 %vm7116_vm1, %v7115_v8 }
0x3523   :  { %6598 = vmatprep.subr.bf16.mxu1 %v7115_v8 }
0x3529   :  { %6589 = vmatmul.mubr.msk.bf16.vlgmr.msra.gmra.mrb[136].mxu1 %vm143_vm2, %v4208_v36 }
0x352a   :  { %6600 = vmatprep.mubr.msk.bf16.mxu1 %vm7116_vm1, %v7115_v8  ;;  %6599 = vmatpush3.bf16.msra.mxu1 %v4335_v49 }
0x352b   :  { %6610 = vmatprep.subr.bf16.mxu1 %v7115_v8 }
0x35ea   :  { %v4200_v38 = vpop.f32.mrb[124].mxu0 }
0x35eb   :  { %v6584_v40 = vpop.f32.mrb[125].mxu0 }
0x35ec   :  { %v4203_v42 = vpop.f32.mrb[126].mxu0 }
0x35ed   :  { %v6585_v44 = vpop.f32.mrb[127].mxu0 }
0x35f4   :  { %v4153_v45 = vpop.f32.mrb[132].mxu1 }
0x35f5   :  { %v8134_v31 = vadd.f32 %v4200_v38, %v4153_v45  ;;  %v6578_v3 = vpop.f32.mrb[133].mxu1 }
0x35f6   :  { %v4156_v46 = vpop.f32.mrb[134].mxu1 }
0x35f7   :  { %v8136_v5 = vadd.f32 %v4203_v42, %v4156_v46  ;;  %v6579_v50 = vpop.f32.mrb[135].mxu1 }
0x35fc   :  { %v4251_v7 = vpop.f32.mrb[136].mxu1 }
0x35fd   :  { %v4252_v56 = vadd.f32 %v7040_v53, %v4251_v7  ;;  %v6590_v61 = vpop.f32.mrb[137].mxu1 }
0x35fe   :  { %v4254_v63 = vpop.f32.mrb[138].mxu1 }
0x35ff   :  { %v4255_v30 = vadd.f32 %v7041_v27, %v4254_v63  ;;  %v6591_v6 = vpop.f32.mrb[139].mxu1  ;;  %v4258_v11 = vsel %vm191_vm3, %v4252_v56, -inf }
0x3600   :  { %4259 = vmax.xlane.f32.xlu1 %v4258_v11 }
0x3601   :  { %v4261_v12 = vsel %vm191_vm3, %v4255_v30, -inf }
0x3602   :  { %4262 = vmax.xlane.f32.xlu0 %v4261_v12 }
0x368d   :  { %v4260_v13 = vpop.xlane.xlu1 %4259 }
0x368e   :  { %v4264_v14 = vsub.f32 %v4252_v56, %v4260_v13 }
0x368f   :  { %v4263_v15 = vpop.xlane.xlu0 %4262 }
0x3690   :  { %v4266_v16 = vmul.f32 1.442695, %v4264_v14  ;;  %v4265_v9 = vsub.f32 %v4255_v30, %v4263_v15 }
0x3692   :  { %6974 = vpow2.f32 %v4266_v16  ;;  %v4268_v17 = vmul.f32 1.442695, %v4265_v9 }
0x3694   :  { %6976 = vpow2.f32 %v4268_v17 }
0x369c   :  { %v6975_v51 = vpop.eup %6974 }
0x369d   :  { %v4270_v0 = vsel %vm191_vm3, %v6975_v51, 0.0 }
0x369e   :  { %v6977_v18 = vpop.eup %6976  ;;  %4271 = vadd.xlane.f32.xlu0 %v4270_v0  ;;  %v6786_v0 = vld [vmem:[%s8459_s9 + $0x10] sm:$0xff]  }
0x369f   :  { %v4273_v19 = vsel %vm191_vm3, %v6977_v18, 0.0 }
0x36a0   :  { %4274 = vadd.xlane.f32.xlu1 %v4273_v19 }
0x36b1   :  { %4382 = vrot.lane.b32.xlu1 %v8058_v22, %s7126_s0 }
0x36b4   :  { %4281 = vrot.lane.b32.xlu0 %v8058_v22, %s7124_s26 }
0x36b5   :  { %4380 = vrot.lane.b32.xlu1 %v8058_v22, %s7125_s27 }
0x372b   :  { %v4272_v1 = vpop.xlane.xlu0 %4271 }
0x372c   :  { %6978 = vrcp.f32 %v4272_v1  ;;  %v6787_v1 = vld [vmem:[%s8459_s9 + $0x18] sm:$0xff]  }
0x372d   :  { %v4275_v41 = vpop.xlane.xlu1 %4274 }
0x372e   :  { %6980 = vrcp.f32 %v4275_v41 }
0x372f   :  { %v4282_v20 = vpop.permute.xlu0 %4281 }
0x3730   :  { %6593 = vmatpush3.bf16.msra.mxu0 %v4282_v20 }
0x3731   :  { %6604 = vmatprep.subr.bf16.mxu0 %v7115_v8  ;;  %v4383_v39 = vpop.permute.xlu1 %4382 }
0x3732   :  { %v4388_v25 = vsel %vm143_vm2, %v4383_v39, 0 }
0x3735   :  { %v4381_v28 = vpop.permute.xlu1 %4380 }
0x3736   :  { %v6979_v37 = vpop.eup %6978 }
0x3737   :  { %v4278_v4 = vmul.f32 %v6979_v37, %v6975_v51 }
0x3738   :  { %v6981_v59 = vpop.eup %6980 }
0x3739   :  { %v4279_v43 = vmul.f32 %v6981_v59, %v6977_v18 }
0x373b   :  { %v4280_v21 = vpack.c.bf16 %v4279_v43, %v4278_v4 }
0x373d   :  { %6595 = vmatmul.mubr.msk.bf16.vlgmr.msra.gmra.mrb[128].mxu0 %vm191_vm3, %v4280_v21 }
0x373e   :  { %6605 = vmatpush3.bf16.xpose.msra.mxu0 %v4388_v25  ;;  %6606 = vmatprep.mubr.msk.bf16.mxu0 %vm7116_vm1, %v7115_v8 }
0x373f   :  { %6616 = vmatprep.subr.bf16.mxu0 %v7115_v8 }
0x3745   :  { %6607 = vmatmul.mubr.msk.bf16.vlgmr.msra.gmra.mrb[132].mxu0 %vm143_vm2, %v4381_v28 }
0x3746   :  { %6618 = vmatprep.mubr.msk.bf16.mxu0 %vm7116_vm1, %v7115_v8 }
0x3810   :  { %v4321_v24 = vpop.f32.mrb[128].mxu0 }
0x3811   :  { %v6596_v10 = vpop.f32.mrb[129].mxu0 }
0x3812   :  { %v4324_v55 = vpop.f32.mrb[130].mxu0 }
0x3813   :  { %v4328_v60 = vpack.c.bf16 %v4324_v55, %v4321_v24  ;;  %v6597_v26 = vpop.f32.mrb[131].mxu0 }
0x3815   :  { %6601 = vmatmul.mubr.msk.bf16.vlgmr.msra.gmra.mrb[140].mxu1 %vm143_vm2, %v4328_v60  ;;  %v6789_v60 = vld [vmem:[%s8458_s8 + $0x18] sm:$0xff]  }
0x3816   :  { %6612 = vmatprep.mubr.msk.bf16.mxu1 %vm7116_vm1, %v7115_v8 }
0x3818   :  { %v4424_v52 = vpop.f32.mrb[132].mxu0 }
0x3819   :  { %v4425_v54 = vadd.f32 %v7042_v29, %v4424_v52  ;;  %v6608_v47 = vpop.f32.mrb[133].mxu0 }
0x381a   :  { %v4427_v62 = vpop.f32.mrb[134].mxu0 }
0x381b   :  { %v4428_v57 = vadd.f32 %v7043_v32, %v4427_v62  ;;  %v6609_v33 = vpop.f32.mrb[135].mxu0  ;;  %v4431_v34 = vsel %vm191_vm3, %v4425_v54, -inf }
0x381c   :  { %4432 = vmax.xlane.f32.xlu0 %v4431_v34  ;;  %v5892_v34 = vld [vmem:[%s8453_s3 + $0x8] ss:$0 sm:$0xff] }
0x381d   :  { %v4434_v35 = vsel %vm191_vm3, %v4428_v57, -inf }
0x381e   :  { %4435 = vmax.xlane.f32.xlu1 %v4434_v35 }
0x382f   :  { %4454 = vrot.lane.b32.xlu1 %v8058_v22, %s7127_s23 }
0x38a9   :  { %v4433_v36 = vpop.xlane.xlu0 %4432 }
0x38aa   :  { %v4437_v38 = vsub.f32 %v4425_v54, %v4433_v36 }
0x38ab   :  { %v4436_v40 = vpop.xlane.xlu1 %4435 }
0x38ac   :  { %v4439_v42 = vmul.f32 1.442695, %v4437_v38  ;;  %v4438_v44 = vsub.f32 %v4428_v57, %v4436_v40 }
0x38ae   :  { %6982 = vpow2.f32 %v4439_v42  ;;  %v4441_v45 = vmul.f32 1.442695, %v4438_v44 }
0x38af   :  { %v4455_v3 = vpop.permute.xlu1 %4454 }
0x38b0   :  { %6984 = vpow2.f32 %v4441_v45  ;;  %6611 = vmatpush3.bf16.msra.mxu1 %v4455_v3 }
0x38b1   :  { %6622 = vmatprep.subr.bf16.mxu1 %v7115_v8 }
0x38b8   :  { %v6983_v46 = vpop.eup %6982 }
0x38b9   :  { %v4443_v50 = vsel %vm191_vm3, %v6983_v46, 0.0 }
0x38ba   :  { %v6985_v7 = vpop.eup %6984  ;;  %4444 = vadd.xlane.f32.xlu0 %v4443_v50 }
0x38bb   :  { %v4446_v53 = vsel %vm191_vm3, %v6985_v7, 0.0 }
0x38be   :  { %4447 = vadd.xlane.f32.xlu0 %v4446_v53 }
0x38e8   :  { %v4371_v22 = vpop.f32.mrb[140].mxu1 }
0x38e9   :  { %v4378_v56 = vadd.f32 %v4371_v22, %v8134_v31  ;;  %v6602_v61 = vpop.f32.mrb[141].mxu1  ;;  %v5889_v31 = vld [vmem:[%s8455_s5 + $0x3c] sm:$0xf] }
0x38ea   :  { %v4374_v63 = vpop.f32.mrb[142].mxu1  ;;  %v7044_v61 = vld [vmem:[%s8452_s2 + $0x80] sm:$0xff] }
0x38eb   :  { %v4379_v27 = vadd.f32 %v4374_v63, %v8136_v5  ;;  %v6603_v30 = vpop.f32.mrb[143].mxu1  ;;  %v4508_v5 = vsel %vm394_vm4, %v5889_v31, 0 }
0x38ec   :  { %6617 = vmatpush3.bf16.msra.mxu0 %v4508_v5 }
0x38ed   :  { %6630 = vmatprep.subr.bf16.mxu0 %v7115_v8 }
0x3947   :  { %v4445_v6 = vpop.xlane.xlu0 %4444 }
0x3948   :  { %6986 = vrcp.f32 %v4445_v6  ;;  %v7045_v6 = vld [vmem:[%s8452_s2 + $0x88] sm:$0xff] }
0x394b   :  { %v4448_v11 = vpop.xlane.xlu0 %4447 }
0x394c   :  { %6988 = vrcp.f32 %v4448_v11 }
0x3952   :  { %v6987_v12 = vpop.eup %6986 }
0x3953   :  { %v4451_v14 = vmul.f32 %v6987_v12, %v6983_v46 }
0x3956   :  { %v6989_v13 = vpop.eup %6988 }
0x3957   :  { %v4452_v15 = vmul.f32 %v6989_v13, %v6985_v7 }
0x3959   :  { %v4453_v16 = vpack.c.bf16 %v4452_v15, %v4451_v14 }
0x395b   :  { %6613 = vmatmul.mubr.msk.bf16.vlgmr.msra.gmra.mrb[144].mxu1 %vm191_vm3, %v4453_v16  ;;  %v7046_v16 = vld [vmem:[%s8452_s2 + $0x90] sm:$0xff] }
0x395c   :  { %6626 = vmatprep.mubr.msk.bf16.mxu1 %vm7116_vm1, %v7115_v8 }
0x3a2e   :  { %v4494_v9 = vpop.f32.mrb[144].mxu1 }
0x3a2f   :  { %v6614_v17 = vpop.f32.mrb[145].mxu1 }
0x3a30   :  { %v4497_v51 = vpop.f32.mrb[146].mxu1  ;;  %v7047_v17 = vld [vmem:[%s8452_s2 + $0x98] sm:$0xff] }
0x3a31   :  { %v4501_v18 = vpack.c.bf16 %v4497_v51, %v4494_v9  ;;  %v6615_v19 = vpop.f32.mrb[147].mxu1 }
0x3a33   :  { %6619 = vmatmul.mubr.msk.bf16.vlgmr.msra.gmra.mrb[136].mxu0 %vm143_vm2, %v4501_v18 }
0x3a34   :  { %6631 = vmatpush3.bf16.msra.mxu0 %v6786_v0  ;;  %6634 = vmatprep.mubr.msk.bf16.mxu0 %vm7116_vm1, %v7115_v8 }
0x3a35   :  { %6632 = vmatprep.subr.bf16.mxu0 %v7115_v8 }
0x3a38   :  { %6633 = vmatpush3.bf16.msra.mxu0 %v6787_v1 }
0x3a39   :  { %6644 = vmatprep.subr.bf16.mxu0 %v7115_v8 }
0x3a3b   :  { %6635 = vmatmul.mubr.msk.bf16.vlgmr.msra.gmra.mrb[140].mxu0 %vm51_vm0, %v7816_v48 }
0x3a3c   :  { %6646 = vmatprep.mubr.msk.bf16.mxu0 %vm7116_vm1, %v7115_v8 }
0x3b06   :  { %v4544_v41 = vpop.f32.mrb[136].mxu0 }
0x3b07   :  { %v4551_v20 = vadd.f32 %v4544_v41, %v4378_v56  ;;  %v6620_v37 = vpop.f32.mrb[137].mxu0 }
0x3b08   :  { %v4547_v59 = vpop.f32.mrb[138].mxu0 }
0x3b09   :  { %v8210_v4 = vadd.f32 %v4551_v20, %v8032_v58  ;;  %v4552_v43 = vadd.f32 %v4547_v59, %v4379_v27  ;;  %v6621_v39 = vpop.f32.mrb[139].mxu0 }
0x3b0b   :  { %v8213_v21 = vadd.f32 %v4552_v43, %v8034_v2  ;;  %v4555_v25 = vmul.f32 %v8210_v4, %v8210_v4  ;;  %v6788_v2 = vld [vmem:[%s8458_s8 + $0x10] sm:$0xff]  }
0x3b0c   :  { %6623 = vmatpush3.bf16.msra.mxu1 %v6788_v2 }
0x3b0d   :  { %v4557_v48 = vsel %vm51_vm0, %v4555_v25, 0.0  ;;  %v4556_v28 = vmul.f32 %v8213_v21, %v8213_v21  ;;  %6624 = vmatprep.subr.bf16.mxu1 %v7115_v8 }
0x3b0e   :  { %4558 = vadd.xlane.f32.xlu0 %v4557_v48  ;;  %v4694_v23 = vpop.f32.mrb[140].mxu0 }
0x3b0f   :  { %v6636_v49 = vpop.f32.mrb[141].mxu0  ;;  %v4560_v55 = vsel %vm51_vm0, %v4556_v28, 0.0 }
0x3b10   :  { %v4697_v24 = vpop.f32.mrb[142].mxu0  ;;  %6625 = vmatpush3.bf16.msra.mxu1 %v6789_v60 }
0x3b11   :  { %v8220_v10 = vpack.c.bf16 %v4697_v24, %v4694_v23  ;;  %v6637_v58 = vpop.f32.mrb[143].mxu0  ;;  %6638 = vmatprep.subr.bf16.mxu1 %v7115_v8 }
0x3b12   :  { %4561 = vadd.xlane.f32.xlu0 %v4560_v55 }
0x3b13   :  { %v4707_v42 = vsel %vm143_vm2, %v8220_v10, 0 }
0x3b28   :  { %4827 = vrot.lane.b32.xlu0 %v8220_v10, %s7117_s19 }
0x3b9b   :  { %v4559_v26 = vpop.xlane.xlu0 %4558 }
0x3b9c   :  { %v4563_v52 = vmul.f32 0.03125, %v4559_v26 }
0x3b9e   :  { %v4565_v29 = vadd.f32 1e-06, %v4563_v52 }
0x3b9f   :  { %v4562_v54 = vpop.xlane.xlu0 %4561 }
0x3ba0   :  { %6990 = vrsqrt.f32 %v4565_v29  ;;  %v4564_v47 = vmul.f32 0.03125, %v4562_v54 }
0x3ba2   :  { %v4566_v62 = vadd.f32 1e-06, %v4564_v47 }
0x3ba3   :  { %v4828_v3 = vpop.permute.xlu0 %4827 }
0x3ba4   :  { %6992 = vrsqrt.f32 %v4566_v62  ;;  %v4833_v53 = vsel %vm143_vm2, %v4828_v3, 0 }
0x3baa   :  { %v6991_v32 = vpop.eup %6990 }
0x3bab   :  { %v4569_v57 = vmul.f32 %v6991_v32, %v8210_v4 }
0x3bad   :  { %v4579_v36 = vmul.f32 %v5892_v34, %v4569_v57 }
0x3bae   :  { %v6993_v33 = vpop.eup %6992 }
0x3baf   :  { %v4570_v35 = vmul.f32 %v6993_v33, %v8213_v21 }
0x3bb1   :  { %v4580_v38 = vmul.f32 %v5892_v34, %v4570_v35 }
0x3bb3   :  { %v4586_v40 = vpack.c.bf16 %v4580_v38, %v4579_v36 }
0x3bb5   :  { %6627 = vmatmul.mubr.msk.bf16.vlgmr.msra.gmra.mrb[148].mxu1 %vm51_vm0, %v4586_v40 }
0x3bb6   :  { %6639 = vmatpush3.bf16.xpose.msra.mxu1 %v4707_v42  ;;  %6640 = vmatprep.mubr.msk.bf16.mxu1 %vm7116_vm1, %v7115_v8 }
0x3bb7   :  { %6650 = vmatprep.subr.bf16.mxu1 %v7115_v8 }
0x3c88   :  { %v4636_v44 = vpop.f32.mrb[148].mxu1 }
0x3c89   :  { %v6628_v45 = vpop.f32.mrb[149].mxu1 }
0x3c8a   :  { %v4639_v46 = vpop.f32.mrb[150].mxu1 }
0x3c8b   :  { %v8244_v50 = vpack.c.bf16 %v4639_v46, %v4636_v44  ;;  %v6629_v7 = vpop.f32.mrb[151].mxu1 }
0x3c8c   :  { %v5909_v7 = vld [vmem:[%s8455_s5 + $0x50] sm:$0xf] }
0x3c8d   :  { %4825 = vrot.lane.b32.xlu1 %v8244_v50, %s7117_s19  ;;  %6641 = vmatmul.mubr.msk.bf16.vlgmr.msra.gmra.mrb[152].mxu1 %vm143_vm2, %v8244_v50 }
0x3c8e   :  { %6651 = vmatpush3.bf16.xpose.msra.mxu1 %v4833_v53  ;;  %6652 = vmatprep.mubr.msk.bf16.mxu1 %vm7116_vm1, %v7115_v8  ;;  %v5000_v53 = vsel %vm394_vm4, %v5909_v7, 0 }
0x3c8f   :  { %6662 = vmatprep.subr.bf16.mxu1 %v7115_v8 }
0x3cff   :  { %v4826_v22 = vpop.permute.xlu1 %4825 }
0x3d00   :  { %6653 = vmatmul.mubr.msk.bf16.vlgmr.msra.gmra.mrb[156].mxu1 %vm143_vm2, %v4826_v22  ;;  %v5912_v22 = vld [vmem:[%s8455_s5 + $0x54] sm:$0xf] }
0x3d01   :  { %6664 = vmatprep.mubr.msk.bf16.mxu1 %vm7116_vm1, %v7115_v8 }
0x3d60   :  { %v4743_v56 = vpop.f32.mrb[152].mxu1 }
0x3d61   :  { %v4744_v63 = vadd.f32 %v7044_v61, %v4743_v56  ;;  %v6642_v27 = vpop.f32.mrb[153].mxu1  ;;  %v4953_v56 = vsel %vm394_vm4, %v5912_v22, 0 }
0x3d62   :  { %v4746_v30 = vpop.f32.mrb[154].mxu1  ;;  %6663 = vmatpush3.bf16.msra.mxu1 %v4953_v56 }
0x3d63   :  { %v4747_v11 = vadd.f32 %v7045_v6, %v4746_v30  ;;  %v6643_v12 = vpop.f32.mrb[155].mxu1  ;;  %v4750_v13 = vsel %vm191_vm3, %v4744_v63, -inf  ;;  %6674 = vmatprep.subr.bf16.mxu1 %v7115_v8 }
0x3d64   :  { %4751 = vmax.xlane.f32.xlu1 %v4750_v13 }
0x3d65   :  { %v4753_v14 = vsel %vm191_vm3, %v4747_v11, -inf }
0x3d66   :  { %4754 = vmax.xlane.f32.xlu0 %v4753_v14 }
0x3dd3   :  { %v4869_v15 = vpop.f32.mrb[156].mxu1 }
0x3dd4   :  { %v4870_v31 = vadd.f32 %v7046_v16, %v4869_v15  ;;  %v6654_v5 = vpop.f32.mrb[157].mxu1 }
0x3dd5   :  { %v4872_v9 = vpop.f32.mrb[158].mxu1 }
0x3dd6   :  { %v4873_v51 = vadd.f32 %v7047_v17, %v4872_v9  ;;  %v6655_v0 = vpop.f32.mrb[159].mxu1  ;;  %v4876_v18 = vsel %vm191_vm3, %v4870_v31, -inf }
0x3dd7   :  { %4877 = vmax.xlane.f32.xlu1 %v4876_v18 }
0x3dd8   :  { %v4879_v19 = vsel %vm191_vm3, %v4873_v51, -inf }
0x3ddb   :  { %4880 = vmax.xlane.f32.xlu1 %v4879_v19 }
0x3df1   :  { %v4752_v1 = vpop.xlane.xlu1 %4751 }
0x3df2   :  { %v4756_v41 = vsub.f32 %v4744_v63, %v4752_v1 }
0x3df3   :  { %v4755_v20 = vpop.xlane.xlu0 %4754 }
0x3df4   :  { %v4758_v37 = vmul.f32 1.442695, %v4756_v41  ;;  %v4757_v59 = vsub.f32 %v4747_v11, %v4755_v20 }
0x3df6   :  { %6994 = vpow2.f32 %v4758_v37  ;;  %v4760_v43 = vmul.f32 1.442695, %v4757_v59 }
0x3df8   :  { %6996 = vpow2.f32 %v4760_v43  ;;  %v7048_v43 = vld [vmem:[%s8452_s2 + $0xa0] sm:$0xff] }
0x3e00   :  { %v6995_v39 = vpop.eup %6994 }
0x3e01   :  { %v4762_v25 = vsel %vm191_vm3, %v6995_v39, 0.0 }
0x3e02   :  { %v6997_v48 = vpop.eup %6996  ;;  %4763 = vadd.xlane.f32.xlu0 %v4762_v25 }
0x3e03   :  { %v4765_v28 = vsel %vm191_vm3, %v6997_v48, 0.0 }
0x3e04   :  { %4766 = vadd.xlane.f32.xlu1 %v4765_v28  ;;  %v7049_v28 = vld [vmem:[%s8452_s2 + $0xa8] sm:$0xff] }
0x3e64   :  { %v4878_v23 = vpop.xlane.xlu1 %4877 }
0x3e65   :  { %v4882_v49 = vsub.f32 %v4870_v31, %v4878_v23 }
0x3e67   :  { %v4884_v24 = vmul.f32 1.442695, %v4882_v49 }
0x3e68   :  { %v4881_v58 = vpop.xlane.xlu1 %4880 }
0x3e69   :  { %6998 = vpow2.f32 %v4884_v24  ;;  %v4883_v55 = vsub.f32 %v4873_v51, %v4881_v58 }
0x3e6b   :  { %v4886_v2 = vmul.f32 1.442695, %v4883_v55 }
0x3e6d   :  { %7000 = vpow2.f32 %v4886_v2 }
0x3e73   :  { %v6999_v60 = vpop.eup %6998 }
0x3e74   :  { %v4888_v26 = vsel %vm191_vm3, %v6999_v60, 0.0 }
0x3e75   :  { %4889 = vadd.xlane.f32.xlu0 %v4888_v26 }
0x3e77   :  { %v7001_v52 = vpop.eup %7000 }
0x3e78   :  { %v4891_v29 = vsel %vm191_vm3, %v7001_v52, 0.0 }
0x3e79   :  { %4892 = vadd.xlane.f32.xlu1 %v4891_v29 }
0x3e8a   :  { %4899 = vrot.lane.b32.xlu1 %v8220_v10, %s7119_s21 }
0x3e8b   :  { %4774 = vrot.lane.b32.xlu0 %v8220_v10, %s7118_s20 }
0x3e8e   :  { %5045 = vrot.lane.b32.xlu1 %v8220_v10, %s7122_s13 }
0x3e8f   :  { %5043 = vrot.lane.b32.xlu0 %v8244_v50, %s7122_s13  ;;  %v4764_v47 = vpop.xlane.xlu0 %4763 }
0x3e91   :  { %v4767_v54 = vpop.xlane.xlu1 %4766 }
0x3e92   :  { %7002 = vrcp.f32 %v4767_v54 }
0x3e93   :  { %7004 = vrcp.f32 %v4764_v47 }
0x3e9c   :  { %v7003_v62 = vpop.eup %7002 }
0x3e9d   :  { %v7005_v57 = vpop.eup %7004  ;;  %v4771_v33 = vmul.f32 %v7003_v62, %v6997_v48 }
0x3e9e   :  { %v4770_v34 = vmul.f32 %v7005_v57, %v6995_v39 }
0x3ea0   :  { %v4772_v38 = vpack.c.bf16 %v4771_v33, %v4770_v34 }
0x3f02   :  { %v4890_v32 = vpop.xlane.xlu0 %4889 }
0x3f03   :  { %7006 = vrcp.f32 %v4890_v32 }
0x3f06   :  { %v4775_v35 = vpop.permute.xlu0 %4774  ;;  %v4893_v36 = vpop.xlane.xlu1 %4892 }
0x3f07   :  { %7008 = vrcp.f32 %v4893_v36  ;;  %6645 = vmatpush3.bf16.msra.mxu0 %v4775_v35 }
0x3f08   :  { %6656 = vmatprep.subr.bf16.mxu0 %v7115_v8 }
0x3f0a   :  { %6647 = vmatmul.mubr.msk.bf16.vlgmr.msra.gmra.mrb[144].mxu0 %vm191_vm3, %v4772_v38  ;;  %v4900_v40 = vpop.permute.xlu1 %4899  ;;  %v5044_v5 = vpop.permute.xlu0 %5043 }
0x3f0b   :  { %6657 = vmatpush3.bf16.msra.mxu0 %v4900_v40  ;;  %6658 = vmatprep.mubr.msk.bf16.mxu0 %vm7116_vm1, %v7115_v8 }
0x3f0c   :  { %6668 = vmatprep.subr.bf16.mxu0 %v7115_v8 }
0x3f0d   :  { %v7007_v42 = vpop.eup %7006 }
0x3f0e   :  { %v4896_v45 = vmul.f32 %v7007_v42, %v6999_v60  ;;  %v5046_v13 = vpop.permute.xlu1 %5045 }
0x3f0f   :  { %v5051_v31 = vsel %vm143_vm2, %v5046_v13, 0 }
0x3f11   :  { %v7009_v44 = vpop.eup %7008 }
0x3f12   :  { %v4897_v3 = vmul.f32 %v7009_v44, %v7001_v52 }
0x3f14   :  { %v4898_v46 = vpack.c.bf16 %v4897_v3, %v4896_v45  ;;  %v5917_v3 = vld [vmem:[%s8455_s5 + $0x58] sm:$0xf] }
0x3f16   :  { %6659 = vmatmul.mubr.msk.bf16.vlgmr.msra.gmra.mrb[148].mxu0 %vm191_vm3, %v4898_v46  ;;  %v5171_v46 = vsel %vm394_vm4, %v5917_v3, 0  ;;  %v6793_v3 = vld [vmem:[%s8457_s7 + $0x68] sm:$0xff]  }
0x3f17   :  { %6670 = vmatprep.mubr.msk.bf16.mxu0 %vm7116_vm1, %v7115_v8  ;;  %6669 = vmatpush3.bf16.msra.mxu0 %v5000_v53 }
0x3f18   :  { %6680 = vmatprep.subr.bf16.mxu0 %v7115_v8 }
0x3fdd   :  { %v4814_v61 = vpop.f32.mrb[144].mxu0 }
0x3fde   :  { %v6648_v63 = vpop.f32.mrb[145].mxu0 }
0x3fdf   :  { %v4817_v27 = vpop.f32.mrb[146].mxu0 }
0x3fe0   :  { %v4821_v30 = vpack.c.bf16 %v4817_v27, %v4814_v61  ;;  %v6649_v6 = vpop.f32.mrb[147].mxu0  ;;  %v7050_v27 = vld [vmem:[%s8452_s2 + $0xb0] sm:$0xff] }
0x3fe2   :  { %6671 = vmatmul.mubr.msk.bf16.vlgmr.msra.gmra.mrb[152].mxu0 %vm143_vm2, %v4821_v30 }
0x3fe3   :  { %6682 = vmatprep.mubr.msk.bf16.mxu0 %vm7116_vm1, %v7115_v8 }
0x3fe9   :  { %v4939_v11 = vpop.f32.mrb[148].mxu0 }
0x3fea   :  { %v6660_v12 = vpop.f32.mrb[149].mxu0 }
0x3feb   :  { %v4942_v14 = vpop.f32.mrb[150].mxu0  ;;  %v7051_v12 = vld [vmem:[%s8452_s2 + $0xb8] sm:$0xff] }
0x3fec   :  { %v4946_v15 = vpack.c.bf16 %v4942_v14, %v4939_v11  ;;  %v6661_v16 = vpop.f32.mrb[151].mxu0 }
0x3fee   :  { %6665 = vmatmul.mubr.msk.bf16.vlgmr.msra.gmra.mrb[160].mxu1 %vm143_vm2, %v4946_v15 }
0x3fef   :  { %6675 = vmatpush3.bf16.xpose.msra.mxu1 %v5051_v31  ;;  %6676 = vmatprep.mubr.msk.bf16.mxu1 %vm7116_vm1, %v7115_v8 }
0x3ff0   :  { %6686 = vmatprep.subr.bf16.mxu1 %v7115_v8 }
0x3ff6   :  { %6677 = vmatmul.mubr.msk.bf16.vlgmr.msra.gmra.mrb[164].mxu1 %vm143_vm2, %v5044_v5 }
0x3ff7   :  { %6688 = vmatprep.mubr.msk.bf16.mxu1 %vm7116_vm1, %v7115_v8  ;;  %6687 = vmatpush3.bf16.msra.mxu1 %v5171_v46 }
0x3ff8   :  { %6698 = vmatprep.subr.bf16.mxu1 %v7115_v8 }
0x40b5   :  { %v5036_v9 = vpop.f32.mrb[152].mxu0 }
0x40b6   :  { %v6672_v17 = vpop.f32.mrb[153].mxu0 }
0x40b7   :  { %v5039_v51 = vpop.f32.mrb[154].mxu0 }
0x40b8   :  { %v6673_v0 = vpop.f32.mrb[155].mxu0 }
0x40c1   :  { %v4989_v18 = vpop.f32.mrb[160].mxu1 }
0x40c2   :  { %v8314_v19 = vadd.f32 %v5036_v9, %v4989_v18  ;;  %v6666_v1 = vpop.f32.mrb[161].mxu1 }
0x40c3   :  { %v4992_v41 = vpop.f32.mrb[162].mxu1 }
0x40c4   :  { %v8316_v20 = vadd.f32 %v5039_v51, %v4992_v41  ;;  %v6667_v37 = vpop.f32.mrb[163].mxu1 }
0x40c9   :  { %v5087_v59 = vpop.f32.mrb[164].mxu1 }
0x40ca   :  { %v5088_v39 = vadd.f32 %v7048_v43, %v5087_v59  ;;  %v6678_v25 = vpop.f32.mrb[165].mxu1 }
0x40cb   :  { %v5090_v48 = vpop.f32.mrb[166].mxu1 }
0x40cc   :  { %v5091_v23 = vadd.f32 %v7049_v28, %v5090_v48  ;;  %v6679_v49 = vpop.f32.mrb[167].mxu1  ;;  %v5094_v24 = vsel %vm191_vm3, %v5088_v39, -inf }
0x40cd   :  { %5095 = vmax.xlane.f32.xlu1 %v5094_v24 }
0x40ce   :  { %v5097_v58 = vsel %vm191_vm3, %v5091_v23, -inf }
0x40cf   :  { %5098 = vmax.xlane.f32.xlu0 %v5097_v58 }
0x415a   :  { %v5096_v55 = vpop.xlane.xlu1 %5095 }
0x415b   :  { %v5100_v2 = vsub.f32 %v5088_v39, %v5096_v55 }
0x415c   :  { %v5099_v60 = vpop.xlane.xlu0 %5098 }
0x415d   :  { %v5102_v26 = vmul.f32 1.442695, %v5100_v2  ;;  %v5101_v52 = vsub.f32 %v5091_v23, %v5099_v60 }
0x415f   :  { %7010 = vpow2.f32 %v5102_v26  ;;  %v5104_v29 = vmul.f32 1.442695, %v5101_v52 }
0x4161   :  { %7012 = vpow2.f32 %v5104_v29 }
0x4169   :  { %v7011_v54 = vpop.eup %7010 }
0x416a   :  { %v5106_v47 = vsel %vm191_vm3, %v7011_v54, 0.0 }
0x416b   :  { %v7013_v62 = vpop.eup %7012  ;;  %5107 = vadd.xlane.f32.xlu0 %v5106_v47 }
0x416c   :  { %v5109_v32 = vsel %vm191_vm3, %v7013_v62, 0.0 }
0x416d   :  { %5110 = vadd.xlane.f32.xlu1 %v5109_v32 }
0x417e   :  { %5218 = vrot.lane.b32.xlu1 %v8220_v10, %s7125_s27 }
0x4181   :  { %5117 = vrot.lane.b32.xlu0 %v8220_v10, %s7121_s30 }
0x4182   :  { %5216 = vrot.lane.b32.xlu1 %v8244_v50, %s7125_s27  ;;  %s5590_s27 = sld [smem:[#allocation3]] }
0x4188   :  { %s5591_s26 = scalar_lea.vmem [#allocation6], %s5590_s27 }
0x41f8   :  { %v5108_v57 = vpop.xlane.xlu0 %5107 }
0x41f9   :  { %7014 = vrcp.f32 %v5108_v57 }
0x41fa   :  { %v5111_v33 = vpop.xlane.xlu1 %5110 }
0x41fb   :  { %7016 = vrcp.f32 %v5111_v33 }
0x41fc   :  { %v5118_v34 = vpop.permute.xlu0 %5117 }
0x41fd   :  { %6681 = vmatpush3.bf16.msra.mxu0 %v5118_v34 }
0x41fe   :  { %6692 = vmatprep.subr.bf16.mxu0 %v7115_v8  ;;  %v5219_v42 = vpop.permute.xlu1 %5218 }
0x41ff   :  { %v5224_v45 = vsel %vm143_vm2, %v5219_v42, 0 }
0x4202   :  { %v5217_v50 = vpop.permute.xlu1 %5216 }
0x4203   :  { %v7015_v35 = vpop.eup %7014 }
0x4204   :  { %v5114_v38 = vmul.f32 %v7015_v35, %v7011_v54 }
0x4205   :  { %v7017_v36 = vpop.eup %7016 }
0x4206   :  { %v5115_v40 = vmul.f32 %v7017_v36, %v7013_v62 }
0x4208   :  { %v5116_v44 = vpack.c.bf16 %v5115_v40, %v5114_v38 }
0x420a   :  { %6683 = vmatmul.mubr.msk.bf16.vlgmr.msra.gmra.mrb[156].mxu0 %vm191_vm3, %v5116_v44 }
0x420b   :  { %6693 = vmatpush3.bf16.xpose.msra.mxu0 %v5224_v45  ;;  %6694 = vmatprep.mubr.msk.bf16.mxu0 %vm7116_vm1, %v7115_v8 }
0x420c   :  { %6704 = vmatprep.subr.bf16.mxu0 %v7115_v8 }
0x4212   :  { %6695 = vmatmul.mubr.msk.bf16.vlgmr.msra.gmra.mrb[160].mxu0 %vm143_vm2, %v5217_v50  ;;  %v6790_v50 = vld [vmem:[%s8456_s6 + $0x30] sm:$0xff]  }
0x4213   :  { %6706 = vmatprep.mubr.msk.bf16.mxu0 %vm7116_vm1, %v7115_v8 }
0x42dd   :  { %v5157_v7 = vpop.f32.mrb[156].mxu0 }
0x42de   :  { %v6684_v53 = vpop.f32.mrb[157].mxu0 }
0x42df   :  { %v5160_v22 = vpop.f32.mrb[158].mxu0 }
0x42e0   :  { %v5164_v56 = vpack.c.bf16 %v5160_v22, %v5157_v7  ;;  %v6685_v61 = vpop.f32.mrb[159].mxu0 }
0x42e2   :  { %6689 = vmatmul.mubr.msk.bf16.vlgmr.msra.gmra.mrb[168].mxu1 %vm143_vm2, %v5164_v56 }
0x42e3   :  { %6700 = vmatprep.mubr.msk.bf16.mxu1 %vm7116_vm1, %v7115_v8 }
0x42e5   :  { %v5260_v63 = vpop.f32.mrb[160].mxu0 }
0x42e6   :  { %v5261_v30 = vadd.f32 %v7050_v27, %v5260_v63  ;;  %v6696_v6 = vpop.f32.mrb[161].mxu0 }
0x42e7   :  { %v5263_v11 = vpop.f32.mrb[162].mxu0  ;;  %v5924_v6 = vld [vmem:[%s8453_s3 + $0x9] ss:$0 sm:$0xff] }
0x42e8   :  { %v5264_v13 = vadd.f32 %v7051_v12, %v5263_v11  ;;  %v6697_v14 = vpop.f32.mrb[163].mxu0  ;;  %v5267_v15 = vsel %vm191_vm3, %v5261_v30, -inf }
0x42e9   :  { %5268 = vmax.xlane.f32.xlu0 %v5267_v15  ;;  %v6794_v15 = vld [vmem:[%s8457_s7 + $0x70] sm:$0xff]  }
0x42ea   :  { %v5270_v16 = vsel %vm191_vm3, %v5264_v13, -inf }
0x42eb   :  { %5271 = vmax.xlane.f32.xlu1 %v5270_v16  ;;  %v6795_v16 = vld [vmem:[%s8457_s7 + $0x78] sm:$0xff]  }
0x42fc   :  { %5290 = vrot.lane.b32.xlu1 %v8220_v10, %s7126_s0 }
0x4376   :  { %v5269_v31 = vpop.xlane.xlu0 %5268 }
0x4377   :  { %v5273_v5 = vsub.f32 %v5261_v30, %v5269_v31 }
0x4378   :  { %v5272_v9 = vpop.xlane.xlu1 %5271 }
0x4379   :  { %v5275_v17 = vmul.f32 1.442695, %v5273_v5  ;;  %v5274_v51 = vsub.f32 %v5264_v13, %v5272_v9 }
0x437b   :  { %7018 = vpow2.f32 %v5275_v17  ;;  %v5277_v0 = vmul.f32 1.442695, %v5274_v51 }
0x437c   :  { %v5291_v18 = vpop.permute.xlu1 %5290 }
0x437d   :  { %7020 = vpow2.f32 %v5277_v0  ;;  %6699 = vmatpush3.bf16.msra.mxu1 %v5291_v18 }
0x437e   :  { %6710 = vmatprep.subr.bf16.mxu1 %v7115_v8 }
0x4385   :  { %v7019_v1 = vpop.eup %7018 }
0x4386   :  { %v5279_v41 = vsel %vm191_vm3, %v7019_v1, 0.0 }
0x4387   :  { %v7021_v37 = vpop.eup %7020  ;;  %5280 = vadd.xlane.f32.xlu0 %v5279_v41 }
0x4388   :  { %v5282_v59 = vsel %vm191_vm3, %v7021_v37, 0.0 }
0x438b   :  { %5283 = vadd.xlane.f32.xlu0 %v5282_v59 }
0x43b5   :  { %v5207_v10 = vpop.f32.mrb[168].mxu1 }
0x43b6   :  { %v5214_v43 = vadd.f32 %v5207_v10, %v8314_v19  ;;  %v6690_v39 = vpop.f32.mrb[169].mxu1  ;;  %v5921_v19 = vld [vmem:[%s8455_s5 + $0x5c] sm:$0xf] }
0x43b7   :  { %v5210_v25 = vpop.f32.mrb[170].mxu1 }
0x43b8   :  { %v5215_v48 = vadd.f32 %v5210_v25, %v8316_v20  ;;  %v6691_v28 = vpop.f32.mrb[171].mxu1  ;;  %v5344_v20 = vsel %vm394_vm4, %v5921_v19, 0 }
0x43b9   :  { %6705 = vmatpush3.bf16.msra.mxu0 %v5344_v20 }
0x43ba   :  { %6718 = vmatprep.subr.bf16.mxu0 %v7115_v8 }
0x4414   :  { %v5281_v23 = vpop.xlane.xlu0 %5280 }
0x4415   :  { %7022 = vrcp.f32 %v5281_v23  ;;  %v6796_v23 = vld [vmem:[%s8460_s10] sm:$0xff]  }
0x4418   :  { %v5284_v49 = vpop.xlane.xlu0 %5283 }
0x4419   :  { %7024 = vrcp.f32 %v5284_v49  ;;  %v6797_v49 = vld [vmem:[%s8460_s10 + $0x8] sm:$0xff]   ;;  %s5947_s10 = sld [smem:[#allocation3 + $0x1]] }
0x441f   :  { %v7023_v24 = vpop.eup %7022  ;;  %s5595_s24 = scalar_lea.vmem [#allocation6], %s5947_s10 }
0x4420   :  { %v5287_v55 = vmul.f32 %v7023_v24, %v7019_v1 }
0x4423   :  { %v7025_v58 = vpop.eup %7024 }
0x4424   :  { %v5288_v2 = vmul.f32 %v7025_v58, %v7021_v37 }
0x4426   :  { %v5289_v60 = vpack.c.bf16 %v5288_v2, %v5287_v55 }
0x4428   :  { %6701 = vmatmul.mubr.msk.bf16.vlgmr.msra.gmra.mrb[172].mxu1 %vm191_vm3, %v5289_v60 }
0x4429   :  { %6714 = vmatprep.mubr.msk.bf16.mxu1 %vm7116_vm1, %v7115_v8  ;;  %6711 = vmatpush3.bf16.msra.mxu1 %v6790_v50 }
0x442a   :  { %6712 = vmatprep.subr.bf16.mxu1 %v7115_v8 }
0x44fb   :  { %v5330_v26 = vpop.f32.mrb[172].mxu1 }
0x44fc   :  { %v6702_v52 = vpop.f32.mrb[173].mxu1 }
0x44fd   :  { %v5333_v29 = vpop.f32.mrb[174].mxu1 }
0x44fe   :  { %v5337_v54 = vpack.c.bf16 %v5333_v29, %v5330_v26  ;;  %v6703_v47 = vpop.f32.mrb[175].mxu1  ;;  %v5946_v26 = vld [vmem:[%s8453_s3 + $0xb] ss:$0 sm:$0xff]  ;;  %s7128_s3 = smov [#allocation6]  }
0x44ff   :  { %s5678_s25 = sshll.u32 %s7128_s3, 4  ;;  %s5679_s25 = int_to_ptr.vmem [resolvable:$true] %s5678_s25 }
0x4500   :  { %6707 = vmatmul.mubr.msk.bf16.vlgmr.msra.gmra.mrb[164].mxu0 %vm143_vm2, %v5337_v54  ;;  %s7064_s1 = scalar_lea.vmem %s5679_s25, 256  ;;  %p7069_p6 = scmp.lt.s32.totalorder %s5679_s25, %s5679_s25 }
0x4501   :  { %6726 = vmatprep.mubr.msk.bf16.mxu0 %vm7116_vm1, %v7115_v8  ;;  %p7065_p5 = scmp.ne.s32.totalorder %s5679_s25, %s7064_s1  ;;  %p7070_p7 = scmp.lt.s32.totalorder %s7064_s1, %s7064_s1 }
0x4503   :  { %p7071_p8 = por %p7070_p7, %p7069_p6 }
0x4505   :  { %p7072_p9 = pnand %p7071_p8, %p7065_p5 }
0x45d3   :  { %v5380_v62 = vpop.f32.mrb[164].mxu0 }
0x45d4   :  { %v5387_v32 = vadd.f32 %v5380_v62, %v5214_v43  ;;  %v6708_v57 = vpop.f32.mrb[165].mxu0 }
0x45d5   :  { %v5383_v33 = vpop.f32.mrb[166].mxu0 }
0x45d6   :  { %v5389_v34 = vadd.f32 %v5387_v32, %v8210_v4  ;;  %v5388_v35 = vadd.f32 %v5383_v33, %v5215_v48  ;;  %v6709_v36 = vpop.f32.mrb[167].mxu0  ;;  %v6791_v4 = vld [vmem:[%s8456_s6 + $0x38] sm:$0xff]  }
0x45d7   :  { %6713 = vmatpush3.bf16.msra.mxu1 %v6791_v4 }
0x45d8   :  { %v5390_v38 = vadd.f32 %v5388_v35, %v8213_v21  ;;  %v5391_v40 = vmul.f32 %v5389_v34, %v5389_v34  ;;  %6730 = vmatprep.subr.bf16.mxu1 %v7115_v8  ;;  %v6792_v21 = vld [vmem:[%s8457_s7 + $0x60] sm:$0xff]  }
0x45d9   :  { %6719 = vmatpush3.bf16.msra.mxu0 %v6792_v21 }
0x45da   :  { %v5393_v42 = vsel %vm51_vm0, %v5391_v40, 0.0  ;;  %v5392_v44 = vmul.f32 %v5390_v38, %v5390_v38  ;;  %6720 = vmatprep.subr.bf16.mxu0 %v7115_v8 }
0x45db   :  { %5394 = vadd.xlane.f32.xlu0 %v5393_v42 }
0x45dc   :  { %v5396_v45 = vsel %vm51_vm0, %v5392_v44, 0.0 }
0x45dd   :  { %6721 = vmatpush3.bf16.msra.mxu0 %v6793_v3 }
0x45de   :  { %6722 = vmatprep.subr.bf16.mxu0 %v7115_v8 }
0x45df   :  { %5397 = vadd.xlane.f32.xlu0 %v5396_v45 }
0x45e1   :  { %6723 = vmatpush3.bf16.msra.mxu0 %v6794_v15 }
0x45e2   :  { %6724 = vmatprep.subr.bf16.mxu0 %v7115_v8 }
0x45e5   :  { %6725 = vmatpush3.bf16.msra.mxu0 %v6795_v16 }
0x4668   :  { %v5395_v46 = vpop.xlane.xlu0 %5394 }
0x4669   :  { %v5399_v7 = vmul.f32 0.03125, %v5395_v46 }
0x466b   :  { %v5401_v53 = vadd.f32 1e-06, %v5399_v7 }
0x466c   :  { %v5398_v22 = vpop.xlane.xlu0 %5397 }
0x466d   :  { %7026 = vrsqrt.f32 %v5401_v53  ;;  %v5400_v56 = vmul.f32 0.03125, %v5398_v22 }
0x466f   :  { %v5402_v61 = vadd.f32 1e-06, %v5400_v56 }
0x4671   :  { %7028 = vrsqrt.f32 %v5402_v61 }
0x4677   :  { %v7027_v63 = vpop.eup %7026 }
0x4678   :  { %v5405_v27 = vmul.f32 %v7027_v63, %v5389_v34 }
0x467a   :  { %v5415_v12 = vmul.f32 %v5924_v6, %v5405_v27 }
0x467b   :  { %v7029_v30 = vpop.eup %7028 }
0x467c   :  { %v5406_v11 = vmul.f32 %v7029_v30, %v5390_v38 }
0x467e   :  { %v5416_v13 = vmul.f32 %v5924_v6, %v5406_v11 }
0x4680   :  { %v5422_v14 = vpack.c.bf16 %v5416_v13, %v5415_v12 }
0x4682   :  { %6715 = vmatmul.mubr.msk.bf16.vlgmr.msra.gmra.mrb[176].mxu1 %vm51_vm0, %v5422_v14 }
0x4683   :  { %6734 = vmatprep.mubr.msk.bf16.mxu1 %vm7116_vm1, %v7115_v8  ;;  %6731 = vmatpush3.bf16.msra.mxu1 %v6796_v23 }
0x4684   :  { %6732 = vmatprep.subr.bf16.mxu1 %v7115_v8 }
0x4687   :  { %6733 = vmatpush3.bf16.msra.mxu1 %v6797_v49 }
0x4755   :  { %v5472_v31 = vpop.f32.mrb[176].mxu1 }
0x4756   :  { %v6716_v5 = vpop.f32.mrb[177].mxu1  ;;  %v5479_v17 = vmax.f32 %v5472_v31, 0.0 }
0x4757   :  { %v5475_v9 = vpop.f32.mrb[178].mxu1 }
0x4758   :  { %v5480_v51 = vmax.f32 %v5475_v9, 0.0  ;;  %v6717_v0 = vpop.f32.mrb[179].mxu1 }
0x475a   :  { %v5490_v18 = vpack.c.bf16 %v5480_v51, %v5479_v17 }
0x475c   :  { %6727 = vmatmul.mubr.msk.bf16.vlgmr.msra.gmra.mrb[168].mxu0 %vm962_vm5, %v5490_v18 }
0x482f   :  { %v5552_v1 = vpop.f32.mrb[168].mxu0 }
0x4830   :  { %v5559_v41 = vadd.f32 %v5552_v1, %v5389_v34  ;;  %v6728_v37 = vpop.f32.mrb[169].mxu0 }
0x4831   :  { %v5555_v59 = vpop.f32.mrb[170].mxu0 }
0x4832   :  { %v5561_v10 = vmul.f32 %v5559_v41, %v5559_v41  ;;  %v5560_v43 = vadd.f32 %v5555_v59, %v5390_v38  ;;  %v6729_v39 = vpop.f32.mrb[171].mxu0 }
0x4834   :  { %v5562_v25 = vmul.f32 %v5560_v43, %v5560_v43  ;;  %v5563_v48 = vsel %vm51_vm0, %v5561_v10, 0.0 }
0x4835   :  { %5564 = vadd.xlane.f32.xlu0 %v5563_v48 }
0x4836   :  { %v5566_v28 = vsel %vm51_vm0, %v5562_v25, 0.0 }
0x4839   :  { %5567 = vadd.xlane.f32.xlu0 %v5566_v28 }
0x48c2   :  { %v5565_v24 = vpop.xlane.xlu0 %5564 }
0x48c3   :  { %v5569_v58 = vmul.f32 0.03125, %v5565_v24 }
0x48c5   :  { %v5571_v55 = vadd.f32 1e-06, %v5569_v58 }
0x48c6   :  { %v5568_v2 = vpop.xlane.xlu0 %5567 }
0x48c7   :  { %7030 = vrsqrt.f32 %v5571_v55  ;;  %v5570_v60 = vmul.f32 0.03125, %v5568_v2 }
0x48c9   :  { %v5572_v19 = vadd.f32 1e-06, %v5570_v60 }
0x48cb   :  { %7032 = vrsqrt.f32 %v5572_v19 }
0x48d1   :  { %v7031_v20 = vpop.eup %7030 }
0x48d2   :  { %v5575_v52 = vmul.f32 %v7031_v20, %v5559_v41 }
0x48d4   :  { %v5585_v29 = vmul.f32 %v5946_v26, %v5575_v52 }
0x48d5   :  { %v7033_v54 = vpop.eup %7032 }
0x48d6   :  { %5587 = vst.msk [vmem:[#allocation6] sm:$0xff] %vm51_vm0, %v5585_v29  ;;  %v5576_v8 = vmul.f32 %v7033_v54, %v5560_v43 }
0x48d8   :  { %v5586_v47 = vmul.f32 %v5946_v26, %v5576_v8 }
0x48da   :  { %5588 = vst.msk [vmem:[#allocation6 + $0x8] sm:$0xff] %vm51_vm0, %v5586_v47 }
0x48e1   :  { %v5596_v62 = vld [vmem:[%s5595_s24] sm:$0x1] }
0x48e2   :  { %v5598_v32 = vrot.slane %v5596_v62, 7  ;;  %v5592_v57 = vld [vmem:[%s5591_s26] sm:$0x1] }
0x48e4   :  { %v5601_v33 = vsel %vm5600_vm6, %v5592_v57, %v5598_v32 }
0x48e5   :  { %v5602_v34 = vpack.c.bf16 %v5601_v33, %v5601_v33 }
0x48e7   :  { %6735 = vmatmul.mubr.msk.bf16.vlgmr.msra.gmra.mrb[180].mxu1 %vm51_vm0, %v5602_v34 }
0x48e8   :  { %7075 = shalt.err (!%p7072_p9)
}
0x48e9   :  { %s7076_s5 = scalar_lea.hbm %s8462_s12, 256 }
0x48ea   :  { %p7077_p10 = scmp.ne.s32.totalorder %s8462_s12, %s7076_s5  ;;  %p7080_p11 = scmp.lt.u32.totalorder %s7076_s5, %s8462_s12 }
0x48ec   :  { %p7082_p12 = pnand %p7080_p11, %p7077_p10 }
0x48ee   :  { %7085 = shalt.err (!%p7082_p12)
}
0x48ef   :  { %s7129_s29 = smov 128   ;;  %s7130_s23 = smov 8  }
0x48f0   :  { %5684 = dma.vmem_to_hbm [thread:$0]  %s5679_s25, 256, %s8462_s12, [#allocation7], %s7129_s29, %s7129_s29, %s7130_s23  }
0x48f1   :  { %s7131_s16 = smov [#allocation4]  }
0x48f2   :  { %s5669_s20 = sshll.u32 %s7131_s16, 4  ;;  %s5670_s20 = int_to_ptr.vmem [resolvable:$true] %s5669_s20 }
0x48f3   :  { %s7086_s21 = scalar_lea.vmem %s5670_s20, 32  ;;  %p7091_p0 = scmp.lt.s32.totalorder %s5670_s20, %s5670_s20 }
0x48f4   :  { %p7087_p13 = scmp.ne.s32.totalorder %s5670_s20, %s7086_s21  ;;  %p7092_p1 = scmp.lt.s32.totalorder %s7086_s21, %s7086_s21 }
0x48f6   :  { %p7093_p2 = por %p7092_p1, %p7091_p0 }
0x48f8   :  { %p7094_p3 = pnand %p7093_p2, %p7087_p13 }
0x49ba   :  { %v5656_v35 = vpop.f32.mrb[180].mxu1 }
0x49bb   :  { %5662 = vst [vmem:[#allocation4] sm:$0x3] %v5656_v35  ;;  %v6736_v36 = vpop.f32.mrb[181].mxu1 }
0x49bc   :  { %v5659_v38 = vpop.f32.mrb[182].mxu1 }
0x49bd   :  { %7097 = shalt.err (!%p7094_p3)
}
0x49be   :  { %s7098_s7 = scalar_lea.hbm %s8461_s11, 32 }
0x49bf   :  { %p7099_p4 = scmp.ne.s32.totalorder %s8461_s11, %s7098_s7  ;;  %p7102_p5 = scmp.lt.u32.totalorder %s7098_s7, %s8461_s11 }
0x49c1   :  { %p7104_p6 = pnand %p7102_p5, %p7099_p4 }
0x49c3   :  { %7107 = shalt.err (!%p7104_p6)
}
0x49c4   :  { %5672 = dma.vmem_to_hbm [thread:$0]  %s5670_s20, 32, %s8461_s11, [#allocation5]   ;;  %v6737_v40 = vpop.f32.mrb[183].mxu1 }
0x49c5   :  { %7110 = dma.done.wait [#allocation5], 32  }
0x49c6   :  { %7111 = vsyncadd [#allocation5], 4294967264 }
0x49c7   :  { %7112 = dma.done.wait [#allocation7], 256  }
0x49c8   :  { %7113 = vsyncadd [#allocation7], 4294967040 }
0x49c9   :  { %5691 = vsyncpa [#allocation5], 1 }
0x49ca   :  { %5692 = vsyncpa [#allocation7], 1 }

</bundles_post_ra>
